<compile_context>
chip_gen: v7x
topology: tpu7x:2x2x1
jax: 0.10.0
libtpu: 0.0.40
codegen_flags: <defaults>
</compile_context>

<pallas_src>
import functools

import jax
import jax.numpy as jnp
from jax.experimental import pallas as pl
from jax.experimental.pallas import tpu as pltpu

NEG_SLOPE = 0.01  # nn.LeakyReLU() default
BN_EPS = 1e-5     # nn.BatchNorm1d default


def _round_up(x, m):
    return ((x + m - 1) // m) * m


def _leaky_relu(x):
    # max(x, 0.01*x): 2 VALU ops (mul+max) vs 3 (cmp+mul+select).
    return jnp.maximum(x, NEG_SLOPE * x)


def _bf16_vpu_available():
    """True on chips with bf16 VPU ALUs (v6e / v7x); False on v5e and older."""
    try:
        kind = jax.devices()[0].device_kind.lower()
    except Exception:
        return False
    return any(t in kind for t in ("v6", "v7", "7x")) and "v5" not in kind


def decoder_kernel(z_ref,
                   w1_ref, c1_ref,
                   w2_ref, c2_ref,
                   w3_ref, c3_ref,
                   w4_ref, b4_ref,
                   o_ref, *, ew_bf16):
    def layer(h, w_ref, c_ref):
        acc = jnp.dot(h, w_ref[...], preferred_element_type=jnp.float32)
        if ew_bf16:
            # v6e/v7x: bf16 VPU -> bias add + LeakyReLU in bf16; feeds the
            # next MXU dot directly (no extra full-width cast).
            hb = acc.astype(jnp.bfloat16) + c_ref[...]
            return _leaky_relu(hb)
        # v5e: f32-only VPU; keep elementwise in f32, cast once for the MXU.
        hf = _leaky_relu(acc + c_ref[...])
        return hf.astype(jnp.bfloat16)

    # Dropout(p=0.1) is identity in eval mode; BN is folded into w/c offline.
    h = layer(z_ref[...], w1_ref, c1_ref)   # z arrives already bf16
    h = layer(h, w2_ref, c2_ref)
    h = layer(h, w3_ref, c3_ref)
    o = jnp.dot(h, w4_ref[...], preferred_element_type=jnp.float32)
    o_ref[...] = (o + b4_ref[...]).astype(o_ref.dtype)


def prepare_params(params, ew_bf16=None):
    """One-time offline prep: fold BN into the fc weights, transpose, cast.

      W_i' = W_i.T * s_i   (s_i = gamma_i / sqrt(var_i + eps), per column)
      c_i  = b_i * s_i + (beta_i - mean_i * s_i)

    c1..c3 are stored in bf16 when the elementwise path runs in bf16
    (v6e / v7x), f32 otherwise; decoder_forward keys the kernel variant off
    that dtype.  All transposes / folds happen exactly once, offline.
    """
    if ew_bf16 is None:
        ew_bf16 = _bf16_vpu_available()
    c_dtype = jnp.bfloat16 if ew_bf16 else jnp.float32

    def fold(w, b, g, beta, m, v):
        s = g / jnp.sqrt(v + BN_EPS)                     # [out]
        w_t = (w.T * s[None, :]).astype(jnp.bfloat16)    # [in, out]
        c = (b * s + (beta - m * s)).reshape(1, -1).astype(c_dtype)
        return w_t, c

    prep = {}
    for i in (1, 2, 3):
        prep[f"w{i}"], prep[f"c{i}"] = fold(
            params[f"w{i}"], params[f"b{i}"],
            params[f"bn{i}_g"], params[f"bn{i}_b"],
            params[f"bn{i}_m"], params[f"bn{i}_v"])
    prep["w4"] = params["w4"].T.astype(jnp.bfloat16)      # [in, out]
    prep["b4"] = params["b4"].reshape(1, -1).astype(jnp.float32)
    return prep


def _auto_tile_b(B):
    # Single 16-aligned tile for small batches; otherwise ~512-row tiles with
    # an EVEN tile count so the ("parallel",) grid balances over 2 TCs (v7x).
    if B <= 512:
        return max(16, _round_up(B, 16))
    n = -(-B // 512)
    if n > 1 and n % 2 == 1:
        n += 1
    return max(16, _round_up(-(-B // n), 16))


def decoder_forward(z, prep, tile_b=None):
    """z: [B, latent_dim] float32.  prep: output of prepare_params()."""
    B, K = z.shape
    out_dim = prep["w4"].shape[1]
    ew_bf16 = prep["c1"].dtype == jnp.bfloat16

    if tile_b is None:
        tile_b = _auto_tile_b(B)
    tile_b = max(16, _round_up(int(tile_b), 16))

    # Cast activations once here: halves z DMA bytes, no in-kernel cast.
    z = z.astype(jnp.bfloat16)
    B_pad = _round_up(B, tile_b)
    if B_pad != B:
        z = jnp.pad(z, ((0, B_pad - B), (0, 0)))
    grid = (B_pad // tile_b,)

    def act_map(i):
        return (i, 0)

    def const_map(i):
        return (0, 0)

    weight_keys = ("w1", "c1", "w2", "c2", "w3", "c3", "w4", "b4")
    weight_args = [prep[k] for k in weight_keys]

    flops = 2 * B_pad * (K * 256 + 256 * 512 + 512 * 1024 + 1024 * out_dim)
    bytes_accessed = (
        sum(int(a.size) * a.dtype.itemsize for a in weight_args)
        + int(z.size) * z.dtype.itemsize
        + B_pad * out_dim * 4)
    cost = pl.CostEstimate(flops=flops, transcendentals=0,
                           bytes_accessed=bytes_accessed)

    kernel = functools.partial(decoder_kernel, ew_bf16=ew_bf16)

    def build(single_buffer_weights):
        def w_spec(arr):
            # Constant index_map => DMA'd once, VMEM-resident across all batch
            # tiles; single buffering drops the redundant second buffer.
            if single_buffer_weights:
                return pl.BlockSpec(arr.shape, const_map,
                                    pipeline_mode=pl.Buffered(1))
            return pl.BlockSpec(arr.shape, const_map)

        in_specs = [pl.BlockSpec((tile_b, K), act_map)]        # z (pipelined)
        in_specs += [w_spec(a) for a in weight_args]
        out_spec = pl.BlockSpec((tile_b, out_dim), act_map)

        return pl.pallas_call(
            kernel,
            out_shape=jax.ShapeDtypeStruct((B_pad, out_dim), jnp.float32),
            grid_spec=pltpu.PrefetchScalarGridSpec(
                num_scalar_prefetch=0,
                grid=grid,
                in_specs=in_specs,
                out_specs=out_spec,
            ),
            compiler_params=pltpu.CompilerParams(
                dimension_semantics=("parallel",)),   # shard batch tiles over TCs
            cost_estimate=cost,
        )

    try:
        out = build(True)(z, *weight_args)
    except Exception:
        # pipeline_mode=pl.Buffered(1) unsupported on this JAX build; fall
        # back to default double buffering (pure VMEM-hygiene loss only).
        out = build(False)(z, *weight_args)

    return out[:B] if B_pad != B else out


def init_params(key, latent_dim, output_dim):
    """Deterministic synthetic parameters matching the PyTorch module's shapes."""
    dims = [(latent_dim, 256), (256, 512), (512, 1024), (1024, output_dim)]
    params = {}
    keys = jax.random.split(key, 8)
    for i, (fan_in, fan_out) in enumerate(dims, start=1):
        bound = 1.0 / jnp.sqrt(fan_in)
        params[f"w{i}"] = jax.random.uniform(
            keys[2 * (i - 1)], (fan_out, fan_in), jnp.float32, -bound, bound)
        params[f"b{i}"] = jax.random.uniform(
            keys[2 * (i - 1) + 1], (fan_out,), jnp.float32, -bound, bound)
    for i, width in enumerate([256, 512, 1024], start=1):
        params[f"bn{i}_g"] = jnp.ones((width,), jnp.float32)
        params[f"bn{i}_b"] = jnp.zeros((width,), jnp.float32)
        params[f"bn{i}_m"] = jnp.zeros((width,), jnp.float32)
        params[f"bn{i}_v"] = jnp.ones((width,), jnp.float32)
    return params


def decoder_ref_f32(z, params):
    """Pure-JAX f32 reference (eval-mode module semantics)."""
    h = z
    for i in (1, 2, 3):
        h = h @ params[f"w{i}"].T + params[f"b{i}"]
        scale = params[f"bn{i}_g"] / jnp.sqrt(params[f"bn{i}_v"] + BN_EPS)
        h = (h - params[f"bn{i}_m"]) * scale + params[f"bn{i}_b"]
        h = jnp.where(h > 0, h, NEG_SLOPE * h)
    return h @ params["w4"].T + params["b4"]


def decoder_ref_prep(z, prep):
    """Dtype-matched reference: same bf16 weights / MXU inputs / elementwise
    dtype path as the kernel -> supports a tight tolerance check."""
    ew_bf16 = prep["c1"].dtype == jnp.bfloat16
    h = z.astype(jnp.bfloat16)
    for i in (1, 2, 3):
        acc = jnp.dot(h, prep[f"w{i}"], preferred_element_type=jnp.float32)
        if ew_bf16:
            hb = acc.astype(jnp.bfloat16) + prep[f"c{i}"]
            h = jnp.maximum(hb, NEG_SLOPE * hb)
        else:
            hf = acc + prep[f"c{i}"]
            h = jnp.maximum(hf, NEG_SLOPE * hf).astype(jnp.bfloat16)
    o = jnp.dot(h, prep["w4"], preferred_element_type=jnp.float32)
    return o + prep["b4"]


if __name__ == "__main__":
    latent_dim = 32
    output_dim = 128

    key = jax.random.PRNGKey(0)
    k_params, k_z1, k_z2 = jax.random.split(key, 3)
    params = init_params(k_params, latent_dim, output_dim)

    # One-time offline prep (BN fold, transpose, bf16 cast) — out of the
    # per-call path.
    prep = jax.block_until_ready(prepare_params(params))

    # Case 1: small batch (not a multiple of 16) -> single 32-row tile, grid=(1,).
    z_small = jax.random.normal(k_z1, (20, latent_dim), jnp.float32)
    # Case 2: larger batch -> multi-tile pipelined path with an even tile count.
    z_big = jax.random.normal(k_z2, (600, latent_dim), jnp.float32)

    for z in (z_small, z_big):
        out = jax.block_until_ready(decoder_forward(z, prep))
        assert out.shape == (z.shape[0], output_dim)

        # Tight check against the dtype-matched (bf16-weight) reference.
        ref_prep = decoder_ref_prep(z, prep)
        assert jnp.allclose(out, ref_prep, atol=1e-3, rtol=1e-2), (
            float(jnp.max(jnp.abs(out - ref_prep))))

        # Loose sanity check against the pure-f32 module semantics.
        ref_f32 = decoder_ref_f32(z, params)
        assert jnp.allclose(out, ref_f32, atol=5e-2, rtol=5e-2), (
            float(jnp.max(jnp.abs(out - ref_f32))))

    print("KERNEL_OK")
</pallas_src>

<mosaic_0001>
module attributes {stable_mosaic.version = 11 : i64} {
  func.func @decoder_kernel(%arg0: i32, %arg1: memref<32x32xbf16, #tpu.memory_space<vmem>>, %arg2: memref<32x256xbf16, #tpu.memory_space<vmem>>, %arg3: memref<1x256xf32, #tpu.memory_space<vmem>>, %arg4: memref<256x512xbf16, #tpu.memory_space<vmem>>, %arg5: memref<1x512xf32, #tpu.memory_space<vmem>>, %arg6: memref<512x1024xbf16, #tpu.memory_space<vmem>>, %arg7: memref<1x1024xf32, #tpu.memory_space<vmem>>, %arg8: memref<1024x128xbf16, #tpu.memory_space<vmem>>, %arg9: memref<1x128xf32, #tpu.memory_space<vmem>>, %arg10: memref<32x128xf32, #tpu.memory_space<vmem>>) attributes {dimension_semantics = [#tpu.dimension_semantics<parallel>], iteration_bounds = array<i64: 1>, scalar_prefetch = 0 : i64, scratch_operands = 0 : i64, tpu.core_type = #tpu.core_type<tc>, window_params = [{transform_indices = @transform_0, window_bounds = array<i64: 32, 32>}, {pipeline_mode = #tpu.pipeline_mode<synchronous>, transform_indices = @transform_1, window_bounds = array<i64: 32, 256>}, {pipeline_mode = #tpu.pipeline_mode<synchronous>, transform_indices = @transform_2, window_bounds = array<i64: 1, 256>}, {pipeline_mode = #tpu.pipeline_mode<synchronous>, transform_indices = @transform_3, window_bounds = array<i64: 256, 512>}, {pipeline_mode = #tpu.pipeline_mode<synchronous>, transform_indices = @transform_4, window_bounds = array<i64: 1, 512>}, {pipeline_mode = #tpu.pipeline_mode<synchronous>, transform_indices = @transform_5, window_bounds = array<i64: 512, 1024>}, {pipeline_mode = #tpu.pipeline_mode<synchronous>, transform_indices = @transform_6, window_bounds = array<i64: 1, 1024>}, {pipeline_mode = #tpu.pipeline_mode<synchronous>, transform_indices = @transform_7, window_bounds = array<i64: 1024, 128>}, {pipeline_mode = #tpu.pipeline_mode<synchronous>, transform_indices = @transform_8, window_bounds = array<i64: 1, 128>}, {transform_indices = @transform_9, window_bounds = array<i64: 32, 128>}]} {
    %c0 = arith.constant 0 : index
    %c0_0 = arith.constant 0 : index
    %0 = vector.load %arg1[%c0, %c0_0] : memref<32x32xbf16, #tpu.memory_space<vmem>>, vector<32x32xbf16>
    %c0_1 = arith.constant 0 : index
    %c0_2 = arith.constant 0 : index
    %1 = vector.load %arg2[%c0_1, %c0_2] : memref<32x256xbf16, #tpu.memory_space<vmem>>, vector<32x256xbf16>
    %cst = arith.constant dense<0.000000e+00> : vector<32x256xf32>
    %2 = tpu.matmul %0, %1, %cst {dimension_numbers = #tpu.dot_dimension_numbers<[1], [0], [0], [1], [0, 0, 1, 1], [], []>} : vector<32x32xbf16>, vector<32x256xbf16>, vector<32x256xf32> -> vector<32x256xf32>
    %c0_3 = arith.constant 0 : index
    %c0_4 = arith.constant 0 : index
    %3 = vector.load %arg3[%c0_3, %c0_4] : memref<1x256xf32, #tpu.memory_space<vmem>>, vector<1x256xf32>
    %4 = vector.broadcast %3 : vector<1x256xf32> to vector<32x256xf32>
    %5 = arith.addf %2, %4 : vector<32x256xf32>
    %cst_5 = arith.constant 0.00999999977 : f32
    %6 = vector.broadcast %cst_5 : f32 to vector<32x256xf32>
    %7 = arith.mulf %6, %5 : vector<32x256xf32>
    %8 = arith.maximumf %5, %7 : vector<32x256xf32>
    %9 = arith.truncf %8 : vector<32x256xf32> to vector<32x256xbf16>
    %c0_6 = arith.constant 0 : index
    %c0_7 = arith.constant 0 : index
    %10 = vector.load %arg4[%c0_6, %c0_7] : memref<256x512xbf16, #tpu.memory_space<vmem>>, vector<256x512xbf16>
    %cst_8 = arith.constant dense<0.000000e+00> : vector<32x512xf32>
    %11 = tpu.matmul %9, %10, %cst_8 {dimension_numbers = #tpu.dot_dimension_numbers<[1], [0], [0], [1], [0, 0, 1, 1], [], []>} : vector<32x256xbf16>, vector<256x512xbf16>, vector<32x512xf32> -> vector<32x512xf32>
    %c0_9 = arith.constant 0 : index
    %c0_10 = arith.constant 0 : index
    %12 = vector.load %arg5[%c0_9, %c0_10] : memref<1x512xf32, #tpu.memory_space<vmem>>, vector<1x512xf32>
    %13 = vector.broadcast %12 : vector<1x512xf32> to vector<32x512xf32>
    %14 = arith.addf %11, %13 : vector<32x512xf32>
    %cst_11 = arith.constant 0.00999999977 : f32
    %15 = vector.broadcast %cst_11 : f32 to vector<32x512xf32>
    %16 = arith.mulf %15, %14 : vector<32x512xf32>
    %17 = arith.maximumf %14, %16 : vector<32x512xf32>
    %18 = arith.truncf %17 : vector<32x512xf32> to vector<32x512xbf16>
    %c0_12 = arith.constant 0 : index
    %c0_13 = arith.constant 0 : index
    %19 = vector.load %arg6[%c0_12, %c0_13] : memref<512x1024xbf16, #tpu.memory_space<vmem>>, vector<512x1024xbf16>
    %cst_14 = arith.constant dense<0.000000e+00> : vector<32x1024xf32>
    %20 = tpu.matmul %18, %19, %cst_14 {dimension_numbers = #tpu.dot_dimension_numbers<[1], [0], [0], [1], [0, 0, 1, 1], [], []>} : vector<32x512xbf16>, vector<512x1024xbf16>, vector<32x1024xf32> -> vector<32x1024xf32>
    %c0_15 = arith.constant 0 : index
    %c0_16 = arith.constant 0 : index
    %21 = vector.load %arg7[%c0_15, %c0_16] : memref<1x1024xf32, #tpu.memory_space<vmem>>, vector<1x1024xf32>
    %22 = vector.broadcast %21 : vector<1x1024xf32> to vector<32x1024xf32>
    %23 = arith.addf %20, %22 : vector<32x1024xf32>
    %cst_17 = arith.constant 0.00999999977 : f32
    %24 = vector.broadcast %cst_17 : f32 to vector<32x1024xf32>
    %25 = arith.mulf %24, %23 : vector<32x1024xf32>
    %26 = arith.maximumf %23, %25 : vector<32x1024xf32>
    %27 = arith.truncf %26 : vector<32x1024xf32> to vector<32x1024xbf16>
    %c0_18 = arith.constant 0 : index
    %c0_19 = arith.constant 0 : index
    %28 = vector.load %arg8[%c0_18, %c0_19] : memref<1024x128xbf16, #tpu.memory_space<vmem>>, vector<1024x128xbf16>
    %cst_20 = arith.constant dense<0.000000e+00> : vector<32x128xf32>
    %29 = tpu.matmul %27, %28, %cst_20 {dimension_numbers = #tpu.dot_dimension_numbers<[1], [0], [0], [1], [0, 0, 1, 1], [], []>} : vector<32x1024xbf16>, vector<1024x128xbf16>, vector<32x128xf32> -> vector<32x128xf32>
    %c0_21 = arith.constant 0 : index
    %c0_22 = arith.constant 0 : index
    %30 = vector.load %arg9[%c0_21, %c0_22] : memref<1x128xf32, #tpu.memory_space<vmem>>, vector<1x128xf32>
    %31 = vector.broadcast %30 : vector<1x128xf32> to vector<32x128xf32>
    %32 = arith.addf %29, %31 : vector<32x128xf32>
    %c0_23 = arith.constant 0 : index
    %c0_24 = arith.constant 0 : index
    %33 = vector.load %arg10[%c0_23, %c0_24] : memref<32x128xf32, #tpu.memory_space<vmem>>, vector<32x128xf32>
    tpu.vector_store %arg10[%c0_23, %c0_24], %32 {strides = array<i32>} : memref<32x128xf32, #tpu.memory_space<vmem>>, vector<32x128xf32>,
    return
  }
  func.func @transform_0(%arg0: i32) -> (i32, i32) {
    %c0_i32 = arith.constant 0 : i32
    %c0_i32_0 = arith.constant 0 : i32
    return %arg0, %c0_i32 : i32, i32
  }
  func.func @transform_1(%arg0: i32) -> (i32, i32) {
    %c0_i32 = arith.constant 0 : i32
    %c0_i32_0 = arith.constant 0 : i32
    %c0_i32_1 = arith.constant 0 : i32
    return %c0_i32, %c0_i32_0 : i32, i32
  }
  func.func @transform_2(%arg0: i32) -> (i32, i32) {
    %c0_i32 = arith.constant 0 : i32
    %c0_i32_0 = arith.constant 0 : i32
    %c0_i32_1 = arith.constant 0 : i32
    return %c0_i32, %c0_i32_0 : i32, i32
  }
  func.func @transform_3(%arg0: i32) -> (i32, i32) {
    %c0_i32 = arith.constant 0 : i32
    %c0_i32_0 = arith.constant 0 : i32
    %c0_i32_1 = arith.constant 0 : i32
    return %c0_i32, %c0_i32_0 : i32, i32
  }
  func.func @transform_4(%arg0: i32) -> (i32, i32) {
    %c0_i32 = arith.constant 0 : i32
    %c0_i32_0 = arith.constant 0 : i32
    %c0_i32_1 = arith.constant 0 : i32
    return %c0_i32, %c0_i32_0 : i32, i32
  }
  func.func @transform_5(%arg0: i32) -> (i32, i32) {
    %c0_i32 = arith.constant 0 : i32
    %c0_i32_0 = arith.constant 0 : i32
    %c0_i32_1 = arith.constant 0 : i32
    return %c0_i32, %c0_i32_0 : i32, i32
  }
  func.func @transform_6(%arg0: i32) -> (i32, i32) {
    %c0_i32 = arith.constant 0 : i32
    %c0_i32_0 = arith.constant 0 : i32
    %c0_i32_1 = arith.constant 0 : i32
    return %c0_i32, %c0_i32_0 : i32, i32
  }
  func.func @transform_7(%arg0: i32) -> (i32, i32) {
    %c0_i32 = arith.constant 0 : i32
    %c0_i32_0 = arith.constant 0 : i32
    %c0_i32_1 = arith.constant 0 : i32
    return %c0_i32, %c0_i32_0 : i32, i32
  }
  func.func @transform_8(%arg0: i32) -> (i32, i32) {
    %c0_i32 = arith.constant 0 : i32
    %c0_i32_0 = arith.constant 0 : i32
    %c0_i32_1 = arith.constant 0 : i32
    return %c0_i32, %c0_i32_0 : i32, i32
  }
  func.func @transform_9(%arg0: i32) -> (i32, i32) {
    %c0_i32 = arith.constant 0 : i32
    %c0_i32_0 = arith.constant 0 : i32
    return %arg0, %c0_i32 : i32, i32
  }
}

module attributes {stable_mosaic.version = 11 : i64} {
  func.func @decoder_kernel(%arg0: i32, %arg1: memref<32x32xbf16, #tpu.memory_space<vmem>>, %arg2: memref<32x256xbf16, #tpu.memory_space<vmem>>, %arg3: memref<1x256xf32, #tpu.memory_space<vmem>>, %arg4: memref<256x512xbf16, #tpu.memory_space<vmem>>, %arg5: memref<1x512xf32, #tpu.memory_space<vmem>>, %arg6: memref<512x1024xbf16, #tpu.memory_space<vmem>>, %arg7: memref<1x1024xf32, #tpu.memory_space<vmem>>, %arg8: memref<1024x128xbf16, #tpu.memory_space<vmem>>, %arg9: memref<1x128xf32, #tpu.memory_space<vmem>>, %arg10: memref<32x128xf32, #tpu.memory_space<vmem>>) attributes {dimension_semantics = [#tpu.dimension_semantics<parallel>], iteration_bounds = array<i64: 1>, scalar_prefetch = 0 : i64, scratch_operands = 0 : i64, tpu.core_type = #tpu.core_type<tc>, window_params = [{transform_indices = @transform_0, window_bounds = array<i64: 32, 32>}, {pipeline_mode = #tpu.pipeline_mode<synchronous>, transform_indices = @transform_1, window_bounds = array<i64: 32, 256>}, {pipeline_mode = #tpu.pipeline_mode<synchronous>, transform_indices = @transform_2, window_bounds = array<i64: 1, 256>}, {pipeline_mode = #tpu.pipeline_mode<synchronous>, transform_indices = @transform_3, window_bounds = array<i64: 256, 512>}, {pipeline_mode = #tpu.pipeline_mode<synchronous>, transform_indices = @transform_4, window_bounds = array<i64: 1, 512>}, {pipeline_mode = #tpu.pipeline_mode<synchronous>, transform_indices = @transform_5, window_bounds = array<i64: 512, 1024>}, {pipeline_mode = #tpu.pipeline_mode<synchronous>, transform_indices = @transform_6, window_bounds = array<i64: 1, 1024>}, {pipeline_mode = #tpu.pipeline_mode<synchronous>, transform_indices = @transform_7, window_bounds = array<i64: 1024, 128>}, {pipeline_mode = #tpu.pipeline_mode<synchronous>, transform_indices = @transform_8, window_bounds = array<i64: 1, 128>}, {transform_indices = @transform_9, window_bounds = array<i64: 32, 128>}]} {
    %c0 = arith.constant 0 : index
    %c0_0 = arith.constant 0 : index
    %0 = vector.load %arg1[%c0, %c0_0] : memref<32x32xbf16, #tpu.memory_space<vmem>>, vector<32x32xbf16>
    %c0_1 = arith.constant 0 : index
    %c0_2 = arith.constant 0 : index
    %1 = vector.load %arg2[%c0_1, %c0_2] : memref<32x256xbf16, #tpu.memory_space<vmem>>, vector<32x256xbf16>
    %cst = arith.constant dense<0.000000e+00> : vector<32x256xf32>
    %2 = tpu.matmul %0, %1, %cst {dimension_numbers = #tpu.dot_dimension_numbers<[1], [0], [0], [1], [0, 0, 1, 1], [], []>} : vector<32x32xbf16>, vector<32x256xbf16>, vector<32x256xf32> -> vector<32x256xf32>
    %c0_3 = arith.constant 0 : index
    %c0_4 = arith.constant 0 : index
    %3 = vector.load %arg3[%c0_3, %c0_4] : memref<1x256xf32, #tpu.memory_space<vmem>>, vector<1x256xf32>
    %4 = vector.broadcast %3 : vector<1x256xf32> to vector<32x256xf32>
    %5 = arith.addf %2, %4 : vector<32x256xf32>
    %cst_5 = arith.constant 0.00999999977 : f32
    %6 = vector.broadcast %cst_5 : f32 to vector<32x256xf32>
    %7 = arith.mulf %6, %5 : vector<32x256xf32>
    %8 = arith.maximumf %5, %7 : vector<32x256xf32>
    %9 = arith.truncf %8 : vector<32x256xf32> to vector<32x256xbf16>
    %c0_6 = arith.constant 0 : index
    %c0_7 = arith.constant 0 : index
    %10 = vector.load %arg4[%c0_6, %c0_7] : memref<256x512xbf16, #tpu.memory_space<vmem>>, vector<256x512xbf16>
    %cst_8 = arith.constant dense<0.000000e+00> : vector<32x512xf32>
    %11 = tpu.matmul %9, %10, %cst_8 {dimension_numbers = #tpu.dot_dimension_numbers<[1], [0], [0], [1], [0, 0, 1, 1], [], []>} : vector<32x256xbf16>, vector<256x512xbf16>, vector<32x512xf32> -> vector<32x512xf32>
    %c0_9 = arith.constant 0 : index
    %c0_10 = arith.constant 0 : index
    %12 = vector.load %arg5[%c0_9, %c0_10] : memref<1x512xf32, #tpu.memory_space<vmem>>, vector<1x512xf32>
    %13 = vector.broadcast %12 : vector<1x512xf32> to vector<32x512xf32>
    %14 = arith.addf %11, %13 : vector<32x512xf32>
    %cst_11 = arith.constant 0.00999999977 : f32
    %15 = vector.broadcast %cst_11 : f32 to vector<32x512xf32>
    %16 = arith.mulf %15, %14 : vector<32x512xf32>
    %17 = arith.maximumf %14, %16 : vector<32x512xf32>
    %18 = arith.truncf %17 : vector<32x512xf32> to vector<32x512xbf16>
    %c0_12 = arith.constant 0 : index
    %c0_13 = arith.constant 0 : index
    %19 = vector.load %arg6[%c0_12, %c0_13] : memref<512x1024xbf16, #tpu.memory_space<vmem>>, vector<512x1024xbf16>
    %cst_14 = arith.constant dense<0.000000e+00> : vector<32x1024xf32>
    %20 = tpu.matmul %18, %19, %cst_14 {dimension_numbers = #tpu.dot_dimension_numbers<[1], [0], [0], [1], [0, 0, 1, 1], [], []>} : vector<32x512xbf16>, vector<512x1024xbf16>, vector<32x1024xf32> -> vector<32x1024xf32>
    %c0_15 = arith.constant 0 : index
    %c0_16 = arith.constant 0 : index
    %21 = vector.load %arg7[%c0_15, %c0_16] : memref<1x1024xf32, #tpu.memory_space<vmem>>, vector<1x1024xf32>
    %22 = vector.broadcast %21 : vector<1x1024xf32> to vector<32x1024xf32>
    %23 = arith.addf %20, %22 : vector<32x1024xf32>
    %cst_17 = arith.constant 0.00999999977 : f32
    %24 = vector.broadcast %cst_17 : f32 to vector<32x1024xf32>
    %25 = arith.mulf %24, %23 : vector<32x1024xf32>
    %26 = arith.maximumf %23, %25 : vector<32x1024xf32>
    %27 = arith.truncf %26 : vector<32x1024xf32> to vector<32x1024xbf16>
    %c0_18 = arith.constant 0 : index
    %c0_19 = arith.constant 0 : index
    %28 = vector.load %arg8[%c0_18, %c0_19] : memref<1024x128xbf16, #tpu.memory_space<vmem>>, vector<1024x128xbf16>
    %cst_20 = arith.constant dense<0.000000e+00> : vector<32x128xf32>
    %29 = tpu.matmul %27, %28, %cst_20 {dimension_numbers = #tpu.dot_dimension_numbers<[1], [0], [0], [1], [0, 0, 1, 1], [], []>} : vector<32x1024xbf16>, vector<1024x128xbf16>, vector<32x128xf32> -> vector<32x128xf32>
    %c0_21 = arith.constant 0 : index
    %c0_22 = arith.constant 0 : index
    %30 = vector.load %arg9[%c0_21, %c0_22] : memref<1x128xf32, #tpu.memory_space<vmem>>, vector<1x128xf32>
    %31 = vector.broadcast %30 : vector<1x128xf32> to vector<32x128xf32>
    %32 = arith.addf %29, %31 : vector<32x128xf32>
    %c0_23 = arith.constant 0 : index
    %c0_24 = arith.constant 0 : index
    %33 = vector.load %arg10[%c0_23, %c0_24] : memref<32x128xf32, #tpu.memory_space<vmem>>, vector<32x128xf32>
    tpu.vector_store %arg10[%c0_23, %c0_24], %32 {strides = array<i32>} : memref<32x128xf32, #tpu.memory_space<vmem>>, vector<32x128xf32>,
    return
  }
  func.func @transform_0(%arg0: i32) -> (i32, i32) {
    %c0_i32 = arith.constant 0 : i32
    %c0_i32_0 = arith.constant 0 : i32
    return %arg0, %c0_i32 : i32, i32
  }
  func.func @transform_1(%arg0: i32) -> (i32, i32) {
    %c0_i32 = arith.constant 0 : i32
    %c0_i32_0 = arith.constant 0 : i32
    %c0_i32_1 = arith.constant 0 : i32
    return %c0_i32, %c0_i32_0 : i32, i32
  }
  func.func @transform_2(%arg0: i32) -> (i32, i32) {
    %c0_i32 = arith.constant 0 : i32
    %c0_i32_0 = arith.constant 0 : i32
    %c0_i32_1 = arith.constant 0 : i32
    return %c0_i32, %c0_i32_0 : i32, i32
  }
  func.func @transform_3(%arg0: i32) -> (i32, i32) {
    %c0_i32 = arith.constant 0 : i32
    %c0_i32_0 = arith.constant 0 : i32
    %c0_i32_1 = arith.constant 0 : i32
    return %c0_i32, %c0_i32_0 : i32, i32
  }
  func.func @transform_4(%arg0: i32) -> (i32, i32) {
    %c0_i32 = arith.constant 0 : i32
    %c0_i32_0 = arith.constant 0 : i32
    %c0_i32_1 = arith.constant 0 : i32
    return %c0_i32, %c0_i32_0 : i32, i32
  }
  func.func @transform_5(%arg0: i32) -> (i32, i32) {
    %c0_i32 = arith.constant 0 : i32
    %c0_i32_0 = arith.constant 0 : i32
    %c0_i32_1 = arith.constant 0 : i32
    return %c0_i32, %c0_i32_0 : i32, i32
  }
  func.func @transform_6(%arg0: i32) -> (i32, i32) {
    %c0_i32 = arith.constant 0 : i32
    %c0_i32_0 = arith.constant 0 : i32
    %c0_i32_1 = arith.constant 0 : i32
    return %c0_i32, %c0_i32_0 : i32, i32
  }
  func.func @transform_7(%arg0: i32) -> (i32, i32) {
    %c0_i32 = arith.constant 0 : i32
    %c0_i32_0 = arith.constant 0 : i32
    %c0_i32_1 = arith.constant 0 : i32
    return %c0_i32, %c0_i32_0 : i32, i32
  }
  func.func @transform_8(%arg0: i32) -> (i32, i32) {
    %c0_i32 = arith.constant 0 : i32
    %c0_i32_0 = arith.constant 0 : i32
    %c0_i32_1 = arith.constant 0 : i32
    return %c0_i32, %c0_i32_0 : i32, i32
  }
  func.func @transform_9(%arg0: i32) -> (i32, i32) {
    %c0_i32 = arith.constant 0 : i32
    %c0_i32_0 = arith.constant 0 : i32
    return %arg0, %c0_i32 : i32, i32
  }
}

</mosaic_0001>

<bundles_post_ra>
// kernel: tpu_custom_call.1
= control target key start
LH: loop header
LB: loop body
LE: loop exit
PB: predicated region body
PF: predicated region fallthrough
CT: control target
= control target key end

     0   :  { %14 = vsyncpa [#allocation3], 0  ;;  %s4825_s0 = inlined_call_operand.hbm [shape: bf16[32,32], index: 0, kind: input, shape index: {}]   ;;  %s4826_s1 = inlined_call_operand.hbm [shape: bf16[32,256], index: 1, kind: input, shape index: {}]   ;;  %s4827_s2 = inlined_call_operand.vmem [shape: f32[1,256], index: 2, kind: input, shape index: {}]   ;;  %s4828_s3 = inlined_call_operand.hbm [shape: bf16[256,512], index: 3, kind: input, shape index: {}]   ;;  %s4829_s4 = inlined_call_operand.vmem [shape: f32[1,512], index: 4, kind: input, shape index: {}]   ;;  %s4830_s5 = inlined_call_operand.hbm [shape: bf16[512,1024], index: 5, kind: input, shape index: {}]   ;;  %s4831_s6 = inlined_call_operand.vmem [shape: f32[1,1024], index: 6, kind: input, shape index: {}]   ;;  %s4832_s7 = inlined_call_operand.hbm [shape: bf16[1024,128], index: 7, kind: input, shape index: {}]   ;;  %s4833_s8 = inlined_call_operand.vmem [shape: f32[1,128], index: 8, kind: input, shape index: {}]   ;;  %s4834_s9 = inlined_call_operand.hbm [shape: f32[32,128], index: 9, kind: output, shape index: {}]  }
   0x1   :  { %15 = vsyncpa [#allocation6], 0 }
   0x2   :  { %16 = vsyncpa [#allocation9], 0 }
   0x3   :  { %17 = vsyncpa [#allocation4], 0  ;;  %s4496_s30 = smov [#allocation5]   ;;  %s4356_s13 = scalar_lea.hbm %s4826_s1, 512 }
   0x4   :  { %s35_s10 = sshll.u32 %s4496_s30, 4  ;;  %p4357_p0 = scmp.ne.s32.totalorder %s4826_s1, %s4356_s13  ;;  %s36_s10 = int_to_ptr.vmem [resolvable:$true] %s35_s10 }
   0x5   :  { %p4360_p1 = scmp.lt.u32.totalorder %s4356_s13, %s4826_s1 }
   0x7   :  { %p4362_p2 = pnand %p4360_p1, %p4357_p0 }
   0x9   :  { %4365 = shalt.err (!%p4362_p2)
}
   0xa   :  { %s4366_s18 = scalar_lea.vmem %s36_s10, 512  ;;  %p4371_p4 = scmp.lt.s32.totalorder %s36_s10, %s36_s10 }
   0xb   :  { %p4367_p3 = scmp.ne.s32.totalorder %s36_s10, %s4366_s18  ;;  %p4372_p5 = scmp.lt.s32.totalorder %s4366_s18, %s4366_s18 }
   0xd   :  { %p4373_p6 = por %p4372_p5, %p4371_p4 }
   0xf   :  { %p4374_p7 = pnand %p4373_p6, %p4367_p3 }
  0x11   :  { %4377 = shalt.err (!%p4374_p7)
}
  0x12   :  { %s4497_s19 = smov 128   ;;  %s4498_s20 = smov 8  }
  0x13   :  { %41 = dma.hbm_to_vmem [thread:$0]  %s4826_s1, 512, %s36_s10, [#allocation6], %s4497_s19, %s4497_s19, %s4498_s20  }
  0x14   :  { %s4499_s23 = smov [#allocation8]   ;;  %s4378_s27 = scalar_lea.hbm %s4830_s5, 32768 }
  0x15   :  { %s63_s24 = sshll.u32 %s4499_s23, 4  ;;  %p4379_p8 = scmp.ne.s32.totalorder %s4830_s5, %s4378_s27  ;;  %s64_s24 = int_to_ptr.vmem [resolvable:$true] %s63_s24 }
  0x16   :  { %p4382_p9 = scmp.lt.u32.totalorder %s4378_s27, %s4830_s5 }
  0x18   :  { %p4384_p10 = pnand %p4382_p9, %p4379_p8 }
  0x1a   :  { %4387 = shalt.err (!%p4384_p10)
}
  0x1b   :  { %s4388_s12 = scalar_lea.vmem %s64_s24, 32768  ;;  %p4393_p12 = scmp.lt.s32.totalorder %s64_s24, %s64_s24 }
  0x1c   :  { %p4389_p11 = scmp.ne.s32.totalorder %s64_s24, %s4388_s12  ;;  %p4394_p13 = scmp.lt.s32.totalorder %s4388_s12, %s4388_s12 }
  0x1e   :  { %p4395_p0 = por %p4394_p13, %p4393_p12 }
  0x20   :  { %p4396_p1 = pnand %p4395_p0, %p4389_p11 }
  0x22   :  { %4399 = shalt.err (!%p4396_p1)
}
  0x23   :  { %s4500_s1 = smov 512   ;;  %s4501_s10 = smov 32  }
  0x24   :  { %69 = dma.hbm_to_vmem [thread:$0]  %s4830_s5, 32768, %s64_s24, [#allocation9], %s4500_s1, %s4500_s1, %s4501_s10  }
  0x25   :  { %s4502_s15 = smov [#allocation2]   ;;  %s4400_s21 = scalar_lea.hbm %s4825_s0, 256 }
  0x26   :  { %s23_s16 = sshll.u32 %s4502_s15, 4  ;;  %p4401_p2 = scmp.ne.s32.totalorder %s4825_s0, %s4400_s21  ;;  %s24_s16 = int_to_ptr.vmem [resolvable:$true] %s23_s16 }
  0x27   :  { %p4404_p3 = scmp.lt.u32.totalorder %s4400_s21, %s4825_s0 }
  0x29   :  { %p4406_p4 = pnand %p4404_p3, %p4401_p2 }
  0x2b   :  { %4409 = shalt.err (!%p4406_p4)
}
  0x2c   :  { %s4410_s27 = scalar_lea.vmem %s24_s16, 256  ;;  %p4415_p6 = scmp.lt.s32.totalorder %s24_s16, %s24_s16 }
  0x2d   :  { %p4411_p5 = scmp.ne.s32.totalorder %s24_s16, %s4410_s27  ;;  %p4416_p7 = scmp.lt.s32.totalorder %s4410_s27, %s4410_s27 }
  0x2f   :  { %p4417_p8 = por %p4416_p7, %p4415_p6 }
  0x31   :  { %p4418_p9 = pnand %p4417_p8, %p4411_p5 }
  0x33   :  { %4421 = shalt.err (!%p4418_p9)
}
  0x34   :  { %s4503_s5 = smov 64   ;;  %s4504_s24 = smov 4  }
  0x35   :  { %29 = dma.hbm_to_vmem [thread:$0]  %s4825_s0, 256, %s24_s16, [#allocation3], %s4503_s5, %s4503_s5, %s4504_s24  }
  0x36   :  { %s4505_s30 = smov [#allocation7]   ;;  %s4422_s10 = scalar_lea.hbm %s4828_s3, 8192 }
  0x37   :  { %s49_s11 = sshll.u32 %s4505_s30, 4  ;;  %p4423_p10 = scmp.ne.s32.totalorder %s4828_s3, %s4422_s10  ;;  %s50_s11 = int_to_ptr.vmem [resolvable:$true] %s49_s11 }
  0x38   :  { %p4426_p11 = scmp.lt.u32.totalorder %s4422_s10, %s4828_s3 }
  0x3a   :  { %p4428_p12 = pnand %p4426_p11, %p4423_p10 }
  0x3c   :  { %4431 = shalt.err (!%p4428_p12)
}
  0x3d   :  { %s4432_s18 = scalar_lea.vmem %s50_s11, 8192  ;;  %p4437_p0 = scmp.lt.s32.totalorder %s50_s11, %s50_s11 }
  0x3e   :  { %p4433_p13 = scmp.ne.s32.totalorder %s50_s11, %s4432_s18  ;;  %p4438_p1 = scmp.lt.s32.totalorder %s4432_s18, %s4432_s18 }
  0x40   :  { %p4439_p2 = por %p4438_p1, %p4437_p0 }
  0x42   :  { %p4440_p3 = pnand %p4439_p2, %p4433_p13 }
  0x44   :  { %4443 = shalt.err (!%p4440_p3)
}
  0x45   :  { %s4506_s0 = smov 256   ;;  %s4507_s16 = smov 16  }
  0x46   :  { %55 = dma.hbm_to_vmem [thread:$0]  %s4828_s3, 8192, %s50_s11, [#allocation6], %s4506_s0, %s4506_s0, %s4507_s16  }
  0x47   :  { %s4508_s23 = smov [#allocation10]   ;;  %s4444_s28 = scalar_lea.hbm %s4832_s7, 8192 }
  0x48   :  { %s77_s25 = sshll.u32 %s4508_s23, 4  ;;  %p4445_p4 = scmp.ne.s32.totalorder %s4832_s7, %s4444_s28  ;;  %s78_s25 = int_to_ptr.vmem [resolvable:$true] %s77_s25 }
  0x49   :  { %p4448_p5 = scmp.lt.u32.totalorder %s4444_s28, %s4832_s7 }
  0x4b   :  { %p4450_p6 = pnand %p4448_p5, %p4445_p4 }
  0x4d   :  { %4453 = shalt.err (!%p4450_p6)
}
  0x4e   :  { %s4454_s10 = scalar_lea.vmem %s78_s25, 8192  ;;  %p4459_p8 = scmp.lt.s32.totalorder %s78_s25, %s78_s25 }
  0x4f   :  { %p4455_p7 = scmp.ne.s32.totalorder %s78_s25, %s4454_s10  ;;  %p4460_p9 = scmp.lt.s32.totalorder %s4454_s10, %s4454_s10 }
  0x51   :  { %p4461_p10 = por %p4460_p9, %p4459_p8 }
  0x53   :  { %p4462_p11 = pnand %p4461_p10, %p4455_p7 }
  0x55   :  { %4465 = shalt.err (!%p4462_p11)
}
  0x56   :  { %83 = dma.hbm_to_vmem [thread:$0]  %s4832_s7, 8192, %s78_s25, [#allocation9], %s4503_s5, %s4503_s5, %s4504_s24  }
  0x57   :  { %4488 = dma.done.wait [#allocation3], 256  }
  0x58   :  { %4489 = vsyncadd [#allocation3], 4294967040 }
  0x59   :  { %4490 = dma.done.wait [#allocation6], 8704  }
  0x5a   :  { %4491 = vsyncadd [#allocation6], 4294958592 }
  0x5b   :  { %4492 = dma.done.wait [#allocation9], 40960  }
  0x5c   :  { %4493 = vsyncadd [#allocation9], 4294926336  ;;  %v4509_v0 = vmov 0   ;;  %v4188_v1 = vld [vmem:[#allocation5 + $0x4] ss:$8 sps:$4 sm:$0xff]   ;;  %v4194_v5 = vld [vmem:[#allocation2] sm:$0xff]  }
  0x5d   :  { %191 = vmatprep.mubr.bf16.mxu0 %v4509_v0  ;;  %v4190_v2 = vld [vmem:[#allocation5] ss:$8 sps:$4 sm:$0xff]   ;;  %159 = vmatprep.subr.bf16.mxu0 %v4188_v1  ;;  %v4191_v3 = vld [vmem:[#allocation5 + $0x14] ss:$8 sps:$4 sm:$0xff]   ;;  %v4193_v4 = vld [vmem:[#allocation5 + $0x10] ss:$8 sps:$4 sm:$0xff]  }
  0x5e   :  { %160 = vmatpush1.bf16.msra.mxu0 %v4190_v2  ;;  %v4196_v6 = vld [vmem:[#allocation7 + $0x4] ss:$16 sps:$4 sm:$0xff]   ;;  %v4198_v7 = vld [vmem:[#allocation7 + $0x8] ss:$16 sps:$4 sm:$0xff]   ;;  %v4200_v8 = vld [vmem:[#allocation7 + $0xc] ss:$16 sps:$4 sm:$0xff]  }
  0x5f   :  { %161 = vmatprep.subr.bf16.mxu0 %v4191_v3  ;;  %vm152_vm0 = vcmask 261120   ;;  %638 = vmatprep.subr.bf16.mxu1 %v4196_v6  ;;  %v4201_v9 = vld [vmem:[#allocation7] ss:$16 sps:$4 sm:$0xff]   ;;  %v4202_v10 = vld [vmem:[#allocation7 + $0x24] ss:$16 sps:$4 sm:$0xff]   ;;  %v4195_v17 = vld [vmem:[#allocation2 + $0x8] sm:$0xff]  }
  0x60   :  { %639 = vmatpush1.bf16.msra.mxu1 %v4201_v9  ;;  %v4206_v11 = vld [vmem:[#allocation7 + $0x2c] ss:$16 sps:$4 sm:$0xff]   ;;  %v4207_v12 = vld [vmem:[#allocation7 + $0x20] ss:$16 sps:$4 sm:$0xff]   ;;  %v4208_v13 = vld [vmem:[#allocation7 + $0x44] ss:$16 sps:$4 sm:$0xff]  }
  0x61   :  { %640 = vmatprep.subr.bf16.mxu1 %v4202_v10  ;;  %v4204_v14 = vld [vmem:[#allocation7 + $0x28] ss:$16 sps:$4 sm:$0xff]   ;;  %v4212_v15 = vld [vmem:[#allocation7 + $0x4c] ss:$16 sps:$4 sm:$0xff]   ;;  %v4213_v16 = vld [vmem:[#allocation7 + $0x40] ss:$16 sps:$4 sm:$0xff]  }
  0x62   :  { %162 = vmatpush1.bf16.msra.mxu0 %v4193_v4  ;;  %v4214_v18 = vld [vmem:[#allocation7 + $0x64] ss:$16 sps:$4 sm:$0xff]   ;;  %v4210_v19 = vld [vmem:[#allocation7 + $0x48] ss:$16 sps:$4 sm:$0xff]   ;;  %v4218_v20 = vld [vmem:[#allocation7 + $0x6c] ss:$16 sps:$4 sm:$0xff]  }
  0x63   :  { %691 = vmatprep.subr.bf16.mxu0 %v4200_v8  ;;  %v4219_v21 = vld [vmem:[#allocation7 + $0x60] ss:$16 sps:$4 sm:$0xff]   ;;  %v4220_v22 = vld [vmem:[#allocation7 + $0x84] ss:$16 sps:$4 sm:$0xff]   ;;  %v4216_v23 = vld [vmem:[#allocation7 + $0x68] ss:$16 sps:$4 sm:$0xff]  }
  0x64   :  { %641 = vmatpush1.bf16.msra.mxu1 %v4207_v12  ;;  %v4224_v24 = vld [vmem:[#allocation7 + $0x8c] ss:$16 sps:$4 sm:$0xff]   ;;  %v4225_v25 = vld [vmem:[#allocation7 + $0x80] ss:$16 sps:$4 sm:$0xff]   ;;  %v4226_v26 = vld [vmem:[#allocation7 + $0xa4] ss:$16 sps:$4 sm:$0xff]  }
  0x65   :  { %3610 = vmatmul.mubr.msk.bf16.vlgmr.msra.gmra.mrb[0].mxu0 %vm152_vm0, %v4194_v5  ;;  %642 = vmatprep.subr.bf16.mxu1 %v4208_v13  ;;  %v4222_v27 = vld [vmem:[#allocation7 + $0x88] ss:$16 sps:$4 sm:$0xff]   ;;  %v4230_v28 = vld [vmem:[#allocation7 + $0xac] ss:$16 sps:$4 sm:$0xff]   ;;  %v4231_v29 = vld [vmem:[#allocation7 + $0xa0] ss:$16 sps:$4 sm:$0xff]  }
  0x66   :  { %201 = vmatprep.mubr.bf16.mxu0 %v4509_v0  ;;  %692 = vmatpush1.bf16.msra.mxu0 %v4198_v7  ;;  %v4232_v30 = vld [vmem:[#allocation7 + $0xc4] ss:$16 sps:$4 sm:$0xff]   ;;  %v4228_v31 = vld [vmem:[#allocation7 + $0xa8] ss:$16 sps:$4 sm:$0xff]   ;;  %v4236_v32 = vld [vmem:[#allocation7 + $0xcc] ss:$16 sps:$4 sm:$0xff]  }
  0x67   :  { %693 = vmatprep.subr.bf16.mxu0 %v4206_v11  ;;  %v4237_v33 = vld [vmem:[#allocation7 + $0xc0] ss:$16 sps:$4 sm:$0xff]   ;;  %v4238_v34 = vld [vmem:[#allocation7 + $0xe4] ss:$16 sps:$4 sm:$0xff]   ;;  %v4234_v35 = vld [vmem:[#allocation7 + $0xc8] ss:$16 sps:$4 sm:$0xff]  }
  0x68   :  { %643 = vmatpush1.bf16.msra.mxu1 %v4213_v16  ;;  %v4242_v36 = vld [vmem:[#allocation7 + $0xec] ss:$16 sps:$4 sm:$0xff]   ;;  %v4243_v37 = vld [vmem:[#allocation7 + $0xe0] ss:$16 sps:$4 sm:$0xff]   ;;  %v4244_v38 = vld [vmem:[#allocation7 + $0x104] ss:$16 sps:$4 sm:$0xff]  }
  0x69   :  { %644 = vmatprep.subr.bf16.mxu1 %v4214_v18  ;;  %v4240_v39 = vld [vmem:[#allocation7 + $0xe8] ss:$16 sps:$4 sm:$0xff]   ;;  %v4248_v40 = vld [vmem:[#allocation7 + $0x10c] ss:$16 sps:$4 sm:$0xff]   ;;  %v4249_v41 = vld [vmem:[#allocation7 + $0x100] ss:$16 sps:$4 sm:$0xff]  }
  0x6a   :  { %694 = vmatpush1.bf16.msra.mxu0 %v4204_v14  ;;  %v4246_v42 = vld [vmem:[#allocation7 + $0x108] ss:$16 sps:$4 sm:$0xff]   ;;  %v4250_v43 = vld [vmem:[#allocation7 + $0x124] ss:$16 sps:$4 sm:$0xff]   ;;  %v4254_v44 = vld [vmem:[#allocation7 + $0x12c] ss:$16 sps:$4 sm:$0xff]  }
  0x6b   :  { %695 = vmatprep.subr.bf16.mxu0 %v4212_v15  ;;  %v4255_v45 = vld [vmem:[#allocation7 + $0x120] ss:$16 sps:$4 sm:$0xff]   ;;  %v4256_v46 = vld [vmem:[#allocation7 + $0x144] ss:$16 sps:$4 sm:$0xff]   ;;  %v4252_v47 = vld [vmem:[#allocation7 + $0x128] ss:$16 sps:$4 sm:$0xff]   ;;  %v112_v15 = vlaneseq }
  0x6c   :  { %645 = vmatpush1.bf16.msra.mxu1 %v4219_v21  ;;  %v4260_v48 = vld [vmem:[#allocation7 + $0x14c] ss:$16 sps:$4 sm:$0xff]   ;;  %v4261_v49 = vld [vmem:[#allocation7 + $0x140] ss:$16 sps:$4 sm:$0xff]   ;;  %v4262_v50 = vld [vmem:[#allocation7 + $0x164] ss:$16 sps:$4 sm:$0xff]  }
  0x6d   :  { %3611 = vmatmul.mubr.msk.bf16.gmra.mrb[4].mxu0 %vm152_vm0, %v4195_v17  ;;  %646 = vmatprep.subr.bf16.mxu1 %v4220_v22  ;;  %v4258_v51 = vld [vmem:[#allocation7 + $0x148] ss:$16 sps:$4 sm:$0xff]   ;;  %v4266_v52 = vld [vmem:[#allocation7 + $0x16c] ss:$16 sps:$4 sm:$0xff]   ;;  %v4267_v53 = vld [vmem:[#allocation7 + $0x160] ss:$16 sps:$4 sm:$0xff]  }
  0x6e   :  { %696 = vmatpush1.bf16.msra.mxu0 %v4210_v19  ;;  %v4268_v54 = vld [vmem:[#allocation7 + $0x184] ss:$16 sps:$4 sm:$0xff]   ;;  %v4264_v55 = vld [vmem:[#allocation7 + $0x168] ss:$16 sps:$4 sm:$0xff]   ;;  %v4272_v56 = vld [vmem:[#allocation7 + $0x18c] ss:$16 sps:$4 sm:$0xff]  }
  0x6f   :  { %697 = vmatprep.subr.bf16.mxu0 %v4218_v20  ;;  %v4273_v57 = vld [vmem:[#allocation7 + $0x180] ss:$16 sps:$4 sm:$0xff]   ;;  %v4270_v58 = vld [vmem:[#allocation7 + $0x188] ss:$16 sps:$4 sm:$0xff]   ;;  %v4274_v59 = vld [vmem:[#allocation7 + $0x1a4] ss:$16 sps:$4 sm:$0xff]  }
  0x70   :  { %647 = vmatpush1.bf16.msra.mxu1 %v4225_v25  ;;  %v4278_v60 = vld [vmem:[#allocation7 + $0x1ac] ss:$16 sps:$4 sm:$0xff]   ;;  %v4276_v61 = vld [vmem:[#allocation7 + $0x1a8] ss:$16 sps:$4 sm:$0xff]   ;;  %v4279_v62 = vld [vmem:[#allocation7 + $0x1a0] ss:$16 sps:$4 sm:$0xff]  }
  0x71   :  { %648 = vmatprep.subr.bf16.mxu1 %v4226_v26  ;;  %v4280_v63 = vld [vmem:[#allocation7 + $0x1c4] ss:$16 sps:$4 sm:$0xff]   ;;  %v4284_v0 = vld [vmem:[#allocation7 + $0x1cc] ss:$16 sps:$4 sm:$0xff]   ;;  %v4282_v1 = vld [vmem:[#allocation7 + $0x1c8] ss:$16 sps:$4 sm:$0xff]  }
  0x72   :  { %698 = vmatpush1.bf16.msra.mxu0 %v4216_v23  ;;  %v4285_v2 = vld [vmem:[#allocation7 + $0x1c0] ss:$16 sps:$4 sm:$0xff]   ;;  %v4286_v3 = vld [vmem:[#allocation7 + $0x1e4] ss:$16 sps:$4 sm:$0xff]   ;;  %v4290_v4 = vld [vmem:[#allocation7 + $0x1ec] ss:$16 sps:$4 sm:$0xff]  }
  0x73   :  { %699 = vmatprep.subr.bf16.mxu0 %v4224_v24  ;;  %v4288_v5 = vld [vmem:[#allocation7 + $0x1e8] ss:$16 sps:$4 sm:$0xff]   ;;  %v4291_v6 = vld [vmem:[#allocation7 + $0x1e0] ss:$16 sps:$4 sm:$0xff]   ;;  %v4636_v16 = vshrl.u32 %v112_v15, 7 }
  0x74   :  { %649 = vmatpush1.bf16.msra.mxu1 %v4231_v29  ;;  %v4632_v7 = vld [vmem:[#allocation8] sm:$0xff]  ;;  %v785_v9 = vld [vmem:[#allocation8 + $0x8] sm:$0xff]  ;;  %v110_v18 = vld [vmem:[%s4827_s2] sm:$0x3] }
  0x75   :  { %650 = vmatprep.subr.bf16.mxu1 %v4232_v30  ;;  %v788_v8 = vld [vmem:[#allocation8 + $0x20] sm:$0xff]  ;;  %v789_v12 = vld [vmem:[#allocation8 + $0x28] sm:$0xff]  ;;  %v4639_v17 = vsub.s32 0, %v4636_v16  ;;  %v4645_v19 = vsub.s32 1, %v4636_v16 }
  0x76   :  { %700 = vmatpush1.bf16.msra.mxu0 %v4222_v27  ;;  %v3676_v10 = vcombine.low %v4632_v7, %v788_v8  ;;  %v3677_v11 = vcombine.high %v4632_v7, %v788_v8  ;;  %v3678_v13 = vcombine.low %v785_v9, %v789_v12  ;;  %v3679_v14 = vcombine.high %v785_v9, %v789_v12  ;;  %v812_v7 = vld [vmem:[#allocation8 + $0xe0] sm:$0xff]  ;;  %v809_v8 = vld [vmem:[#allocation8 + $0xc8] sm:$0xff] }
  0x77   :  { %701 = vmatprep.subr.bf16.mxu0 %v4230_v28  ;;  %v115_v20 = vrot.slane %v110_v18, %v4639_v17  ;;  %v119_v21 = vrot.slane %v110_v18, %v4645_v19  ;;  %v813_v9 = vld [vmem:[#allocation8 + $0xe8] sm:$0xff]  ;;  %v816_v18 = vld [vmem:[#allocation8 + $0x100] sm:$0xff] }
  0x78   :  { %651 = vmatpush1.bf16.msra.mxu1 %v4237_v33 }
  0x79   :  { %652 = vmatprep.subr.bf16.mxu1 %v4238_v34 }
  0x7a   :  { %702 = vmatpush1.bf16.msra.mxu0 %v4228_v31 }
  0x7b   :  { %703 = vmatprep.subr.bf16.mxu0 %v4236_v32 }
  0x7c   :  { %653 = vmatpush1.bf16.msra.mxu1 %v4243_v37 }
  0x7d   :  { %654 = vmatprep.subr.bf16.mxu1 %v4244_v38 }
  0x7e   :  { %704 = vmatpush1.bf16.msra.mxu0 %v4234_v35 }
  0x7f   :  { %705 = vmatprep.subr.bf16.mxu0 %v4242_v36  ;;  %v792_v36 = vld [vmem:[#allocation8 + $0x40] sm:$0xff] }
  0x80   :  { %655 = vmatpush1.bf16.msra.mxu1 %v4249_v41  ;;  %v793_v41 = vld [vmem:[#allocation8 + $0x48] sm:$0xff] }
  0x81   :  { %656 = vmatprep.subr.bf16.mxu1 %v4250_v43 }
  0x82   :  { %706 = vmatpush1.bf16.msra.mxu0 %v4240_v39 }
  0x83   :  { %707 = vmatprep.subr.bf16.mxu0 %v4248_v40  ;;  %v796_v40 = vld [vmem:[#allocation8 + $0x60] sm:$0xff] }
  0x84   :  { %657 = vmatpush1.bf16.msra.mxu1 %v4255_v45 }
  0x85   :  { %658 = vmatprep.subr.bf16.mxu1 %v4256_v46 }
  0x86   :  { %708 = vmatpush1.bf16.msra.mxu0 %v4246_v42  ;;  %v797_v42 = vld [vmem:[#allocation8 + $0x68] sm:$0xff] }
  0x87   :  { %709 = vmatprep.subr.bf16.mxu0 %v4254_v44 }
  0x88   :  { %659 = vmatpush1.bf16.msra.mxu1 %v4261_v49 }
  0x89   :  { %660 = vmatprep.subr.bf16.mxu1 %v4262_v50 }
  0x8a   :  { %710 = vmatpush1.bf16.msra.mxu0 %v4252_v47 }
  0x8b   :  { %711 = vmatprep.subr.bf16.mxu0 %v4260_v48 }
  0x8c   :  { %661 = vmatpush1.bf16.msra.mxu1 %v4267_v53  ;;  %v3687_v53 = vcombine.high %v793_v41, %v797_v42 }
  0x8d   :  { %662 = vmatprep.subr.bf16.mxu1 %v4268_v54  ;;  %v800_v54 = vld [vmem:[#allocation8 + $0x80] sm:$0xff] }
  0x8e   :  { %712 = vmatpush1.bf16.msra.mxu0 %v4258_v51 }
  0x8f   :  { %713 = vmatprep.subr.bf16.mxu0 %v4266_v52  ;;  %v3685_v52 = vcombine.high %v792_v36, %v796_v40 }
  0x90   :  { %663 = vmatpush1.bf16.msra.mxu1 %v4273_v57  ;;  %v804_v57 = vld [vmem:[#allocation8 + $0xa0] sm:$0xff] }
  0x91   :  { %664 = vmatprep.subr.bf16.mxu1 %v4274_v59  ;;  %v805_v59 = vld [vmem:[#allocation8 + $0xa8] sm:$0xff] }
  0x92   :  { %714 = vmatpush1.bf16.msra.mxu0 %v4264_v55 }
  0x93   :  { %715 = vmatprep.subr.bf16.mxu0 %v4272_v56 }
  0x94   :  { %665 = vmatpush1.bf16.msra.mxu1 %v4279_v62 }
  0x95   :  { %666 = vmatprep.subr.bf16.mxu1 %v4280_v63 }
  0x96   :  { %716 = vmatpush1.bf16.msra.mxu0 %v4270_v58  ;;  %v801_v58 = vld [vmem:[#allocation8 + $0x88] sm:$0xff] }
  0x97   :  { %717 = vmatprep.subr.bf16.mxu0 %v4278_v60  ;;  %v3694_v15 = vcombine.low %v801_v58, %v805_v59 }
  0x98   :  { %667 = vmatpush1.bf16.msra.mxu1 %v4285_v2 }
  0x99   :  { %668 = vmatprep.subr.bf16.mxu1 %v4286_v3  ;;  %v3693_v3 = vcombine.high %v800_v54, %v804_v57 }
  0x9a   :  { %718 = vmatpush1.bf16.msra.mxu0 %v4276_v61 }
  0x9b   :  { %719 = vmatprep.subr.bf16.mxu0 %v4284_v0  ;;  %v3684_v0 = vcombine.low %v792_v36, %v796_v40  ;;  %v836_v36 = vld [vmem:[#allocation8 + $0x1a0] sm:$0xff] }
  0x9c   :  { %669 = vmatpush1.bf16.msra.mxu1 %v4291_v6 }
  0x9d   :  { %2362 = vmatprep.subr.bf16.mxu1 %v3677_v11 }
  0x9e   :  { %720 = vmatpush1.bf16.msra.mxu0 %v4282_v1  ;;  %v3686_v1 = vcombine.low %v793_v41, %v797_v42 }
  0x9f   :  { %721 = vmatprep.subr.bf16.mxu0 %v4290_v4  ;;  %v3695_v4 = vcombine.high %v801_v58, %v805_v59  ;;  %v856_v59 = vld [vmem:[#allocation8 + $0x240] sm:$0xff] }
  0xa2   :  { %722 = vmatpush1.bf16.msra.mxu0 %v4288_v5  ;;  %v808_v5 = vld [vmem:[#allocation8 + $0xc0] sm:$0xff] }
  0xa3   :  { %2468 = vmatprep.subr.bf16.mxu0 %v3679_v14  ;;  %v3692_v14 = vcombine.low %v800_v54, %v804_v57  ;;  %v853_v54 = vld [vmem:[#allocation8 + $0x228] sm:$0xff] }
 0x138   :  { %v193_v22 = vpop.f32.mrb[0].mxu0 }
 0x139   :  { %v194_v23 = vadd.f32 %v193_v22, %v115_v20  ;;  %v195_v24 = vpop.f32.mrb[1].mxu0  ;;  %v821_v22 = vld [vmem:[#allocation8 + $0x128] sm:$0xff] }
 0x13a   :  { %v196_v25 = vadd.f32 %v195_v24, %v119_v21  ;;  %v197_v26 = vpop.f32.mrb[2].mxu0  ;;  %v3702_v24 = vcombine.low %v809_v8, %v813_v9 }
 0x13b   :  { %v212_v27 = vmul.f32 0.01, %v194_v23  ;;  %v198_v28 = vadd.f32 %v197_v26, %v115_v20  ;;  %v199_v29 = vpop.f32.mrb[3].mxu0 }
 0x13c   :  { %v213_v30 = vmul.f32 0.01, %v196_v25  ;;  %v200_v31 = vadd.f32 %v199_v29, %v119_v21  ;;  %v825_v29 = vld [vmem:[#allocation8 + $0x148] sm:$0xff] }
 0x13d   :  { %v214_v32 = vmul.f32 0.01, %v198_v28  ;;  %v220_v34 = vmax.f32 %v194_v23, %v212_v27  ;;  %v3700_v23 = vcombine.low %v808_v5, %v812_v7  ;;  %v824_v27 = vld [vmem:[#allocation8 + $0x140] sm:$0xff] }
 0x13e   :  { %v215_v33 = vmul.f32 0.01, %v200_v31  ;;  %v221_v37 = vmax.f32 %v196_v25, %v213_v30  ;;  %v829_v30 = vld [vmem:[#allocation8 + $0x168] sm:$0xff] }
 0x13f   :  { %v222_v35 = vmax.f32 %v198_v28, %v214_v32  ;;  %v828_v28 = vld [vmem:[#allocation8 + $0x160] sm:$0xff]  ;;  %v3718_v40 = vcombine.low %v825_v29, %v829_v30 }
 0x140   :  { %v223_v38 = vmax.f32 %v200_v31, %v215_v33  ;;  %v203_v39 = vpop.f32.mrb[4].mxu0  ;;  %v3717_v33 = vcombine.high %v824_v27, %v828_v28 }
 0x141   :  { %v204_v43 = vadd.f32 %v203_v39, %v115_v20  ;;  %v205_v44 = vpop.f32.mrb[5].mxu0  ;;  %v228_v45 = vpack.c.bf16 %v222_v35, %v220_v34  ;;  %v3719_v34 = vcombine.high %v825_v29, %v829_v30  ;;  %v832_v35 = vld [vmem:[#allocation8 + $0x180] sm:$0xff]  ;;  %v3716_v39 = vcombine.low %v824_v27, %v828_v28 }
 0x142   :  { %v206_v46 = vadd.f32 %v205_v44, %v119_v21  ;;  %v207_v47 = vpop.f32.mrb[6].mxu0  ;;  %v229_v48 = vpack.c.bf16 %v223_v38, %v221_v37  ;;  %v833_v37 = vld [vmem:[#allocation8 + $0x188] sm:$0xff]  ;;  %v3725_v41 = vcombine.high %v832_v35, %v836_v36  ;;  %v844_v44 = vld [vmem:[#allocation8 + $0x1e0] sm:$0xff] }
 0x143   :  { %v216_v49 = vmul.f32 0.01, %v204_v43  ;;  %v208_v50 = vadd.f32 %v207_v47, %v115_v20  ;;  %v209_v51 = vpop.f32.mrb[7].mxu0  ;;  %v820_v20 = vld [vmem:[#allocation8 + $0x120] sm:$0xff]  ;;  %v837_v38 = vld [vmem:[#allocation8 + $0x1a8] sm:$0xff]  ;;  %v3724_v47 = vcombine.low %v832_v35, %v836_v36 }
 0x144   :  { %v217_v55 = vmul.f32 0.01, %v206_v46  ;;  %v210_v56 = vadd.f32 %v209_v51, %v119_v21  ;;  %670 = vmatprep.mubr.bf16.mxu1 %v229_v48  ;;  %723 = vmatprep.mubr.bf16.mxu0 %v229_v48  ;;  %v817_v21 = vld [vmem:[#allocation8 + $0x108] sm:$0xff]  ;;  %v3709_v25 = vcombine.high %v816_v18, %v820_v20  ;;  %v3708_v31 = vcombine.low %v816_v18, %v820_v20  ;;  %v848_v51 = vld [vmem:[#allocation8 + $0x200] sm:$0xff] }
 0x145   :  { %v224_v60 = vmax.f32 %v204_v43, %v216_v49  ;;  %v218_v61 = vmul.f32 0.01, %v208_v50  ;;  %671 = vmatmul.mubr.bf16.vlgmr.msra.gmra.mrb[0].mxu1 %v228_v45  ;;  %724 = vmatmul.mubr.bf16.vlgmr.msra.gmra.mrb[8].mxu0 %v228_v45  ;;  %v3711_v26 = vcombine.high %v817_v21, %v821_v22  ;;  %v3710_v32 = vcombine.low %v817_v21, %v821_v22  ;;  %v840_v43 = vld [vmem:[#allocation8 + $0x1c0] sm:$0xff]  ;;  %v841_v45 = vld [vmem:[#allocation8 + $0x1c8] sm:$0xff] }
 0x146   :  { %v225_v62 = vmax.f32 %v206_v46, %v217_v55  ;;  %v219_v63 = vmul.f32 0.01, %v210_v56  ;;  %2363 = vmatpush1.bf16.msra.mxu1 %v3676_v10  ;;  %2469 = vmatpush1.bf16.msra.mxu0 %v3678_v13  ;;  %v3701_v10 = vcombine.high %v808_v5, %v812_v7  ;;  %v3703_v13 = vcombine.high %v809_v8, %v813_v9  ;;  %v845_v46 = vld [vmem:[#allocation8 + $0x1e8] sm:$0xff]  ;;  %v880_v22 = vld [vmem:[#allocation8 + $0x300] sm:$0xff] }
 0x147   :  { %v226_v2 = vmax.f32 %v208_v50, %v218_v61  ;;  %2364 = vmatprep.subr.bf16.mxu1 %v3685_v52  ;;  %2470 = vmatprep.subr.bf16.mxu0 %v3687_v53  ;;  %v3727_v42 = vcombine.high %v833_v37, %v837_v38  ;;  %v3726_v48 = vcombine.low %v833_v37, %v837_v38  ;;  %v852_v52 = vld [vmem:[#allocation8 + $0x220] sm:$0xff]  ;;  %v849_v53 = vld [vmem:[#allocation8 + $0x208] sm:$0xff] }
 0x148   :  { %v227_v6 = vmax.f32 %v210_v56, %v219_v63  ;;  %v3733_v49 = vcombine.high %v840_v43, %v844_v44  ;;  %v3735_v50 = vcombine.high %v841_v45, %v845_v46  ;;  %v3732_v55 = vcombine.low %v840_v43, %v844_v44  ;;  %v857_v61 = vld [vmem:[#allocation8 + $0x248] sm:$0xff] }
 0x149   :  { %v230_v11 = vpack.c.bf16 %v226_v2, %v224_v60  ;;  %v3734_v56 = vcombine.low %v841_v45, %v845_v46  ;;  %v3741_v57 = vcombine.high %v848_v51, %v852_v52  ;;  %v3743_v58 = vcombine.high %v849_v53, %v853_v54  ;;  %v860_v60 = vld [vmem:[#allocation8 + $0x260] sm:$0xff]  ;;  %v865_v5 = vld [vmem:[#allocation8 + $0x288] sm:$0xff] }
 0x14a   :  { %v231_v12 = vpack.c.bf16 %v227_v6, %v225_v62  ;;  %2365 = vmatpush1.bf16.msra.mxu1 %v3684_v0  ;;  %2471 = vmatpush1.bf16.msra.mxu0 %v3686_v1  ;;  %v861_v62 = vld [vmem:[#allocation8 + $0x268] sm:$0xff]  ;;  %v3740_v63 = vcombine.low %v848_v51, %v852_v52  ;;  %v3742_v0 = vcombine.low %v849_v53, %v853_v54 }
 0x14b   :  { %2366 = vmatprep.subr.bf16.mxu1 %v3693_v3  ;;  %2472 = vmatprep.subr.bf16.mxu0 %v3695_v4  ;;  %v3749_v1 = vcombine.high %v856_v59, %v860_v60  ;;  %v3751_v2 = vcombine.high %v857_v61, %v861_v62  ;;  %v864_v3 = vld [vmem:[#allocation8 + $0x280] sm:$0xff]  ;;  %v869_v6 = vld [vmem:[#allocation8 + $0x2a8] sm:$0xff]  ;;  %v3748_v7 = vcombine.low %v856_v59, %v860_v60 }
 0x14c   :  { %680 = vmatprep.mubr.bf16.mxu1 %v231_v12  ;;  %733 = vmatprep.mubr.bf16.mxu0 %v231_v12  ;;  %v868_v4 = vld [vmem:[#allocation8 + $0x2a0] sm:$0xff]  ;;  %v3750_v8 = vcombine.low %v857_v61, %v861_v62  ;;  %v3758_v18 = vcombine.low %v865_v5, %v869_v6  ;;  %v893_v36 = vld [vmem:[#allocation8 + $0x368] sm:$0xff] }
 0x14d   :  { %681 = vmatmul.mubr.bf16.gmra.mrb[4].mxu1 %v230_v11  ;;  %734 = vmatmul.mubr.bf16.gmra.mrb[12].mxu0 %v230_v11  ;;  %v3757_v9 = vcombine.high %v864_v3, %v868_v4  ;;  %v3759_v11 = vcombine.high %v865_v5, %v869_v6  ;;  %v872_v12 = vld [vmem:[#allocation8 + $0x2c0] sm:$0xff]  ;;  %v901_v44 = vld [vmem:[#allocation8 + $0x3a8] sm:$0xff] }
 0x14e   :  { %2367 = vmatpush1.bf16.msra.mxu1 %v3692_v14  ;;  %2473 = vmatpush1.bf16.msra.mxu0 %v3694_v15  ;;  %v876_v14 = vld [vmem:[#allocation8 + $0x2e0] sm:$0xff]  ;;  %v873_v15 = vld [vmem:[#allocation8 + $0x2c8] sm:$0xff] }
 0x14f   :  { %2368 = vmatprep.subr.bf16.mxu1 %v3701_v10  ;;  %2474 = vmatprep.subr.bf16.mxu0 %v3703_v13  ;;  %v877_v10 = vld [vmem:[#allocation8 + $0x2e8] sm:$0xff]  ;;  %v3756_v13 = vcombine.low %v864_v3, %v868_v4  ;;  %v3765_v20 = vcombine.high %v872_v12, %v876_v14 }
 0x150   :  { %v3767_v21 = vcombine.high %v873_v15, %v877_v10  ;;  %v3766_v27 = vcombine.low %v873_v15, %v877_v10  ;;  %v909_v52 = vld [vmem:[#allocation8 + $0x3e8] sm:$0xff] }
 0x151   :  { %v4657_v60 = vld [vmem:[#allocation8 + $0x428] sm:$0xff] }
 0x152   :  { %2369 = vmatpush1.bf16.msra.mxu1 %v3700_v23  ;;  %2475 = vmatpush1.bf16.msra.mxu0 %v3702_v24  ;;  %v884_v23 = vld [vmem:[#allocation8 + $0x320] sm:$0xff]  ;;  %v881_v24 = vld [vmem:[#allocation8 + $0x308] sm:$0xff] }
 0x153   :  { %2370 = vmatprep.subr.bf16.mxu1 %v3709_v25  ;;  %2476 = vmatprep.subr.bf16.mxu0 %v3711_v26  ;;  %v885_v25 = vld [vmem:[#allocation8 + $0x328] sm:$0xff]  ;;  %v3764_v26 = vcombine.low %v872_v12, %v876_v14  ;;  %v3773_v28 = vcombine.high %v880_v22, %v884_v23  ;;  %v3772_v30 = vcombine.low %v880_v22, %v884_v23 }
 0x154   :  { %v3775_v29 = vcombine.high %v881_v24, %v885_v25 }
 0x156   :  { %2371 = vmatpush1.bf16.msra.mxu1 %v3708_v31  ;;  %2477 = vmatpush1.bf16.msra.mxu0 %v3710_v32  ;;  %v3774_v31 = vcombine.low %v881_v24, %v885_v25  ;;  %v888_v32 = vld [vmem:[#allocation8 + $0x340] sm:$0xff]  ;;  %v4693_v24 = vld [vmem:[#allocation8 + $0x468] sm:$0xff] }
 0x157   :  { %2372 = vmatprep.subr.bf16.mxu1 %v3717_v33  ;;  %2478 = vmatprep.subr.bf16.mxu0 %v3719_v34  ;;  %v892_v33 = vld [vmem:[#allocation8 + $0x360] sm:$0xff]  ;;  %v889_v34 = vld [vmem:[#allocation8 + $0x348] sm:$0xff] }
 0x158   :  { %v3781_v35 = vcombine.high %v888_v32, %v892_v33  ;;  %v3780_v37 = vcombine.low %v888_v32, %v892_v33  ;;  %v3782_v38 = vcombine.low %v889_v34, %v893_v36  ;;  %v4695_v25 = vld [vmem:[#allocation8 + $0x480] sm:$0xff] }
 0x15a   :  { %2373 = vmatpush1.bf16.msra.mxu1 %v3716_v39  ;;  %2479 = vmatpush1.bf16.msra.mxu0 %v3718_v40  ;;  %v3783_v39 = vcombine.high %v889_v34, %v893_v36  ;;  %v896_v40 = vld [vmem:[#allocation8 + $0x380] sm:$0xff] }
 0x15b   :  { %2374 = vmatprep.subr.bf16.mxu1 %v3725_v41  ;;  %2480 = vmatprep.subr.bf16.mxu0 %v3727_v42  ;;  %v900_v41 = vld [vmem:[#allocation8 + $0x3a0] sm:$0xff]  ;;  %v897_v42 = vld [vmem:[#allocation8 + $0x388] sm:$0xff] }
 0x15c   :  { %v3789_v43 = vcombine.high %v896_v40, %v900_v41  ;;  %v3788_v45 = vcombine.low %v896_v40, %v900_v41  ;;  %v3790_v46 = vcombine.low %v897_v42, %v901_v44 }
 0x15e   :  { %2375 = vmatpush1.bf16.msra.mxu1 %v3724_v47  ;;  %2481 = vmatpush1.bf16.msra.mxu0 %v3726_v48  ;;  %v3791_v47 = vcombine.high %v897_v42, %v901_v44  ;;  %v904_v48 = vld [vmem:[#allocation8 + $0x3c0] sm:$0xff] }
 0x15f   :  { %2376 = vmatprep.subr.bf16.mxu1 %v3733_v49  ;;  %2482 = vmatprep.subr.bf16.mxu0 %v3735_v50  ;;  %v908_v49 = vld [vmem:[#allocation8 + $0x3e0] sm:$0xff]  ;;  %v905_v50 = vld [vmem:[#allocation8 + $0x3c8] sm:$0xff] }
 0x160   :  { %v3797_v51 = vcombine.high %v904_v48, %v908_v49  ;;  %v3796_v53 = vcombine.low %v904_v48, %v908_v49  ;;  %v3798_v54 = vcombine.low %v905_v50, %v909_v52 }
 0x162   :  { %2377 = vmatpush1.bf16.msra.mxu1 %v3732_v55  ;;  %2483 = vmatpush1.bf16.msra.mxu0 %v3734_v56  ;;  %v3799_v55 = vcombine.high %v905_v50, %v909_v52  ;;  %v4649_v56 = vld [vmem:[#allocation8 + $0x400] sm:$0xff] }
 0x163   :  { %2378 = vmatprep.subr.bf16.mxu1 %v3741_v57  ;;  %2484 = vmatprep.subr.bf16.mxu0 %v3743_v58  ;;  %v4651_v57 = vld [vmem:[#allocation8 + $0x420] sm:$0xff]  ;;  %v4653_v58 = vld [vmem:[#allocation8 + $0x408] sm:$0xff] }
 0x164   :  { %v3805_v59 = vcombine.high %v4649_v56, %v4651_v57  ;;  %v3804_v61 = vcombine.low %v4649_v56, %v4651_v57  ;;  %v3806_v62 = vcombine.low %v4653_v58, %v4657_v60  ;;  %v940_v57 = vld [vmem:[#allocation8 + $0x4e0] sm:$0xff] }
 0x166   :  { %2379 = vmatpush1.bf16.msra.mxu1 %v3740_v63  ;;  %2485 = vmatpush1.bf16.msra.mxu0 %v3742_v0  ;;  %v3807_v63 = vcombine.high %v4653_v58, %v4657_v60  ;;  %v308_v0 = vsub.s32 2, %v4636_v16  ;;  %v937_v58 = vld [vmem:[#allocation8 + $0x4c8] sm:$0xff] }
 0x167   :  { %2380 = vmatprep.subr.bf16.mxu1 %v3749_v1  ;;  %2486 = vmatprep.subr.bf16.mxu0 %v3751_v2  ;;  %v296_v1 = vld [vmem:[%s4829_s4] sm:$0xf]  ;;  %v312_v2 = vsub.s32 3, %v4636_v16  ;;  %v941_v60 = vld [vmem:[#allocation8 + $0x4e8] sm:$0xff] }
 0x168   :  { %v301_v3 = vrot.slane %v296_v1, %v4639_v17  ;;  %v4673_v4 = vrot.slane %v296_v1, %v308_v0  ;;  %v4676_v5 = vrot.slane %v296_v1, %v4645_v19 }
 0x169   :  { %v4680_v6 = vrot.slane %v296_v1, %v312_v2 }
 0x16a   :  { %2381 = vmatpush1.bf16.msra.mxu1 %v3748_v7  ;;  %2487 = vmatpush1.bf16.msra.mxu0 %v3750_v8  ;;  %v4682_v7 = vld [vmem:[#allocation8 + $0x440] sm:$0xff] }
 0x16b   :  { %2382 = vmatprep.subr.bf16.mxu1 %v3757_v9  ;;  %2488 = vmatprep.subr.bf16.mxu0 %v3759_v11  ;;  %v4684_v8 = vld [vmem:[#allocation8 + $0x460] sm:$0xff] }
 0x16c   :  { %v3813_v23 = vcombine.high %v4682_v7, %v4684_v8 }
 0x16e   :  { %2383 = vmatpush1.bf16.msra.mxu1 %v3756_v13  ;;  %2489 = vmatpush1.bf16.msra.mxu0 %v3758_v18  ;;  %v4687_v13 = vld [vmem:[#allocation8 + $0x448] sm:$0xff] }
 0x16f   :  { %2384 = vmatprep.subr.bf16.mxu1 %v3765_v20  ;;  %2490 = vmatprep.subr.bf16.mxu0 %v3767_v21  ;;  %v3814_v40 = vcombine.low %v4687_v13, %v4693_v24 }
 0x172   :  { %2385 = vmatpush1.bf16.msra.mxu1 %v3764_v26  ;;  %2491 = vmatpush1.bf16.msra.mxu0 %v3766_v27  ;;  %v4697_v26 = vld [vmem:[#allocation8 + $0x4a0] sm:$0xff] }
 0x173   :  { %2386 = vmatprep.subr.bf16.mxu1 %v3773_v28  ;;  %2492 = vmatprep.subr.bf16.mxu0 %v3775_v29  ;;  %v3821_v44 = vcombine.high %v4695_v25, %v4697_v26  ;;  %v3820_v56 = vcombine.low %v4695_v25, %v4697_v26 }
 0x176   :  { %2387 = vmatpush1.bf16.msra.mxu1 %v3772_v30  ;;  %2493 = vmatpush1.bf16.msra.mxu0 %v3774_v31 }
 0x177   :  { %2388 = vmatprep.subr.bf16.mxu1 %v3781_v35  ;;  %2494 = vmatprep.subr.bf16.mxu0 %v3783_v39  ;;  %v3812_v39 = vcombine.low %v4682_v7, %v4684_v8  ;;  %v3831_v7 = vcombine.high %v937_v58, %v941_v60  ;;  %v948_v8 = vld [vmem:[#allocation8 + $0x520] sm:$0xff] }
 0x17a   :  { %2389 = vmatpush1.bf16.msra.mxu1 %v3780_v37  ;;  %2495 = vmatpush1.bf16.msra.mxu0 %v3782_v38 }
 0x17b   :  { %2390 = vmatprep.subr.bf16.mxu1 %v3789_v43  ;;  %2496 = vmatprep.subr.bf16.mxu0 %v3791_v47  ;;  %v3815_v43 = vcombine.high %v4687_v13, %v4693_v24  ;;  %v3830_v24 = vcombine.low %v937_v58, %v941_v60 }
 0x17e   :  { %2391 = vmatpush1.bf16.msra.mxu1 %v3788_v45  ;;  %2497 = vmatpush1.bf16.msra.mxu0 %v3790_v46 }
 0x17f   :  { %2392 = vmatprep.subr.bf16.mxu1 %v3797_v51  ;;  %2498 = vmatprep.subr.bf16.mxu0 %v3799_v55 }
 0x182   :  { %2393 = vmatpush1.bf16.msra.mxu1 %v3796_v53  ;;  %2499 = vmatpush1.bf16.msra.mxu0 %v3798_v54 }
 0x183   :  { %2415 = vmatprep.subr.bf16.mxu1 %v3805_v59  ;;  %2521 = vmatprep.subr.bf16.mxu0 %v3807_v63 }
 0x218   :  { %v672_v9 = vpop.f32.mrb[0].mxu1  ;;  %v725_v11 = vpop.f32.mrb[8].mxu0 }
 0x219   :  { %v673_v12 = vadd.f32 %v672_v9, %v301_v3  ;;  %v726_v14 = vadd.f32 %v725_v11, %v4673_v4  ;;  %v674_v15 = vpop.f32.mrb[1].mxu1  ;;  %v727_v10 = vpop.f32.mrb[9].mxu0 }
 0x21a   :  { %v675_v18 = vadd.f32 %v674_v15, %v4676_v5  ;;  %v728_v20 = vadd.f32 %v727_v10, %v4680_v6  ;;  %v676_v21 = vpop.f32.mrb[2].mxu1  ;;  %v729_v22 = vpop.f32.mrb[10].mxu0 }
 0x21b   :  { %v744_v27 = vmul.f32 0.01, %v673_v12  ;;  %v746_v28 = vmul.f32 0.01, %v726_v14  ;;  %v677_v29 = vadd.f32 %v676_v21, %v301_v3  ;;  %v730_v30 = vadd.f32 %v729_v22, %v4673_v4  ;;  %v678_v31 = vpop.f32.mrb[3].mxu1  ;;  %v731_v32 = vpop.f32.mrb[11].mxu0 }
 0x21c   :  { %v745_v33 = vmul.f32 0.01, %v675_v18  ;;  %v747_v34 = vmul.f32 0.01, %v728_v20  ;;  %v679_v35 = vadd.f32 %v678_v31, %v4676_v5  ;;  %v732_v36 = vadd.f32 %v731_v32, %v4680_v6 }
 0x21d   :  { %v748_v37 = vmul.f32 0.01, %v677_v29  ;;  %v750_v38 = vmul.f32 0.01, %v730_v30  ;;  %v760_v45 = vmax.f32 %v673_v12, %v744_v27  ;;  %v762_v46 = vmax.f32 %v726_v14, %v746_v28 }
 0x21e   :  { %v749_v41 = vmul.f32 0.01, %v679_v35  ;;  %v751_v42 = vmul.f32 0.01, %v732_v36  ;;  %v761_v49 = vmax.f32 %v675_v18, %v745_v33  ;;  %v763_v50 = vmax.f32 %v728_v20, %v747_v34  ;;  %v929_v33 = vld [vmem:[#allocation8 + $0x488] sm:$0xff] }
 0x21f   :  { %v764_v47 = vmax.f32 %v677_v29, %v748_v37  ;;  %v766_v48 = vmax.f32 %v730_v30, %v750_v38  ;;  %v933_v34 = vld [vmem:[#allocation8 + $0x4a8] sm:$0xff] }
 0x220   :  { %v765_v51 = vmax.f32 %v679_v35, %v749_v41  ;;  %v767_v52 = vmax.f32 %v732_v36, %v751_v42  ;;  %v682_v53 = vpop.f32.mrb[4].mxu1  ;;  %v735_v54 = vpop.f32.mrb[12].mxu0 }
 0x221   :  { %v4710_v55 = vpack.c.bf16 %v764_v47, %v760_v45  ;;  %v4712_v59 = vpack.c.bf16 %v766_v48, %v762_v46  ;;  %v683_v63 = vadd.f32 %v682_v53, %v301_v3  ;;  %v684_v1 = vpop.f32.mrb[5].mxu1  ;;  %v736_v9 = vadd.f32 %v735_v54, %v4673_v4  ;;  %v737_v11 = vpop.f32.mrb[13].mxu0  ;;  %v949_v54 = vld [vmem:[#allocation8 + $0x528] sm:$0xff] }
 0x222   :  { %v4715_v15 = vpack.c.bf16 %v765_v51, %v761_v49  ;;  %v4717_v12 = vpack.c.bf16 %v767_v52, %v763_v50  ;;  %v685_v14 = vadd.f32 %v684_v1, %v4676_v5  ;;  %v686_v10 = vpop.f32.mrb[6].mxu1  ;;  %v738_v18 = vadd.f32 %v737_v11, %v4680_v6  ;;  %v739_v20 = vpop.f32.mrb[14].mxu0  ;;  %v936_v49 = vld [vmem:[#allocation8 + $0x4c0] sm:$0xff]  ;;  %v957_v1 = vld [vmem:[#allocation8 + $0x568] sm:$0xff] }
 0x223   :  { %v752_v21 = vmul.f32 0.01, %v683_v63  ;;  %v687_v22 = vadd.f32 %v686_v10, %v301_v3  ;;  %v688_v27 = vpop.f32.mrb[7].mxu1  ;;  %v754_v28 = vmul.f32 0.01, %v736_v9  ;;  %v740_v29 = vadd.f32 %v739_v20, %v4673_v4  ;;  %v741_v30 = vpop.f32.mrb[15].mxu0 }
 0x224   :  { %v753_v31 = vmul.f32 0.01, %v685_v14  ;;  %v689_v32 = vadd.f32 %v688_v27, %v4676_v5  ;;  %2394 = vmatprep.mubr.bf16.mxu1 %v4715_v15  ;;  %2500 = vmatprep.mubr.bf16.mxu0 %v4715_v15  ;;  %v755_v35 = vmul.f32 0.01, %v738_v18  ;;  %v742_v36 = vadd.f32 %v741_v30, %v4680_v6  ;;  %v944_v52 = vld [vmem:[#allocation8 + $0x500] sm:$0xff] }
 0x225   :  { %v768_v37 = vmax.f32 %v683_v63, %v752_v21  ;;  %v756_v38 = vmul.f32 0.01, %v687_v22  ;;  %2395 = vmatmul.mubr.bf16.vlgmr.msra.gmra.mrb[8].mxu1 %v4710_v55  ;;  %2501 = vmatmul.mubr.bf16.vlgmr.msra.gmra.mrb[16].mxu0 %v4710_v55  ;;  %v770_v3 = vmax.f32 %v736_v9, %v754_v28  ;;  %v758_v4 = vmul.f32 0.01, %v740_v29  ;;  %v953_v63 = vld [vmem:[#allocation8 + $0x548] sm:$0xff]  ;;  %v964_v20 = vld [vmem:[#allocation8 + $0x5a0] sm:$0xff] }
 0x226   :  { %v769_v41 = vmax.f32 %v685_v14, %v753_v31  ;;  %v757_v42 = vmul.f32 0.01, %v689_v32  ;;  %2416 = vmatpush1.bf16.msra.mxu1 %v3804_v61  ;;  %2522 = vmatpush1.bf16.msra.mxu0 %v3806_v62  ;;  %v771_v5 = vmax.f32 %v738_v18, %v755_v35  ;;  %v759_v6 = vmul.f32 0.01, %v742_v36  ;;  %v960_v18 = vld [vmem:[#allocation8 + $0x580] sm:$0xff]  ;;  %v961_v21 = vld [vmem:[#allocation8 + $0x588] sm:$0xff] }
 0x227   :  { %v772_v45 = vmax.f32 %v687_v22, %v756_v38  ;;  %2417 = vmatprep.subr.bf16.mxu1 %v3813_v23  ;;  %2523 = vmatprep.subr.bf16.mxu0 %v3815_v43  ;;  %v3823_v46 = vcombine.high %v929_v33, %v933_v34  ;;  %v774_v47 = vmax.f32 %v740_v29, %v758_v4  ;;  %v965_v22 = vld [vmem:[#allocation8 + $0x5a8] sm:$0xff]  ;;  %v968_v31 = vld [vmem:[#allocation8 + $0x5c0] sm:$0xff] }
 0x228   :  { %v773_v48 = vmax.f32 %v689_v32, %v757_v42  ;;  %v775_v50 = vmax.f32 %v742_v36, %v759_v6  ;;  %v3822_v23 = vcombine.low %v929_v33, %v933_v34  ;;  %v3829_v53 = vcombine.high %v936_v49, %v940_v57  ;;  %v972_v32 = vld [vmem:[#allocation8 + $0x5e0] sm:$0xff]  ;;  %v969_v33 = vld [vmem:[#allocation8 + $0x5c8] sm:$0xff] }
 0x229   :  { %v4737_v51 = vpack.c.bf16 %v772_v45, %v768_v37  ;;  %v4741_v61 = vpack.c.bf16 %v774_v47, %v770_v3  ;;  %v3828_v13 = vcombine.low %v936_v49, %v940_v57  ;;  %v3837_v25 = vcombine.high %v944_v52, %v948_v8  ;;  %v973_v34 = vld [vmem:[#allocation8 + $0x5e8] sm:$0xff]  ;;  %v976_v3 = vld [vmem:[#allocation8 + $0x600] sm:$0xff] }
 0x22a   :  { %v4743_v62 = vpack.c.bf16 %v773_v48, %v769_v41  ;;  %2418 = vmatpush1.bf16.msra.mxu1 %v3812_v39  ;;  %2524 = vmatpush1.bf16.msra.mxu0 %v3814_v40  ;;  %v4751_v43 = vpack.c.bf16 %v775_v50, %v771_v5  ;;  %v945_v39 = vld [vmem:[#allocation8 + $0x508] sm:$0xff]  ;;  %v952_v40 = vld [vmem:[#allocation8 + $0x540] sm:$0xff]  ;;  %v3836_v9 = vcombine.low %v944_v52, %v948_v8 }
 0x22b   :  { %2419 = vmatprep.subr.bf16.mxu1 %v3821_v44  ;;  %2525 = vmatprep.subr.bf16.mxu0 %v3823_v46  ;;  %v3839_v26 = vcombine.high %v945_v39, %v949_v54  ;;  %v956_v44 = vld [vmem:[#allocation8 + $0x560] sm:$0xff]  ;;  %v3838_v11 = vcombine.low %v945_v39, %v949_v54  ;;  %v3847_v10 = vcombine.high %v953_v63, %v957_v1  ;;  %v977_v41 = vld [vmem:[#allocation8 + $0x608] sm:$0xff] }
 0x22c   :  { %2404 = vmatprep.mubr.bf16.mxu1 %v4743_v62  ;;  %2510 = vmatprep.mubr.bf16.mxu0 %v4743_v62  ;;  %v3845_v14 = vcombine.high %v952_v40, %v956_v44  ;;  %v3844_v27 = vcombine.low %v952_v40, %v956_v44  ;;  %v3846_v28 = vcombine.low %v953_v63, %v957_v1  ;;  %v980_v4 = vld [vmem:[#allocation8 + $0x620] sm:$0xff]  ;;  %v981_v42 = vld [vmem:[#allocation8 + $0x628] sm:$0xff] }
 0x22d   :  { %2405 = vmatmul.mubr.bf16.gmra.mrb[12].mxu1 %v4737_v51  ;;  %2511 = vmatmul.mubr.bf16.gmra.mrb[20].mxu0 %v4737_v51  ;;  %v3853_v29 = vcombine.high %v960_v18, %v964_v20  ;;  %v3855_v30 = vcombine.high %v961_v21, %v965_v22  ;;  %v3852_v35 = vcombine.low %v960_v18, %v964_v20  ;;  %v984_v47 = vld [vmem:[#allocation8 + $0x640] sm:$0xff]  ;;  %v985_v49 = vld [vmem:[#allocation8 + $0x648] sm:$0xff] }
 0x22e   :  { %2420 = vmatpush1.bf16.msra.mxu1 %v3820_v56  ;;  %2526 = vmatpush1.bf16.msra.mxu0 %v3822_v23  ;;  %v3854_v36 = vcombine.low %v961_v21, %v965_v22  ;;  %v3861_v37 = vcombine.high %v968_v31, %v972_v32  ;;  %v3863_v38 = vcombine.high %v969_v33, %v973_v34  ;;  %v988_v48 = vld [vmem:[#allocation8 + $0x660] sm:$0xff]  ;;  %v989_v50 = vld [vmem:[#allocation8 + $0x668] sm:$0xff] }
 0x22f   :  { %2447 = vmatprep.mubr.bf16.mxu1 %v4717_v12  ;;  %2553 = vmatprep.mubr.bf16.mxu0 %v4717_v12  ;;  %v3860_v5 = vcombine.low %v968_v31, %v972_v32  ;;  %v3862_v6 = vcombine.low %v969_v33, %v973_v34  ;;  %v3869_v45 = vcombine.high %v976_v3, %v980_v4  ;;  %v992_v23 = vld [vmem:[#allocation8 + $0x680] sm:$0xff]  ;;  %v1005_v40 = vld [vmem:[#allocation8 + $0x6e8] sm:$0xff] }
 0x230   :  { %2421 = vmatprep.subr.bf16.mxu1 %v3829_v53  ;;  %2527 = vmatprep.subr.bf16.mxu0 %v3831_v7  ;;  %v3871_v46 = vcombine.high %v977_v41, %v981_v42  ;;  %v3868_v56 = vcombine.low %v976_v3, %v980_v4  ;;  %v3870_v57 = vcombine.low %v977_v41, %v981_v42  ;;  %v996_v52 = vld [vmem:[#allocation8 + $0x6a0] sm:$0xff]  ;;  %v993_v53 = vld [vmem:[#allocation8 + $0x688] sm:$0xff] }
 0x231   :  { %v3877_v58 = vcombine.high %v984_v47, %v988_v48  ;;  %v3879_v60 = vcombine.high %v985_v49, %v989_v50  ;;  %v997_v7 = vld [vmem:[#allocation8 + $0x6a8] sm:$0xff]  ;;  %v3876_v8 = vcombine.low %v984_v47, %v988_v48  ;;  %v3878_v39 = vcombine.low %v985_v49, %v989_v50 }
 0x232   :  { %2422 = vmatpush1.bf16.msra.mxu1 %v3828_v13  ;;  %2528 = vmatpush1.bf16.msra.mxu0 %v3830_v24  ;;  %v3885_v54 = vcombine.high %v992_v23, %v996_v52  ;;  %v3887_v13 = vcombine.high %v993_v53, %v997_v7  ;;  %v1000_v24 = vld [vmem:[#allocation8 + $0x6c0] sm:$0xff]  ;;  %v3884_v44 = vcombine.low %v992_v23, %v996_v52  ;;  %v1013_v18 = vld [vmem:[#allocation8 + $0x728] sm:$0xff]  ;;  %v791_v23 = vld [vmem:[#allocation8 + $0x38] sm:$0xff] }
 0x233   :  { %2423 = vmatprep.subr.bf16.mxu1 %v3837_v25  ;;  %2529 = vmatprep.subr.bf16.mxu0 %v3839_v26  ;;  %v1004_v25 = vld [vmem:[#allocation8 + $0x6e0] sm:$0xff]  ;;  %v1001_v26 = vld [vmem:[#allocation8 + $0x6c8] sm:$0xff]  ;;  %v3886_v63 = vcombine.low %v993_v53, %v997_v7 }
 0x234   :  { %v3893_v1 = vcombine.high %v1000_v24, %v1004_v25  ;;  %v3892_v20 = vcombine.low %v1000_v24, %v1004_v25  ;;  %v3894_v21 = vcombine.low %v1001_v26, %v1005_v40  ;;  %v1021_v31 = vld [vmem:[#allocation8 + $0x768] sm:$0xff]  ;;  %v799_v24 = vld [vmem:[#allocation8 + $0x78] sm:$0xff] }
 0x235   :  { %v1029_v3 = vld [vmem:[#allocation8 + $0x7a8] sm:$0xff] }
 0x236   :  { %2424 = vmatpush1.bf16.msra.mxu1 %v3836_v9  ;;  %2530 = vmatpush1.bf16.msra.mxu0 %v3838_v11  ;;  %v3895_v9 = vcombine.high %v1001_v26, %v1005_v40  ;;  %v1008_v11 = vld [vmem:[#allocation8 + $0x700] sm:$0xff]  ;;  %v1037_v47 = vld [vmem:[#allocation8 + $0x7e8] sm:$0xff] }
 0x237   :  { %2425 = vmatprep.subr.bf16.mxu1 %v3845_v14  ;;  %2531 = vmatprep.subr.bf16.mxu0 %v3847_v10  ;;  %v1012_v14 = vld [vmem:[#allocation8 + $0x720] sm:$0xff]  ;;  %v1009_v10 = vld [vmem:[#allocation8 + $0x708] sm:$0xff] }
 0x238   :  { %v3901_v22 = vcombine.high %v1008_v11, %v1012_v14  ;;  %v3900_v32 = vcombine.low %v1008_v11, %v1012_v14  ;;  %v3902_v33 = vcombine.low %v1009_v10, %v1013_v18  ;;  %v807_v11 = vld [vmem:[#allocation8 + $0xb8] sm:$0xff] }
 0x23a   :  { %2426 = vmatpush1.bf16.msra.mxu1 %v3844_v27  ;;  %2532 = vmatpush1.bf16.msra.mxu0 %v3846_v28  ;;  %v3903_v27 = vcombine.high %v1009_v10, %v1013_v18  ;;  %v1016_v28 = vld [vmem:[#allocation8 + $0x740] sm:$0xff] }
 0x23b   :  { %2427 = vmatprep.subr.bf16.mxu1 %v3853_v29  ;;  %2533 = vmatprep.subr.bf16.mxu0 %v3855_v30  ;;  %v1020_v29 = vld [vmem:[#allocation8 + $0x760] sm:$0xff]  ;;  %v1017_v30 = vld [vmem:[#allocation8 + $0x748] sm:$0xff] }
 0x23c   :  { %v3909_v34 = vcombine.high %v1016_v28, %v1020_v29  ;;  %v3908_v4 = vcombine.low %v1016_v28, %v1020_v29  ;;  %v3910_v41 = vcombine.low %v1017_v30, %v1021_v31  ;;  %v815_v28 = vld [vmem:[#allocation8 + $0xf8] sm:$0xff] }
 0x23e   :  { %2428 = vmatpush1.bf16.msra.mxu1 %v3852_v35  ;;  %2534 = vmatpush1.bf16.msra.mxu0 %v3854_v36  ;;  %v3911_v35 = vcombine.high %v1017_v30, %v1021_v31  ;;  %v1024_v36 = vld [vmem:[#allocation8 + $0x780] sm:$0xff] }
 0x23f   :  { %2429 = vmatprep.subr.bf16.mxu1 %v3861_v37  ;;  %2535 = vmatprep.subr.bf16.mxu0 %v3863_v38  ;;  %v1028_v37 = vld [vmem:[#allocation8 + $0x7a0] sm:$0xff]  ;;  %v1025_v38 = vld [vmem:[#allocation8 + $0x788] sm:$0xff] }
 0x240   :  { %v3917_v42 = vcombine.high %v1024_v36, %v1028_v37  ;;  %v3916_v48 = vcombine.low %v1024_v36, %v1028_v37  ;;  %v3918_v49 = vcombine.low %v1025_v38, %v1029_v3  ;;  %v823_v36 = vld [vmem:[#allocation8 + $0x138] sm:$0xff] }
 0x242   :  { %2430 = vmatpush1.bf16.msra.mxu1 %v3860_v5  ;;  %2536 = vmatpush1.bf16.msra.mxu0 %v3862_v6  ;;  %v3919_v5 = vcombine.high %v1025_v38, %v1029_v3  ;;  %v1032_v6 = vld [vmem:[#allocation8 + $0x7c0] sm:$0xff] }
 0x243   :  { %2431 = vmatprep.subr.bf16.mxu1 %v3869_v45  ;;  %2537 = vmatprep.subr.bf16.mxu0 %v3871_v46  ;;  %v1036_v45 = vld [vmem:[#allocation8 + $0x7e0] sm:$0xff]  ;;  %v1033_v46 = vld [vmem:[#allocation8 + $0x7c8] sm:$0xff] }
 0x244   :  { %v3925_v50 = vcombine.high %v1032_v6, %v1036_v45  ;;  %v3924_v52 = vcombine.low %v1032_v6, %v1036_v45  ;;  %v3926_v53 = vcombine.low %v1033_v46, %v1037_v47  ;;  %v831_v6 = vld [vmem:[#allocation8 + $0x178] sm:$0xff] }
 0x246   :  { %2432 = vmatpush1.bf16.msra.mxu1 %v3868_v56  ;;  %2538 = vmatpush1.bf16.msra.mxu0 %v3870_v57  ;;  %v3927_v56 = vcombine.high %v1033_v46, %v1037_v47  ;;  %v786_v57 = vld [vmem:[#allocation8 + $0x10] sm:$0xff] }
 0x247   :  { %2433 = vmatprep.subr.bf16.mxu1 %v3877_v58  ;;  %2539 = vmatprep.subr.bf16.mxu0 %v3879_v60  ;;  %v790_v58 = vld [vmem:[#allocation8 + $0x30] sm:$0xff]  ;;  %v787_v60 = vld [vmem:[#allocation8 + $0x18] sm:$0xff] }
 0x248   :  { %v3681_v7 = vcombine.high %v786_v57, %v790_v58  ;;  %v3680_v25 = vcombine.low %v786_v57, %v790_v58  ;;  %v3682_v26 = vcombine.low %v787_v60, %v791_v23 }
 0x24a   :  { %2434 = vmatpush1.bf16.msra.mxu1 %v3876_v8  ;;  %2540 = vmatpush1.bf16.msra.mxu0 %v3878_v39  ;;  %v3683_v8 = vcombine.high %v787_v60, %v791_v23  ;;  %v794_v39 = vld [vmem:[#allocation8 + $0x50] sm:$0xff] }
 0x24b   :  { %2435 = vmatprep.subr.bf16.mxu1 %v3885_v54  ;;  %2541 = vmatprep.subr.bf16.mxu0 %v3887_v13  ;;  %v798_v54 = vld [vmem:[#allocation8 + $0x70] sm:$0xff]  ;;  %v795_v13 = vld [vmem:[#allocation8 + $0x58] sm:$0xff] }
 0x24c   :  { %v3689_v40 = vcombine.high %v794_v39, %v798_v54  ;;  %v3688_v14 = vcombine.low %v794_v39, %v798_v54  ;;  %v3690_v10 = vcombine.low %v795_v13, %v799_v24 }
 0x24e   :  { %2436 = vmatpush1.bf16.msra.mxu1 %v3884_v44  ;;  %2542 = vmatpush1.bf16.msra.mxu0 %v3886_v63  ;;  %v3691_v44 = vcombine.high %v795_v13, %v799_v24  ;;  %v802_v63 = vld [vmem:[#allocation8 + $0x90] sm:$0xff] }
 0x24f   :  { %2437 = vmatprep.subr.bf16.mxu1 %v3893_v1  ;;  %2543 = vmatprep.subr.bf16.mxu0 %v3895_v9  ;;  %v806_v1 = vld [vmem:[#allocation8 + $0xb0] sm:$0xff]  ;;  %v803_v9 = vld [vmem:[#allocation8 + $0x98] sm:$0xff] }
 0x250   :  { %v3697_v18 = vcombine.high %v802_v63, %v806_v1  ;;  %v3696_v29 = vcombine.low %v802_v63, %v806_v1  ;;  %v3698_v30 = vcombine.low %v803_v9, %v807_v11 }
 0x252   :  { %2438 = vmatpush1.bf16.msra.mxu1 %v3892_v20  ;;  %2544 = vmatpush1.bf16.msra.mxu0 %v3894_v21  ;;  %v3699_v20 = vcombine.high %v803_v9, %v807_v11  ;;  %v810_v21 = vld [vmem:[#allocation8 + $0xd0] sm:$0xff] }
 0x253   :  { %2439 = vmatprep.subr.bf16.mxu1 %v3901_v22  ;;  %2545 = vmatprep.subr.bf16.mxu0 %v3903_v27  ;;  %v814_v22 = vld [vmem:[#allocation8 + $0xf0] sm:$0xff]  ;;  %v811_v27 = vld [vmem:[#allocation8 + $0xd8] sm:$0xff] }
 0x254   :  { %v3705_v31 = vcombine.high %v810_v21, %v814_v22  ;;  %v3704_v37 = vcombine.low %v810_v21, %v814_v22  ;;  %v3706_v38 = vcombine.low %v811_v27, %v815_v28 }
 0x256   :  { %2440 = vmatpush1.bf16.msra.mxu1 %v3900_v32  ;;  %2546 = vmatpush1.bf16.msra.mxu0 %v3902_v33  ;;  %v3707_v32 = vcombine.high %v811_v27, %v815_v28  ;;  %v818_v33 = vld [vmem:[#allocation8 + $0x110] sm:$0xff] }
 0x257   :  { %2441 = vmatprep.subr.bf16.mxu1 %v3909_v34  ;;  %2547 = vmatprep.subr.bf16.mxu0 %v3911_v35  ;;  %v822_v34 = vld [vmem:[#allocation8 + $0x130] sm:$0xff]  ;;  %v819_v35 = vld [vmem:[#allocation8 + $0x118] sm:$0xff] }
 0x258   :  { %v3713_v3 = vcombine.high %v818_v33, %v822_v34  ;;  %v3712_v45 = vcombine.low %v818_v33, %v822_v34  ;;  %v3714_v46 = vcombine.low %v819_v35, %v823_v36 }
 0x25a   :  { %2442 = vmatpush1.bf16.msra.mxu1 %v3908_v4  ;;  %2548 = vmatpush1.bf16.msra.mxu0 %v3910_v41  ;;  %v3715_v4 = vcombine.high %v819_v35, %v823_v36  ;;  %v826_v41 = vld [vmem:[#allocation8 + $0x150] sm:$0xff] }
 0x25b   :  { %2443 = vmatprep.subr.bf16.mxu1 %v3917_v42  ;;  %2549 = vmatprep.subr.bf16.mxu0 %v3919_v5  ;;  %v830_v42 = vld [vmem:[#allocation8 + $0x170] sm:$0xff]  ;;  %v827_v5 = vld [vmem:[#allocation8 + $0x158] sm:$0xff] }
 0x25c   :  { %v3721_v47 = vcombine.high %v826_v41, %v830_v42  ;;  %v3720_v57 = vcombine.low %v826_v41, %v830_v42  ;;  %v3722_v58 = vcombine.low %v827_v5, %v831_v6 }
 0x25e   :  { %2444 = vmatpush1.bf16.msra.mxu1 %v3916_v48  ;;  %2550 = vmatpush1.bf16.msra.mxu0 %v3918_v49  ;;  %v834_v48 = vld [vmem:[#allocation8 + $0x190] sm:$0xff] }
 0x25f   :  { %2445 = vmatprep.subr.bf16.mxu1 %v3925_v50  ;;  %2551 = vmatprep.subr.bf16.mxu0 %v3927_v56  ;;  %v838_v49 = vld [vmem:[#allocation8 + $0x1b0] sm:$0xff]  ;;  %v835_v50 = vld [vmem:[#allocation8 + $0x198] sm:$0xff] }
 0x260   :  { %v839_v56 = vld [vmem:[#allocation8 + $0x1b8] sm:$0xff]  ;;  %v3729_v60 = vcombine.high %v834_v48, %v838_v49  ;;  %v3728_v39 = vcombine.low %v834_v48, %v838_v49 }
 0x261   :  { %v3731_v23 = vcombine.high %v835_v50, %v839_v56  ;;  %v3730_v54 = vcombine.low %v835_v50, %v839_v56 }
 0x262   :  { %2446 = vmatpush1.bf16.msra.mxu1 %v3924_v52  ;;  %2552 = vmatpush1.bf16.msra.mxu0 %v3926_v53  ;;  %v842_v52 = vld [vmem:[#allocation8 + $0x1d0] sm:$0xff] }
 0x263   :  { %2574 = vmatprep.subr.bf16.mxu1 %v3681_v7  ;;  %2680 = vmatprep.subr.bf16.mxu0 %v3683_v8  ;;  %v846_v53 = vld [vmem:[#allocation8 + $0x1f0] sm:$0xff]  ;;  %v843_v7 = vld [vmem:[#allocation8 + $0x1d8] sm:$0xff] }
 0x264   :  { %v847_v8 = vld [vmem:[#allocation8 + $0x1f8] sm:$0xff]  ;;  %v3737_v13 = vcombine.high %v842_v52, %v846_v53  ;;  %v3736_v63 = vcombine.low %v842_v52, %v846_v53 }
 0x265   :  { %2448 = vmatmul.mubr.bf16.vlgmr.msra.gmra.mrb[8].mxu1 %v4712_v59  ;;  %2554 = vmatmul.mubr.bf16.vlgmr.msra.gmra.mrb[16].mxu0 %v4712_v59  ;;  %v3739_v24 = vcombine.high %v843_v7, %v847_v8  ;;  %v3738_v1 = vcombine.low %v843_v7, %v847_v8 }
 0x266   :  { %2457 = vmatprep.mubr.bf16.mxu1 %v4751_v43  ;;  %2563 = vmatprep.mubr.bf16.mxu0 %v4751_v43 }
 0x267   :  { %2575 = vmatpush1.bf16.msra.mxu1 %v3680_v25  ;;  %2681 = vmatpush1.bf16.msra.mxu0 %v3682_v26  ;;  %v850_v25 = vld [vmem:[#allocation8 + $0x210] sm:$0xff] }
 0x268   :  { %2576 = vmatprep.subr.bf16.mxu1 %v3689_v40  ;;  %2682 = vmatprep.subr.bf16.mxu0 %v3691_v44  ;;  %v854_v26 = vld [vmem:[#allocation8 + $0x230] sm:$0xff]  ;;  %v851_v40 = vld [vmem:[#allocation8 + $0x218] sm:$0xff] }
 0x269   :  { %v855_v44 = vld [vmem:[#allocation8 + $0x238] sm:$0xff]  ;;  %v3745_v9 = vcombine.high %v850_v25, %v854_v26  ;;  %v3744_v21 = vcombine.low %v850_v25, %v854_v26 }
 0x26a   :  { %v3747_v11 = vcombine.high %v851_v40, %v855_v44  ;;  %v3746_v22 = vcombine.low %v851_v40, %v855_v44 }
 0x26b   :  { %2577 = vmatpush1.bf16.msra.mxu1 %v3688_v14  ;;  %2683 = vmatpush1.bf16.msra.mxu0 %v3690_v10  ;;  %v858_v14 = vld [vmem:[#allocation8 + $0x250] sm:$0xff] }
 0x26c   :  { %2578 = vmatprep.subr.bf16.mxu1 %v3697_v18  ;;  %2684 = vmatprep.subr.bf16.mxu0 %v3699_v20  ;;  %v862_v10 = vld [vmem:[#allocation8 + $0x270] sm:$0xff]  ;;  %v859_v18 = vld [vmem:[#allocation8 + $0x258] sm:$0xff] }
 0x26d   :  { %2458 = vmatmul.mubr.bf16.gmra.mrb[12].mxu1 %v4741_v61  ;;  %2564 = vmatmul.mubr.bf16.gmra.mrb[20].mxu0 %v4741_v61  ;;  %v863_v20 = vld [vmem:[#allocation8 + $0x278] sm:$0xff]  ;;  %v3753_v27 = vcombine.high %v858_v14, %v862_v10  ;;  %v3752_v33 = vcombine.low %v858_v14, %v862_v10 }
 0x26e   :  { %2606 = vmatprep.mubr.bf16.mxu1 %v4715_v15  ;;  %2712 = vmatprep.mubr.bf16.mxu0 %v4715_v15  ;;  %v3723_v15 = vcombine.high %v827_v5, %v831_v6  ;;  %v3755_v28 = vcombine.high %v859_v18, %v863_v20  ;;  %v3754_v34 = vcombine.low %v859_v18, %v863_v20 }
 0x26f   :  { %2579 = vmatpush1.bf16.msra.mxu1 %v3696_v29  ;;  %2685 = vmatpush1.bf16.msra.mxu0 %v3698_v30  ;;  %v866_v29 = vld [vmem:[#allocation8 + $0x290] sm:$0xff] }
 0x270   :  { %2580 = vmatprep.subr.bf16.mxu1 %v3705_v31  ;;  %2686 = vmatprep.subr.bf16.mxu0 %v3707_v32  ;;  %v870_v30 = vld [vmem:[#allocation8 + $0x2b0] sm:$0xff]  ;;  %v867_v31 = vld [vmem:[#allocation8 + $0x298] sm:$0xff] }
 0x271   :  { %v871_v32 = vld [vmem:[#allocation8 + $0x2b8] sm:$0xff]  ;;  %v3761_v35 = vcombine.high %v866_v29, %v870_v30  ;;  %v3760_v41 = vcombine.low %v866_v29, %v870_v30 }
 0x272   :  { %v3763_v36 = vcombine.high %v867_v31, %v871_v32  ;;  %v3762_v42 = vcombine.low %v867_v31, %v871_v32 }
 0x273   :  { %2581 = vmatpush1.bf16.msra.mxu1 %v3704_v37  ;;  %2687 = vmatpush1.bf16.msra.mxu0 %v3706_v38  ;;  %v874_v37 = vld [vmem:[#allocation8 + $0x2d0] sm:$0xff] }
 0x274   :  { %2582 = vmatprep.subr.bf16.mxu1 %v3713_v3  ;;  %2688 = vmatprep.subr.bf16.mxu0 %v3715_v4  ;;  %v878_v38 = vld [vmem:[#allocation8 + $0x2f0] sm:$0xff]  ;;  %v875_v3 = vld [vmem:[#allocation8 + $0x2d8] sm:$0xff] }
 0x275   :  { %v879_v4 = vld [vmem:[#allocation8 + $0x2f8] sm:$0xff]  ;;  %v3769_v5 = vcombine.high %v874_v37, %v878_v38  ;;  %v3768_v48 = vcombine.low %v874_v37, %v878_v38 }
 0x276   :  { %v3771_v6 = vcombine.high %v875_v3, %v879_v4  ;;  %v3770_v49 = vcombine.low %v875_v3, %v879_v4 }
 0x277   :  { %2583 = vmatpush1.bf16.msra.mxu1 %v3712_v45  ;;  %2689 = vmatpush1.bf16.msra.mxu0 %v3714_v46  ;;  %v882_v45 = vld [vmem:[#allocation8 + $0x310] sm:$0xff] }
 0x278   :  { %2584 = vmatprep.subr.bf16.mxu1 %v3721_v47  ;;  %2690 = vmatprep.subr.bf16.mxu0 %v3723_v15  ;;  %v886_v46 = vld [vmem:[#allocation8 + $0x330] sm:$0xff]  ;;  %v883_v47 = vld [vmem:[#allocation8 + $0x318] sm:$0xff] }
 0x279   :  { %v887_v15 = vld [vmem:[#allocation8 + $0x338] sm:$0xff]  ;;  %v3777_v50 = vcombine.high %v882_v45, %v886_v46  ;;  %v3776_v52 = vcombine.low %v882_v45, %v886_v46 }
 0x27a   :  { %v3779_v56 = vcombine.high %v883_v47, %v887_v15  ;;  %v3778_v53 = vcombine.low %v883_v47, %v887_v15 }
 0x27b   :  { %2585 = vmatpush1.bf16.msra.mxu1 %v3720_v57  ;;  %2691 = vmatpush1.bf16.msra.mxu0 %v3722_v58  ;;  %v890_v57 = vld [vmem:[#allocation8 + $0x350] sm:$0xff] }
 0x27c   :  { %2586 = vmatprep.subr.bf16.mxu1 %v3729_v60  ;;  %2692 = vmatprep.subr.bf16.mxu0 %v3731_v23  ;;  %v894_v58 = vld [vmem:[#allocation8 + $0x370] sm:$0xff]  ;;  %v891_v60 = vld [vmem:[#allocation8 + $0x358] sm:$0xff] }
 0x27d   :  { %v895_v23 = vld [vmem:[#allocation8 + $0x378] sm:$0xff]  ;;  %v3785_v7 = vcombine.high %v890_v57, %v894_v58  ;;  %v3784_v25 = vcombine.low %v890_v57, %v894_v58 }
 0x27e   :  { %v3787_v8 = vcombine.high %v891_v60, %v895_v23  ;;  %v3786_v26 = vcombine.low %v891_v60, %v895_v23  ;;  %v946_v23 = vld [vmem:[#allocation8 + $0x510] sm:$0xff] }
 0x27f   :  { %2587 = vmatpush1.bf16.msra.mxu1 %v3728_v39  ;;  %2693 = vmatpush1.bf16.msra.mxu0 %v3730_v54  ;;  %v898_v39 = vld [vmem:[#allocation8 + $0x390] sm:$0xff] }
 0x280   :  { %2588 = vmatprep.subr.bf16.mxu1 %v3737_v13  ;;  %2694 = vmatprep.subr.bf16.mxu0 %v3739_v24  ;;  %v902_v54 = vld [vmem:[#allocation8 + $0x3b0] sm:$0xff]  ;;  %v899_v13 = vld [vmem:[#allocation8 + $0x398] sm:$0xff] }
 0x281   :  { %v903_v24 = vld [vmem:[#allocation8 + $0x3b8] sm:$0xff]  ;;  %v3793_v40 = vcombine.high %v898_v39, %v902_v54  ;;  %v3792_v14 = vcombine.low %v898_v39, %v902_v54 }
 0x282   :  { %v3795_v44 = vcombine.high %v899_v13, %v903_v24  ;;  %v3794_v10 = vcombine.low %v899_v13, %v903_v24  ;;  %v954_v13 = vld [vmem:[#allocation8 + $0x550] sm:$0xff] }
 0x283   :  { %2589 = vmatpush1.bf16.msra.mxu1 %v3736_v63  ;;  %2695 = vmatpush1.bf16.msra.mxu0 %v3738_v1  ;;  %v906_v63 = vld [vmem:[#allocation8 + $0x3d0] sm:$0xff] }
 0x284   :  { %2590 = vmatprep.subr.bf16.mxu1 %v3745_v9  ;;  %2696 = vmatprep.subr.bf16.mxu0 %v3747_v11  ;;  %v910_v1 = vld [vmem:[#allocation8 + $0x3f0] sm:$0xff]  ;;  %v907_v9 = vld [vmem:[#allocation8 + $0x3d8] sm:$0xff] }
 0x285   :  { %v911_v11 = vld [vmem:[#allocation8 + $0x3f8] sm:$0xff]  ;;  %v3801_v18 = vcombine.high %v906_v63, %v910_v1  ;;  %v3800_v29 = vcombine.low %v906_v63, %v910_v1  ;;  %v958_v24 = vld [vmem:[#allocation8 + $0x570] sm:$0xff] }
 0x286   :  { %v3803_v20 = vcombine.high %v907_v9, %v911_v11  ;;  %v3802_v30 = vcombine.low %v907_v9, %v911_v11  ;;  %v962_v1 = vld [vmem:[#allocation8 + $0x590] sm:$0xff]  ;;  %v967_v11 = vld [vmem:[#allocation8 + $0x5b8] sm:$0xff] }
 0x287   :  { %2591 = vmatpush1.bf16.msra.mxu1 %v3744_v21  ;;  %2697 = vmatpush1.bf16.msra.mxu0 %v3746_v22  ;;  %v914_v21 = vld [vmem:[#allocation8 + $0x410] sm:$0xff] }
 0x288   :  { %2592 = vmatprep.subr.bf16.mxu1 %v3753_v27  ;;  %2698 = vmatprep.subr.bf16.mxu0 %v3755_v28  ;;  %v918_v22 = vld [vmem:[#allocation8 + $0x430] sm:$0xff]  ;;  %v915_v27 = vld [vmem:[#allocation8 + $0x418] sm:$0xff] }
 0x289   :  { %v919_v28 = vld [vmem:[#allocation8 + $0x438] sm:$0xff]  ;;  %v3809_v31 = vcombine.high %v914_v21, %v918_v22  ;;  %v3808_v37 = vcombine.low %v914_v21, %v918_v22  ;;  %v966_v9 = vld [vmem:[#allocation8 + $0x5b0] sm:$0xff] }
 0x28a   :  { %v3811_v32 = vcombine.high %v915_v27, %v919_v28  ;;  %v3810_v38 = vcombine.low %v915_v27, %v919_v28  ;;  %v970_v21 = vld [vmem:[#allocation8 + $0x5d0] sm:$0xff]  ;;  %v971_v27 = vld [vmem:[#allocation8 + $0x5d8] sm:$0xff] }
 0x28b   :  { %2593 = vmatpush1.bf16.msra.mxu1 %v3752_v33  ;;  %2699 = vmatpush1.bf16.msra.mxu0 %v3754_v34  ;;  %v922_v33 = vld [vmem:[#allocation8 + $0x450] sm:$0xff]  ;;  %v975_v28 = vld [vmem:[#allocation8 + $0x5f8] sm:$0xff] }
 0x28c   :  { %2594 = vmatprep.subr.bf16.mxu1 %v3761_v35  ;;  %2700 = vmatprep.subr.bf16.mxu0 %v3763_v36  ;;  %v926_v34 = vld [vmem:[#allocation8 + $0x470] sm:$0xff]  ;;  %v923_v35 = vld [vmem:[#allocation8 + $0x458] sm:$0xff] }
 0x28d   :  { %v927_v36 = vld [vmem:[#allocation8 + $0x478] sm:$0xff]  ;;  %v3817_v3 = vcombine.high %v922_v33, %v926_v34  ;;  %v3816_v45 = vcombine.low %v922_v33, %v926_v34  ;;  %v974_v22 = vld [vmem:[#allocation8 + $0x5f0] sm:$0xff] }
 0x28e   :  { %v3819_v4 = vcombine.high %v923_v35, %v927_v36  ;;  %v3818_v46 = vcombine.low %v923_v35, %v927_v36  ;;  %v978_v33 = vld [vmem:[#allocation8 + $0x610] sm:$0xff]  ;;  %v979_v35 = vld [vmem:[#allocation8 + $0x618] sm:$0xff] }
 0x28f   :  { %2595 = vmatpush1.bf16.msra.mxu1 %v3760_v41  ;;  %2701 = vmatpush1.bf16.msra.mxu0 %v3762_v42  ;;  %v930_v41 = vld [vmem:[#allocation8 + $0x490] sm:$0xff]  ;;  %v983_v36 = vld [vmem:[#allocation8 + $0x638] sm:$0xff] }
 0x290   :  { %2596 = vmatprep.subr.bf16.mxu1 %v3769_v5  ;;  %2702 = vmatprep.subr.bf16.mxu0 %v3771_v6  ;;  %v934_v42 = vld [vmem:[#allocation8 + $0x4b0] sm:$0xff]  ;;  %v931_v5 = vld [vmem:[#allocation8 + $0x498] sm:$0xff] }
 0x291   :  { %v935_v6 = vld [vmem:[#allocation8 + $0x4b8] sm:$0xff]  ;;  %v3825_v47 = vcombine.high %v930_v41, %v934_v42  ;;  %v982_v34 = vld [vmem:[#allocation8 + $0x630] sm:$0xff] }
 0x292   :  { %v3827_v15 = vcombine.high %v931_v5, %v935_v6  ;;  %v3826_v57 = vcombine.low %v931_v5, %v935_v6  ;;  %v987_v5 = vld [vmem:[#allocation8 + $0x658] sm:$0xff] }
 0x293   :  { %2597 = vmatpush1.bf16.msra.mxu1 %v3768_v48  ;;  %2703 = vmatpush1.bf16.msra.mxu0 %v3770_v49  ;;  %v938_v48 = vld [vmem:[#allocation8 + $0x4d0] sm:$0xff]  ;;  %v991_v6 = vld [vmem:[#allocation8 + $0x678] sm:$0xff] }
 0x294   :  { %2598 = vmatprep.subr.bf16.mxu1 %v3777_v50  ;;  %2704 = vmatprep.subr.bf16.mxu0 %v3779_v56  ;;  %v942_v49 = vld [vmem:[#allocation8 + $0x4f0] sm:$0xff]  ;;  %v939_v50 = vld [vmem:[#allocation8 + $0x4d8] sm:$0xff] }
 0x295   :  { %v943_v56 = vld [vmem:[#allocation8 + $0x4f8] sm:$0xff]  ;;  %v3833_v58 = vcombine.high %v938_v48, %v942_v49 }
 0x296   :  { %v3835_v60 = vcombine.high %v939_v50, %v943_v56 }
 0x297   :  { %2599 = vmatpush1.bf16.msra.mxu1 %v3776_v52  ;;  %2705 = vmatpush1.bf16.msra.mxu0 %v3778_v53  ;;  %v947_v52 = vld [vmem:[#allocation8 + $0x518] sm:$0xff] }
 0x298   :  { %2600 = vmatprep.subr.bf16.mxu1 %v3785_v7  ;;  %2706 = vmatprep.subr.bf16.mxu0 %v3787_v8  ;;  %v951_v53 = vld [vmem:[#allocation8 + $0x538] sm:$0xff]  ;;  %v3832_v7 = vcombine.low %v938_v48, %v942_v49  ;;  %v3834_v8 = vcombine.low %v939_v50, %v943_v56  ;;  %v994_v48 = vld [vmem:[#allocation8 + $0x690] sm:$0xff] }
 0x299   :  { %v3843_v54 = vcombine.high %v947_v52, %v951_v53  ;;  %v998_v49 = vld [vmem:[#allocation8 + $0x6b0] sm:$0xff]  ;;  %v995_v50 = vld [vmem:[#allocation8 + $0x698] sm:$0xff] }
 0x29a   :  { %v999_v56 = vld [vmem:[#allocation8 + $0x6b8] sm:$0xff] }
 0x29b   :  { %2601 = vmatpush1.bf16.msra.mxu1 %v3784_v25  ;;  %2707 = vmatpush1.bf16.msra.mxu0 %v3786_v26  ;;  %v955_v25 = vld [vmem:[#allocation8 + $0x558] sm:$0xff] }
 0x29c   :  { %2602 = vmatprep.subr.bf16.mxu1 %v3793_v40  ;;  %2708 = vmatprep.subr.bf16.mxu0 %v3795_v44  ;;  %v959_v26 = vld [vmem:[#allocation8 + $0x578] sm:$0xff]  ;;  %v3842_v40 = vcombine.low %v947_v52, %v951_v53  ;;  %v3849_v44 = vcombine.high %v954_v13, %v958_v24 }
 0x29d   :  { %v3851_v63 = vcombine.high %v955_v25, %v959_v26  ;;  %v1003_v52 = vld [vmem:[#allocation8 + $0x6d8] sm:$0xff] }
 0x29e   :  { %v1007_v53 = vld [vmem:[#allocation8 + $0x6f8] sm:$0xff] }
 0x29f   :  { %2603 = vmatpush1.bf16.msra.mxu1 %v3792_v14  ;;  %2709 = vmatpush1.bf16.msra.mxu0 %v3794_v10  ;;  %v3848_v14 = vcombine.low %v954_v13, %v958_v24  ;;  %v3850_v10 = vcombine.low %v955_v25, %v959_v26  ;;  %v1010_v13 = vld [vmem:[#allocation8 + $0x710] sm:$0xff]  ;;  %v1011_v25 = vld [vmem:[#allocation8 + $0x718] sm:$0xff] }
 0x2a0   :  { %2604 = vmatprep.subr.bf16.mxu1 %v3801_v18  ;;  %2710 = vmatprep.subr.bf16.mxu0 %v3803_v20  ;;  %v3857_v18 = vcombine.high %v962_v1, %v966_v9  ;;  %v1014_v24 = vld [vmem:[#allocation8 + $0x730] sm:$0xff]  ;;  %v1015_v26 = vld [vmem:[#allocation8 + $0x738] sm:$0xff] }
 0x2a3   :  { %2605 = vmatpush1.bf16.msra.mxu1 %v3800_v29  ;;  %2711 = vmatpush1.bf16.msra.mxu0 %v3802_v30  ;;  %v3856_v29 = vcombine.low %v962_v1, %v966_v9  ;;  %v1018_v1 = vld [vmem:[#allocation8 + $0x750] sm:$0xff] }
 0x2a4   :  { %2627 = vmatprep.subr.bf16.mxu1 %v3809_v31  ;;  %2733 = vmatprep.subr.bf16.mxu0 %v3811_v32  ;;  %v3865_v31 = vcombine.high %v970_v21, %v974_v22  ;;  %v3867_v32 = vcombine.high %v971_v27, %v975_v28  ;;  %v1022_v9 = vld [vmem:[#allocation8 + $0x770] sm:$0xff] }
 0x2a6   :  { %2607 = vmatmul.mubr.bf16.vlgmr.msra.gmra.mrb[16].mxu1 %v4710_v55  ;;  %2713 = vmatmul.mubr.bf16.vlgmr.msra.gmra.mrb[24].mxu0 %v4710_v55  ;;  %v3824_v55 = vcombine.low %v930_v41, %v934_v42  ;;  %v986_v41 = vld [vmem:[#allocation8 + $0x650] sm:$0xff] }
 0x2a7   :  { %2616 = vmatprep.mubr.bf16.mxu1 %v4743_v62  ;;  %2628 = vmatpush1.bf16.msra.mxu1 %v3808_v37  ;;  %v3864_v37 = vcombine.low %v970_v21, %v974_v22  ;;  %v990_v42 = vld [vmem:[#allocation8 + $0x670] sm:$0xff] }
 0x2a8   :  { %2722 = vmatprep.mubr.bf16.mxu0 %v4743_v62  ;;  %2734 = vmatpush1.bf16.msra.mxu0 %v3810_v38  ;;  %v950_v62 = vld [vmem:[#allocation8 + $0x530] sm:$0xff]  ;;  %v3866_v38 = vcombine.low %v971_v27, %v975_v28  ;;  %v1027_v27 = vld [vmem:[#allocation8 + $0x798] sm:$0xff] }
 0x2a9   :  { %2629 = vmatprep.subr.bf16.mxu1 %v3817_v3  ;;  %2735 = vmatprep.subr.bf16.mxu0 %v3819_v4  ;;  %v3841_v39 = vcombine.high %v946_v23, %v950_v62  ;;  %v3873_v3 = vcombine.high %v978_v33, %v982_v34  ;;  %v3875_v4 = vcombine.high %v979_v35, %v983_v36  ;;  %v1026_v21 = vld [vmem:[#allocation8 + $0x790] sm:$0xff]  ;;  %v1031_v28 = vld [vmem:[#allocation8 + $0x7b8] sm:$0xff] }
 0x2aa   :  { %v1030_v22 = vld [vmem:[#allocation8 + $0x7b0] sm:$0xff] }
 0x2ab   :  { %2630 = vmatpush1.bf16.msra.mxu1 %v3816_v45  ;;  %v3872_v45 = vcombine.low %v978_v33, %v982_v34  ;;  %v1034_v33 = vld [vmem:[#allocation8 + $0x7d0] sm:$0xff] }
 0x2ac   :  { %2736 = vmatpush1.bf16.msra.mxu0 %v3818_v46  ;;  %2631 = vmatprep.subr.bf16.mxu1 %v3825_v47  ;;  %v3874_v46 = vcombine.low %v979_v35, %v983_v36  ;;  %v3881_v47 = vcombine.high %v986_v41, %v990_v42  ;;  %v1038_v34 = vld [vmem:[#allocation8 + $0x7f0] sm:$0xff]  ;;  %v1035_v35 = vld [vmem:[#allocation8 + $0x7d8] sm:$0xff] }
 0x2ad   :  { %2737 = vmatprep.subr.bf16.mxu0 %v3827_v15  ;;  %v3883_v15 = vcombine.high %v987_v5, %v991_v6  ;;  %v1039_v36 = vld [vmem:[#allocation8 + $0x7f8] sm:$0xff] }
 0x2ae   :  { %2617 = vmatmul.mubr.bf16.gmra.mrb[20].mxu1 %v4737_v51  ;;  %2723 = vmatmul.mubr.bf16.gmra.mrb[28].mxu0 %v4737_v51  ;;  %v3840_v51 = vcombine.low %v946_v23, %v950_v62  ;;  %v1002_v23 = vld [vmem:[#allocation8 + $0x6d0] sm:$0xff] }
 0x2af   :  { %2632 = vmatpush1.bf16.msra.mxu1 %v3824_v55  ;;  %2659 = vmatprep.mubr.bf16.mxu1 %v4717_v12  ;;  %v3880_v55 = vcombine.low %v986_v41, %v990_v42  ;;  %v1006_v62 = vld [vmem:[#allocation8 + $0x6f0] sm:$0xff]  ;;  %v3928_v41 = vcombine.low %v1034_v33, %v1038_v34  ;;  %v3930_v42 = vcombine.low %v1035_v35, %v1039_v36 }
 0x2b0   :  { %2738 = vmatpush1.bf16.msra.mxu0 %v3826_v57  ;;  %2765 = vmatprep.mubr.bf16.mxu0 %v4717_v12  ;;  %v963_v12 = vld [vmem:[#allocation8 + $0x598] sm:$0xff]  ;;  %v3882_v57 = vcombine.low %v987_v5, %v991_v6  ;;  %v4292_v5 = vld [vmem:[#allocation10 + $0x40] sm:$0xff]  }
 0x2b1   :  { %2633 = vmatprep.subr.bf16.mxu1 %v3833_v58  ;;  %2739 = vmatprep.subr.bf16.mxu0 %v3835_v60  ;;  %v3859_v20 = vcombine.high %v963_v12, %v967_v11  ;;  %v3858_v30 = vcombine.low %v963_v12, %v967_v11  ;;  %v3889_v58 = vcombine.high %v994_v48, %v998_v49  ;;  %v1019_v12 = vld [vmem:[#allocation8 + $0x758] sm:$0xff]  ;;  %v4293_v6 = vld [vmem:[#allocation10 + $0xc0] sm:$0xff]  }
 0x2b2   :  { %v3891_v60 = vcombine.high %v995_v50, %v999_v56  ;;  %v1023_v11 = vld [vmem:[#allocation8 + $0x778] sm:$0xff] }
 0x2b3   :  { %2634 = vmatpush1.bf16.msra.mxu1 %v3832_v7  ;;  %v3888_v7 = vcombine.low %v994_v48, %v998_v49  ;;  %v4298_v48 = vld [vmem:[#allocation10 + $0x8] sm:$0xff]  }
 0x2b4   :  { %2740 = vmatpush1.bf16.msra.mxu0 %v3834_v8  ;;  %2635 = vmatprep.subr.bf16.mxu1 %v3841_v39  ;;  %v3890_v8 = vcombine.low %v995_v50, %v999_v56  ;;  %v3897_v39 = vcombine.high %v1002_v23, %v1006_v62  ;;  %v4299_v49 = vld [vmem:[#allocation10 + $0x88] sm:$0xff]   ;;  %v4300_v50 = vld [vmem:[#allocation10 + $0x50] sm:$0xff]  }
 0x2b5   :  { %2741 = vmatprep.subr.bf16.mxu0 %v3843_v54  ;;  %v3899_v54 = vcombine.high %v1003_v52, %v1007_v53  ;;  %v4301_v56 = vld [vmem:[#allocation10 + $0xd0] sm:$0xff]  }
 0x2b7   :  { %2636 = vmatpush1.bf16.msra.mxu1 %v3840_v51  ;;  %v3896_v51 = vcombine.low %v1002_v23, %v1006_v62  ;;  %v4308_v23 = vld [vmem:[#allocation10 + $0x60] sm:$0xff]  }
 0x2b8   :  { %2742 = vmatpush1.bf16.msra.mxu0 %v3842_v40  ;;  %2637 = vmatprep.subr.bf16.mxu1 %v3849_v44  ;;  %v3898_v40 = vcombine.low %v1003_v52, %v1007_v53  ;;  %v3905_v44 = vcombine.high %v1010_v13, %v1014_v24  ;;  %v4309_v62 = vld [vmem:[#allocation10 + $0xe0] sm:$0xff]  }
 0x2b9   :  { %2743 = vmatprep.subr.bf16.mxu0 %v3851_v63  ;;  %v3907_v63 = vcombine.high %v1011_v25, %v1015_v26  ;;  %v4310_v52 = vld [vmem:[#allocation10 + $0x20] sm:$0xff]  }
 0x2ba   :  { %v4311_v53 = vld [vmem:[#allocation10 + $0xa0] sm:$0xff]  }
 0x2bb   :  { %2638 = vmatpush1.bf16.msra.mxu1 %v3848_v14  ;;  %v3904_v14 = vcombine.low %v1010_v13, %v1014_v24  ;;  %v4317_v13 = vld [vmem:[#allocation10 + $0xf0] sm:$0xff]  }
 0x2bc   :  { %2744 = vmatpush1.bf16.msra.mxu0 %v3850_v10  ;;  %2639 = vmatprep.subr.bf16.mxu1 %v3857_v18  ;;  %v3906_v10 = vcombine.low %v1011_v25, %v1015_v26  ;;  %v3913_v18 = vcombine.high %v1018_v1, %v1022_v9  ;;  %v4318_v24 = vld [vmem:[#allocation10 + $0x30] sm:$0xff]   ;;  %v4320_v26 = vld [vmem:[#allocation10 + $0x78] sm:$0xff]  }
 0x2bd   :  { %2745 = vmatprep.subr.bf16.mxu0 %v3859_v20  ;;  %v3915_v20 = vcombine.high %v1019_v12, %v1023_v11  ;;  %v4319_v25 = vld [vmem:[#allocation10 + $0xb0] sm:$0xff]  }
 0x2bf   :  { %2640 = vmatpush1.bf16.msra.mxu1 %v3856_v29  ;;  %v3912_v29 = vcombine.low %v1018_v1, %v1022_v9  ;;  %v4325_v1 = vld [vmem:[#allocation10 + $0x1c0] sm:$0xff]   ;;  %v4787_v9 = vld [vmem:[%s4831_s6] sm:$0xff] }
 0x2c0   :  { %2746 = vmatpush1.bf16.msra.mxu0 %v3858_v30  ;;  %2641 = vmatprep.subr.bf16.mxu1 %v3865_v31  ;;  %v3914_v30 = vcombine.low %v1019_v12, %v1023_v11  ;;  %v3921_v31 = vcombine.high %v1026_v21, %v1030_v22  ;;  %v1045_v12 = vrot.slane %v4787_v9, %v4639_v17 }
 0x2c1   :  { %2747 = vmatprep.subr.bf16.mxu0 %v3867_v32  ;;  %v3923_v32 = vcombine.high %v1027_v27, %v1031_v28  ;;  %v1053_v11 = vrot.slane %v4787_v9, %v308_v0 }
 0x2c3   :  { %2642 = vmatpush1.bf16.msra.mxu1 %v3864_v37  ;;  %v3920_v37 = vcombine.low %v1026_v21, %v1030_v22 }
 0x2c4   :  { %2748 = vmatpush1.bf16.msra.mxu0 %v3866_v38  ;;  %2643 = vmatprep.subr.bf16.mxu1 %v3873_v3  ;;  %v3922_v38 = vcombine.low %v1027_v27, %v1031_v28  ;;  %v3929_v3 = vcombine.high %v1034_v33, %v1038_v34 }
 0x2c5   :  { %2749 = vmatprep.subr.bf16.mxu0 %v3875_v4  ;;  %v3931_v4 = vcombine.high %v1035_v35, %v1039_v36 }
 0x2c7   :  { %2644 = vmatpush1.bf16.msra.mxu1 %v3872_v45  ;;  %v4294_v45 = vld [vmem:[#allocation10] sm:$0xff]  }
 0x2c8   :  { %2750 = vmatpush1.bf16.msra.mxu0 %v3874_v46  ;;  %2645 = vmatprep.subr.bf16.mxu1 %v3881_v47  ;;  %v4295_v46 = vld [vmem:[#allocation10 + $0x80] sm:$0xff]   ;;  %v4296_v47 = vld [vmem:[#allocation10 + $0x48] sm:$0xff]  }
 0x2c9   :  { %2751 = vmatprep.subr.bf16.mxu0 %v3883_v15  ;;  %v4297_v15 = vld [vmem:[#allocation10 + $0xc8] sm:$0xff]  }
 0x2cb   :  { %2646 = vmatpush1.bf16.msra.mxu1 %v3880_v55  ;;  %v4302_v55 = vld [vmem:[#allocation10 + $0x10] sm:$0xff]  }
 0x2cc   :  { %2752 = vmatpush1.bf16.msra.mxu0 %v3882_v57  ;;  %2647 = vmatprep.subr.bf16.mxu1 %v3889_v58  ;;  %v4303_v57 = vld [vmem:[#allocation10 + $0x90] sm:$0xff]   ;;  %v4304_v58 = vld [vmem:[#allocation10 + $0x58] sm:$0xff]  }
 0x2cd   :  { %2753 = vmatprep.subr.bf16.mxu0 %v3891_v60  ;;  %v4307_v60 = vld [vmem:[#allocation10 + $0x98] sm:$0xff]  }
 0x2cf   :  { %2648 = vmatpush1.bf16.msra.mxu1 %v3888_v7  ;;  %v4312_v7 = vld [vmem:[#allocation10 + $0x68] sm:$0xff]  }
 0x2d0   :  { %2754 = vmatpush1.bf16.msra.mxu0 %v3890_v8  ;;  %2649 = vmatprep.subr.bf16.mxu1 %v3897_v39  ;;  %v4313_v8 = vld [vmem:[#allocation10 + $0xe8] sm:$0xff]  }
 0x2d1   :  { %2755 = vmatprep.subr.bf16.mxu0 %v3899_v54  ;;  %v4314_v39 = vld [vmem:[#allocation10 + $0x28] sm:$0xff]   ;;  %v4316_v54 = vld [vmem:[#allocation10 + $0x70] sm:$0xff]  }
 0x2d3   :  { %2650 = vmatpush1.bf16.msra.mxu1 %v3896_v51  ;;  %v4321_v51 = vld [vmem:[#allocation10 + $0xf8] sm:$0xff]  }
 0x2d4   :  { %2756 = vmatpush1.bf16.msra.mxu0 %v3898_v40  ;;  %2651 = vmatprep.subr.bf16.mxu1 %v3905_v44  ;;  %v4322_v40 = vld [vmem:[#allocation10 + $0x38] sm:$0xff]  }
 0x2d5   :  { %2757 = vmatprep.subr.bf16.mxu0 %v3907_v63  ;;  %v4323_v44 = vld [vmem:[#allocation10 + $0xb8] sm:$0xff]   ;;  %v4324_v63 = vld [vmem:[#allocation10 + $0x140] sm:$0xff]  }
 0x2d7   :  { %2652 = vmatpush1.bf16.msra.mxu1 %v3904_v14  ;;  %v1049_v14 = vrot.slane %v4787_v9, %v4645_v19 }
 0x2d8   :  { %2758 = vmatpush1.bf16.msra.mxu0 %v3906_v10  ;;  %2653 = vmatprep.subr.bf16.mxu1 %v3913_v18  ;;  %v1057_v10 = vrot.slane %v4787_v9, %v312_v2 }
 0x2d9   :  { %2759 = vmatprep.subr.bf16.mxu0 %v3915_v20 }
 0x2db   :  { %2654 = vmatpush1.bf16.msra.mxu1 %v3912_v29 }
 0x2dc   :  { %2760 = vmatpush1.bf16.msra.mxu0 %v3914_v30  ;;  %2655 = vmatprep.subr.bf16.mxu1 %v3921_v31 }
 0x2dd   :  { %2761 = vmatprep.subr.bf16.mxu0 %v3923_v32 }
 0x2df   :  { %2656 = vmatpush1.bf16.msra.mxu1 %v3920_v37 }
 0x2e0   :  { %2762 = vmatpush1.bf16.msra.mxu0 %v3922_v38  ;;  %2657 = vmatprep.subr.bf16.mxu1 %v3929_v3 }
 0x2e1   :  { %2763 = vmatprep.subr.bf16.mxu0 %v3931_v4 }
 0x2e3   :  { %2658 = vmatpush1.bf16.msra.mxu1 %v3928_v41 }
 0x2e4   :  { %2764 = vmatpush1.bf16.msra.mxu0 %v3930_v42  ;;  %3997 = vmatprep.subr.bf16.mxu1 %v4292_v5 }
 0x2e5   :  { %4025 = vmatprep.subr.bf16.mxu0 %v4293_v6 }
 0x2e6   :  { %2660 = vmatmul.mubr.bf16.vlgmr.msra.gmra.mrb[16].mxu1 %v4712_v59 }
 0x2e7   :  { %2766 = vmatmul.mubr.bf16.vlgmr.msra.gmra.mrb[24].mxu0 %v4712_v59  ;;  %2669 = vmatprep.mubr.bf16.mxu1 %v4751_v43  ;;  %v4305_v59 = vld [vmem:[#allocation10 + $0xd8] sm:$0xff]  }
 0x2e8   :  { %2775 = vmatprep.mubr.bf16.mxu0 %v4751_v43  ;;  %3998 = vmatpush3.bf16.msra.mxu1 %v4294_v45  ;;  %v4306_v43 = vld [vmem:[#allocation10 + $0x18] sm:$0xff]  }
 0x2e9   :  { %4026 = vmatpush3.bf16.msra.mxu0 %v4295_v46  ;;  %3999 = vmatprep.subr.bf16.mxu1 %v4296_v47 }
 0x2ea   :  { %4027 = vmatprep.subr.bf16.mxu0 %v4297_v15 }
 0x2ec   :  { %4000 = vmatpush3.bf16.msra.mxu1 %v4298_v48 }
 0x2ed   :  { %4028 = vmatpush3.bf16.msra.mxu0 %v4299_v49  ;;  %4001 = vmatprep.subr.bf16.mxu1 %v4300_v50 }
 0x2ee   :  { %2670 = vmatmul.mubr.bf16.gmra.mrb[20].mxu1 %v4741_v61  ;;  %4029 = vmatprep.subr.bf16.mxu0 %v4301_v56 }
 0x2ef   :  { %2776 = vmatmul.mubr.bf16.gmra.mrb[28].mxu0 %v4741_v61  ;;  %v4315_v61 = vld [vmem:[#allocation10 + $0xa8] sm:$0xff]  }
 0x2f0   :  { %4002 = vmatpush3.bf16.msra.mxu1 %v4302_v55 }
 0x2f1   :  { %4030 = vmatpush3.bf16.msra.mxu0 %v4303_v57  ;;  %4003 = vmatprep.subr.bf16.mxu1 %v4304_v58 }
 0x2f2   :  { %4031 = vmatprep.subr.bf16.mxu0 %v4305_v59 }
 0x2f4   :  { %4004 = vmatpush3.bf16.msra.mxu1 %v4306_v43 }
 0x2f5   :  { %4032 = vmatpush3.bf16.msra.mxu0 %v4307_v60  ;;  %4005 = vmatprep.subr.bf16.mxu1 %v4308_v23  ;;  %v4326_v23 = vld [vmem:[#allocation10 + $0x100] sm:$0xff]  }
 0x2f6   :  { %4033 = vmatprep.subr.bf16.mxu0 %v4309_v62 }
 0x2f8   :  { %4006 = vmatpush3.bf16.msra.mxu1 %v4310_v52 }
 0x2f9   :  { %4034 = vmatpush3.bf16.msra.mxu0 %v4311_v53  ;;  %4007 = vmatprep.subr.bf16.mxu1 %v4312_v7 }
 0x2fa   :  { %4035 = vmatprep.subr.bf16.mxu0 %v4313_v8 }
 0x2fc   :  { %4008 = vmatpush3.bf16.msra.mxu1 %v4314_v39 }
 0x2fd   :  { %4036 = vmatpush3.bf16.msra.mxu0 %v4315_v61  ;;  %4009 = vmatprep.subr.bf16.mxu1 %v4316_v54  ;;  %v4327_v61 = vld [vmem:[#allocation10 + $0x180] sm:$0xff]   ;;  %v4328_v54 = vld [vmem:[#allocation10 + $0x148] sm:$0xff]  }
 0x2fe   :  { %4037 = vmatprep.subr.bf16.mxu0 %v4317_v13  ;;  %v4329_v13 = vld [vmem:[#allocation10 + $0x1c8] sm:$0xff]  }
 0x300   :  { %4010 = vmatpush3.bf16.msra.mxu1 %v4318_v24 }
 0x301   :  { %4038 = vmatpush3.bf16.msra.mxu0 %v4319_v25  ;;  %4011 = vmatprep.subr.bf16.mxu1 %v4320_v26 }
 0x302   :  { %4039 = vmatprep.subr.bf16.mxu0 %v4321_v51 }
 0x304   :  { %4012 = vmatpush3.bf16.msra.mxu1 %v4322_v40 }
 0x305   :  { %4040 = vmatpush3.bf16.msra.mxu0 %v4323_v44  ;;  %4053 = vmatprep.subr.bf16.mxu1 %v4324_v63 }
 0x306   :  { %4081 = vmatprep.subr.bf16.mxu0 %v4325_v1 }
 0x338   :  { %v2449_v18 = vpop.f32.mrb[8].mxu1  ;;  %v2555_v20 = vpop.f32.mrb[16].mxu0 }
 0x339   :  { %v4109_v21 = vadd.f32 %v2449_v18, %v1045_v12  ;;  %v4117_v22 = vadd.f32 %v2555_v20, %v1053_v11  ;;  %v2451_v27 = vpop.f32.mrb[9].mxu1  ;;  %v2557_v28 = vpop.f32.mrb[17].mxu0 }
 0x33a   :  { %v4110_v29 = vadd.f32 %v2451_v27, %v1049_v14  ;;  %v4118_v30 = vadd.f32 %v2557_v28, %v1057_v10  ;;  %v2453_v17 = vpop.f32.mrb[10].mxu1  ;;  %v2559_v31 = vpop.f32.mrb[18].mxu0 }
 0x33b   :  { %v2786_v32 = vmul.f32 0.01, %v4109_v21  ;;  %v2788_v33 = vmul.f32 0.01, %v4117_v22  ;;  %v4111_v0 = vadd.f32 %v2453_v17, %v1045_v12  ;;  %v4119_v34 = vadd.f32 %v2559_v31, %v1053_v11  ;;  %v2455_v35 = vpop.f32.mrb[11].mxu1  ;;  %v2561_v19 = vpop.f32.mrb[19].mxu0 }
 0x33c   :  { %v2787_v36 = vmul.f32 0.01, %v4110_v29  ;;  %v2789_v37 = vmul.f32 0.01, %v4118_v30  ;;  %v4112_v38 = vadd.f32 %v2455_v35, %v1049_v14  ;;  %v4120_v2 = vadd.f32 %v2561_v19, %v1057_v10 }
 0x33d   :  { %v2794_v3 = vmul.f32 0.01, %v4111_v0  ;;  %v2796_v4 = vmul.f32 0.01, %v4119_v34  ;;  %v2818_v5 = vmax.f32 %v4109_v21, %v2786_v32  ;;  %v2820_v6 = vmax.f32 %v4117_v22, %v2788_v33 }
 0x33e   :  { %v2795_v41 = vmul.f32 0.01, %v4112_v38  ;;  %v2797_v42 = vmul.f32 0.01, %v4120_v2  ;;  %v2819_v47 = vmax.f32 %v4110_v29, %v2787_v36  ;;  %v2821_v15 = vmax.f32 %v4118_v30, %v2789_v37  ;;  %v4330_v30 = vld [vmem:[#allocation10 + $0x108] sm:$0xff]  }
 0x33f   :  { %v2826_v45 = vmax.f32 %v4111_v0, %v2794_v3  ;;  %v2828_v46 = vmax.f32 %v4119_v34, %v2796_v4  ;;  %v4336_v3 = vld [vmem:[#allocation10 + $0x158] sm:$0xff]  }
 0x340   :  { %v2827_v48 = vmax.f32 %v4112_v38, %v2795_v41  ;;  %v2829_v49 = vmax.f32 %v4120_v2, %v2797_v42  ;;  %v2459_v50 = vpop.f32.mrb[12].mxu1  ;;  %v2565_v56 = vpop.f32.mrb[20].mxu0  ;;  %v4334_v38 = vld [vmem:[#allocation10 + $0x110] sm:$0xff]   ;;  %v4337_v4 = vld [vmem:[#allocation10 + $0x1d8] sm:$0xff]  }
 0x341   :  { %v2850_v55 = vpack.c.bf16 %v2826_v45, %v2818_v5  ;;  %v2852_v57 = vpack.c.bf16 %v2828_v46, %v2820_v6  ;;  %v4113_v58 = vadd.f32 %v2459_v50, %v1045_v12  ;;  %v4121_v59 = vadd.f32 %v2565_v56, %v1053_v11  ;;  %v2461_v43 = vpop.f32.mrb[13].mxu1  ;;  %v2567_v60 = vpop.f32.mrb[21].mxu0  ;;  %v4335_v2 = vld [vmem:[#allocation10 + $0x190] sm:$0xff]   ;;  %v4338_v41 = vld [vmem:[#allocation10 + $0x118] sm:$0xff]   ;;  %v4340_v5 = vld [vmem:[#allocation10 + $0x160] sm:$0xff]  }
 0x342   :  { %v4114_v62 = vadd.f32 %v2461_v43, %v1049_v14  ;;  %v4122_v52 = vadd.f32 %v2567_v60, %v1057_v10  ;;  %v2463_v53 = vpop.f32.mrb[14].mxu1  ;;  %v2569_v7 = vpop.f32.mrb[22].mxu0  ;;  %v2851_v8 = vpack.c.bf16 %v2827_v48, %v2819_v47  ;;  %v2853_v39 = vpack.c.bf16 %v2829_v49, %v2821_v15  ;;  %v4339_v42 = vld [vmem:[#allocation10 + $0x198] sm:$0xff]   ;;  %v4341_v6 = vld [vmem:[#allocation10 + $0x1e0] sm:$0xff]   ;;  %v4344_v47 = vld [vmem:[#allocation10 + $0x168] sm:$0xff]  }
 0x343   :  { %v2802_v24 = vmul.f32 0.01, %v4113_v58  ;;  %v2804_v25 = vmul.f32 0.01, %v4121_v59  ;;  %v4115_v26 = vadd.f32 %v2463_v53, %v1045_v12  ;;  %v4123_v51 = vadd.f32 %v2569_v7, %v1053_v11  ;;  %v2465_v40 = vpop.f32.mrb[15].mxu1  ;;  %v2571_v44 = vpop.f32.mrb[23].mxu0 }
 0x344   :  { %v2803_v63 = vmul.f32 0.01, %v4114_v62  ;;  %v2805_v1 = vmul.f32 0.01, %v4122_v52  ;;  %v4116_v18 = vadd.f32 %v2465_v40, %v1049_v14  ;;  %v4124_v20 = vadd.f32 %v2571_v44, %v1057_v10  ;;  %3417 = vmatprep.mubr.bf16.mxu1 %v2851_v8  ;;  %3466 = vmatprep.mubr.bf16.mxu0 %v2853_v39  ;;  %v4331_v12 = vld [vmem:[#allocation10 + $0x188] sm:$0xff]   ;;  %v4332_v14 = vld [vmem:[#allocation10 + $0x150] sm:$0xff]  }
 0x345   :  { %v2810_v21 = vmul.f32 0.01, %v4115_v26  ;;  %v2812_v22 = vmul.f32 0.01, %v4123_v51  ;;  %3418 = vmatmul.mubr.bf16.vlgmr.msra.gmra.mrb[24].mxu1 %v2850_v55  ;;  %3467 = vmatmul.mubr.bf16.vlgmr.msra.gmra.mrb[32].mxu0 %v2852_v57  ;;  %v2834_v27 = vmax.f32 %v4113_v58, %v2802_v24  ;;  %v2836_v11 = vmax.f32 %v4121_v59, %v2804_v25  ;;  %v4333_v10 = vld [vmem:[#allocation10 + $0x1d0] sm:$0xff]   ;;  %v4342_v45 = vld [vmem:[#allocation10 + $0x120] sm:$0xff]  }
 0x346   :  { %v2811_v28 = vmul.f32 0.01, %v4116_v18  ;;  %v2813_v29 = vmul.f32 0.01, %v4124_v20  ;;  %4054 = vmatpush3.bf16.msra.mxu1 %v4326_v23  ;;  %4082 = vmatpush3.bf16.msra.mxu0 %v4327_v61  ;;  %v2835_v32 = vmax.f32 %v4114_v62, %v2803_v63  ;;  %v2837_v33 = vmax.f32 %v4122_v52, %v2805_v1  ;;  %v4343_v46 = vld [vmem:[#allocation10 + $0x1a0] sm:$0xff]   ;;  %v4345_v15 = vld [vmem:[#allocation10 + $0x1e8] sm:$0xff]  }
 0x347   :  { %v2842_v17 = vmax.f32 %v4115_v26, %v2810_v21  ;;  %v2844_v31 = vmax.f32 %v4123_v51, %v2812_v22  ;;  %4055 = vmatprep.subr.bf16.mxu1 %v4328_v54  ;;  %4083 = vmatprep.subr.bf16.mxu0 %v4329_v13  ;;  %v4346_v48 = vld [vmem:[#allocation10 + $0x128] sm:$0xff]   ;;  %v4348_v50 = vld [vmem:[#allocation10 + $0x170] sm:$0xff]   ;;  %v4352_v58 = vld [vmem:[#allocation10 + $0x178] sm:$0xff]   ;;  %v1060_v23 = vsub.s32 4, %v4636_v16  ;;  %v1068_v62 = vsub.s32 6, %v4636_v16 }
 0x348   :  { %v2843_v0 = vmax.f32 %v4116_v18, %v2811_v28  ;;  %v2845_v34 = vmax.f32 %v4124_v20, %v2813_v29  ;;  %v4347_v49 = vld [vmem:[#allocation10 + $0x1a8] sm:$0xff]   ;;  %v4349_v56 = vld [vmem:[#allocation10 + $0x1f0] sm:$0xff]   ;;  %v4353_v59 = vld [vmem:[#allocation10 + $0x1f8] sm:$0xff]   ;;  %v1064_v52 = vsub.s32 5, %v4636_v16  ;;  %v1072_v53 = vsub.s32 7, %v4636_v16 }
 0x349   :  { %v2858_v35 = vpack.c.bf16 %v2842_v17, %v2834_v27  ;;  %v2860_v19 = vpack.c.bf16 %v2844_v31, %v2836_v11  ;;  %v4350_v55 = vld [vmem:[#allocation10 + $0x130] sm:$0xff]   ;;  %v4354_v43 = vld [vmem:[#allocation10 + $0x138] sm:$0xff]   ;;  %v1061_v7 = vrot.slane %v4787_v9, %v1060_v23  ;;  %v1069_v8 = vrot.slane %v4787_v9, %v1068_v62 }
 0x34a   :  { %v2859_v36 = vpack.c.bf16 %v2843_v0, %v2835_v32  ;;  %v2861_v37 = vpack.c.bf16 %v2845_v34, %v2837_v33  ;;  %4056 = vmatpush3.bf16.msra.mxu1 %v4330_v30  ;;  %4084 = vmatpush3.bf16.msra.mxu0 %v4331_v12  ;;  %v4351_v57 = vld [vmem:[#allocation10 + $0x1b0] sm:$0xff]   ;;  %v4355_v60 = vld [vmem:[#allocation10 + $0x1b8] sm:$0xff]   ;;  %v1065_v39 = vrot.slane %v4787_v9, %v1064_v52 }
 0x34b   :  { %4057 = vmatprep.subr.bf16.mxu1 %v4332_v14  ;;  %4085 = vmatprep.subr.bf16.mxu0 %v4333_v10  ;;  %v1073_v61 = vrot.slane %v4787_v9, %v1072_v53 }
 0x34c   :  { %3425 = vmatprep.mubr.bf16.mxu1 %v2859_v36  ;;  %3474 = vmatprep.mubr.bf16.mxu0 %v2861_v37 }
 0x34d   :  { %3426 = vmatmul.mubr.bf16.gmra.mrb[28].mxu1 %v2858_v35  ;;  %3475 = vmatmul.mubr.bf16.gmra.mrb[36].mxu0 %v2860_v19 }
 0x34e   :  { %4058 = vmatpush3.bf16.msra.mxu1 %v4334_v38  ;;  %4086 = vmatpush3.bf16.msra.mxu0 %v4335_v2 }
 0x34f   :  { %4059 = vmatprep.subr.bf16.mxu1 %v4336_v3  ;;  %4087 = vmatprep.subr.bf16.mxu0 %v4337_v4 }
 0x352   :  { %4060 = vmatpush3.bf16.msra.mxu1 %v4338_v41  ;;  %4088 = vmatpush3.bf16.msra.mxu0 %v4339_v42 }
 0x353   :  { %4061 = vmatprep.subr.bf16.mxu1 %v4340_v5  ;;  %4089 = vmatprep.subr.bf16.mxu0 %v4341_v6 }
 0x356   :  { %4062 = vmatpush3.bf16.msra.mxu1 %v4342_v45  ;;  %4090 = vmatpush3.bf16.msra.mxu0 %v4343_v46 }
 0x357   :  { %4063 = vmatprep.subr.bf16.mxu1 %v4344_v47  ;;  %4091 = vmatprep.subr.bf16.mxu0 %v4345_v15 }
 0x35a   :  { %4064 = vmatpush3.bf16.msra.mxu1 %v4346_v48  ;;  %4092 = vmatpush3.bf16.msra.mxu0 %v4347_v49 }
 0x35b   :  { %4065 = vmatprep.subr.bf16.mxu1 %v4348_v50  ;;  %4093 = vmatprep.subr.bf16.mxu0 %v4349_v56 }
 0x35e   :  { %4066 = vmatpush3.bf16.msra.mxu1 %v4350_v55  ;;  %4094 = vmatpush3.bf16.msra.mxu0 %v4351_v57 }
 0x35f   :  { %4067 = vmatprep.subr.bf16.mxu1 %v4352_v58  ;;  %4095 = vmatprep.subr.bf16.mxu0 %v4353_v59 }
 0x362   :  { %4068 = vmatpush3.bf16.msra.mxu1 %v4354_v43  ;;  %4096 = vmatpush3.bf16.msra.mxu0 %v4355_v60 }
 0x3b9   :  { %v2661_v54 = vpop.f32.mrb[16].mxu1 }
 0x3ba   :  { %v4125_v13 = vadd.f32 %v2661_v54, %v1061_v7  ;;  %v2767_v24 = vpop.f32.mrb[24].mxu0  ;;  %v2663_v25 = vpop.f32.mrb[17].mxu1 }
 0x3bb   :  { %v4133_v26 = vadd.f32 %v2767_v24, %v1069_v8  ;;  %v4126_v51 = vadd.f32 %v2663_v25, %v1065_v39  ;;  %v2769_v40 = vpop.f32.mrb[25].mxu0  ;;  %v2665_v44 = vpop.f32.mrb[18].mxu1 }
 0x3bc   :  { %v2790_v63 = vmul.f32 0.01, %v4125_v13  ;;  %v4134_v1 = vadd.f32 %v2769_v40, %v1073_v61  ;;  %v4127_v18 = vadd.f32 %v2665_v44, %v1061_v7  ;;  %v2771_v16 = vpop.f32.mrb[26].mxu0  ;;  %v2667_v20 = vpop.f32.mrb[19].mxu1 }
 0x3bd   :  { %v2792_v21 = vmul.f32 0.01, %v4133_v26  ;;  %v2791_v22 = vmul.f32 0.01, %v4126_v51  ;;  %v4135_v27 = vadd.f32 %v2771_v16, %v1069_v8  ;;  %v4128_v28 = vadd.f32 %v2667_v20, %v1065_v39  ;;  %v2773_v29 = vpop.f32.mrb[27].mxu0 }
 0x3be   :  { %v2793_v30 = vmul.f32 0.01, %v4134_v1  ;;  %v2798_v9 = vmul.f32 0.01, %v4127_v18  ;;  %v4136_v12 = vadd.f32 %v2773_v29, %v1073_v61  ;;  %v2822_v31 = vmax.f32 %v4125_v13, %v2790_v63 }
 0x3bf   :  { %v2800_v11 = vmul.f32 0.01, %v4135_v27  ;;  %v2799_v17 = vmul.f32 0.01, %v4128_v28  ;;  %v2824_v32 = vmax.f32 %v4133_v26, %v2792_v21  ;;  %v2823_v33 = vmax.f32 %v4126_v51, %v2791_v22 }
 0x3c0   :  { %v2830_v14 = vmax.f32 %v4127_v18, %v2798_v9  ;;  %v2801_v10 = vmul.f32 0.01, %v4136_v12  ;;  %v2825_v19 = vmax.f32 %v4134_v1, %v2793_v30  ;;  %v3932_v18 = vld [vmem:[%s4833_s8] ss:$0 sm:$0xff]  ;;  %s4510_s8 = smov [#allocation11]  }
 0x3c1   :  { %v2832_v0 = vmax.f32 %v4135_v27, %v2800_v11  ;;  %v2831_v34 = vmax.f32 %v4128_v28, %v2799_v17  ;;  %v2671_v35 = vpop.f32.mrb[20].mxu1  ;;  %s3590_s15 = sshll.u32 %s4510_s8, 4  ;;  %s3591_s15 = int_to_ptr.vmem [resolvable:$true] %s3590_s15 }
 0x3c2   :  { %v2854_v36 = vpack.c.bf16 %v2830_v14, %v2822_v31  ;;  %v2833_v37 = vmax.f32 %v4136_v12, %v2801_v10  ;;  %v4129_v38 = vadd.f32 %v2671_v35, %v1061_v7  ;;  %v2777_v2 = vpop.f32.mrb[28].mxu0  ;;  %v2673_v3 = vpop.f32.mrb[21].mxu1  ;;  %s4466_s17 = scalar_lea.vmem %s3591_s15, 512  ;;  %p4471_p13 = scmp.lt.s32.totalorder %s3591_s15, %s3591_s15 }
 0x3c3   :  { %v2856_v4 = vpack.c.bf16 %v2832_v0, %v2824_v32  ;;  %v4137_v41 = vadd.f32 %v2777_v2, %v1069_v8  ;;  %v4130_v42 = vadd.f32 %v2673_v3, %v1065_v39  ;;  %v2779_v5 = vpop.f32.mrb[29].mxu0  ;;  %v2675_v6 = vpop.f32.mrb[22].mxu1  ;;  %v2855_v45 = vpack.c.bf16 %v2831_v34, %v2823_v33  ;;  %p4467_p12 = scmp.ne.s32.totalorder %s3591_s15, %s4466_s17  ;;  %p4472_p0 = scmp.lt.s32.totalorder %s4466_s17, %s4466_s17 }
 0x3c4   :  { %v2806_v46 = vmul.f32 0.01, %v4129_v38  ;;  %v4138_v47 = vadd.f32 %v2779_v5, %v1073_v61  ;;  %v4131_v15 = vadd.f32 %v2675_v6, %v1061_v7  ;;  %v2781_v48 = vpop.f32.mrb[30].mxu0  ;;  %v2677_v49 = vpop.f32.mrb[23].mxu1  ;;  %v2857_v50 = vpack.c.bf16 %v2833_v37, %v2825_v19 }
 0x3c5   :  { %v2808_v56 = vmul.f32 0.01, %v4137_v41  ;;  %v2807_v55 = vmul.f32 0.01, %v4130_v42  ;;  %v4139_v57 = vadd.f32 %v2781_v48, %v1069_v8  ;;  %v4132_v58 = vadd.f32 %v2677_v49, %v1065_v39  ;;  %v2783_v59 = vpop.f32.mrb[31].mxu0  ;;  %3515 = vmatprep.mubr.bf16.mxu1 %v2855_v45  ;;  %p4473_p1 = por %p4472_p0, %p4471_p13 }
 0x3c6   :  { %v2809_v43 = vmul.f32 0.01, %v4138_v47  ;;  %v2814_v60 = vmul.f32 0.01, %v4131_v15  ;;  %v4140_v23 = vadd.f32 %v2783_v59, %v1073_v61  ;;  %3564 = vmatprep.mubr.bf16.mxu0 %v2857_v50  ;;  %3516 = vmatmul.mubr.bf16.vlgmr.msra.gmra.mrb[32].mxu1 %v2854_v36  ;;  %v2838_v53 = vmax.f32 %v4129_v38, %v2806_v46 }
 0x3c7   :  { %v2816_v62 = vmul.f32 0.01, %v4139_v57  ;;  %v2815_v52 = vmul.f32 0.01, %v4132_v58  ;;  %3565 = vmatmul.mubr.bf16.vlgmr.msra.gmra.mrb[40].mxu0 %v2856_v4  ;;  %v2840_v13 = vmax.f32 %v4137_v41, %v2808_v56  ;;  %v2839_v24 = vmax.f32 %v4130_v42, %v2807_v55  ;;  %p4474_p2 = pnand %p4473_p1, %p4467_p12 }
 0x3c8   :  { %v2846_v54 = vmax.f32 %v4131_v15, %v2814_v60  ;;  %v2817_v7 = vmul.f32 0.01, %v4140_v23  ;;  %v2841_v51 = vmax.f32 %v4138_v47, %v2809_v43 }
 0x3c9   :  { %v2848_v25 = vmax.f32 %v4139_v57, %v2816_v62  ;;  %v2847_v26 = vmax.f32 %v4132_v58, %v2815_v52 }
 0x3ca   :  { %v2849_v8 = vmax.f32 %v4140_v23, %v2817_v7  ;;  %v2862_v39 = vpack.c.bf16 %v2846_v54, %v2838_v53 }
 0x3cb   :  { %v2863_v40 = vpack.c.bf16 %v2847_v26, %v2839_v24  ;;  %v2864_v44 = vpack.c.bf16 %v2848_v25, %v2840_v13 }
 0x3cc   :  { %v2865_v63 = vpack.c.bf16 %v2849_v8, %v2841_v51 }
 0x3cd   :  { %3523 = vmatprep.mubr.bf16.mxu1 %v2863_v40 }
 0x3ce   :  { %3572 = vmatprep.mubr.bf16.mxu0 %v2865_v63  ;;  %3524 = vmatmul.mubr.bf16.gmra.mrb[36].mxu1 %v2862_v39 }
 0x3cf   :  { %3573 = vmatmul.mubr.bf16.gmra.mrb[44].mxu0 %v2864_v44 }
 0x418   :  { %v4013_v61 = vpop.f32.mrb[24].mxu1  ;;  %v4041_v1 = vpop.f32.mrb[32].mxu0 }
 0x419   :  { %v4014_v16 = vpop.f32.mrb[25].mxu1  ;;  %v4042_v20 = vpop.f32.mrb[33].mxu0 }
 0x41a   :  { %v4015_v21 = vadd.f32 %v4014_v16, %v4013_v61  ;;  %v4043_v22 = vadd.f32 %v4042_v20, %v4041_v1  ;;  %v4016_v27 = vpop.f32.mrb[26].mxu1  ;;  %v4044_v28 = vpop.f32.mrb[34].mxu0 }
 0x41b   :  { %v4017_v29 = vpop.f32.mrb[27].mxu1  ;;  %v4045_v30 = vpop.f32.mrb[35].mxu0 }
 0x41c   :  { %v3420_v9 = vadd.f32 %v4015_v21, %v3932_v18  ;;  %v4018_v12 = vadd.f32 %v4017_v29, %v4016_v27  ;;  %v4046_v11 = vadd.f32 %v4045_v30, %v4044_v28 }
 0x41e   :  { %v3469_v17 = vadd.f32 %v4043_v22, %v3420_v9  ;;  %v3423_v31 = vadd.f32 %v4018_v12, %v3932_v18 }
 0x420   :  { %v3472_v14 = vadd.f32 %v4046_v11, %v3423_v31  ;;  %v4019_v10 = vpop.f32.mrb[28].mxu1  ;;  %v4047_v32 = vpop.f32.mrb[36].mxu0 }
 0x421   :  { %v4020_v33 = vpop.f32.mrb[29].mxu1  ;;  %v4048_v0 = vpop.f32.mrb[37].mxu0 }
 0x422   :  { %v4021_v34 = vadd.f32 %v4020_v33, %v4019_v10  ;;  %v4049_v35 = vadd.f32 %v4048_v0, %v4047_v32  ;;  %v4022_v19 = vpop.f32.mrb[30].mxu1  ;;  %v4050_v36 = vpop.f32.mrb[38].mxu0 }
 0x423   :  { %v4023_v37 = vpop.f32.mrb[31].mxu1  ;;  %v4051_v38 = vpop.f32.mrb[39].mxu0 }
 0x424   :  { %v3428_v2 = vadd.f32 %v4021_v34, %v3932_v18  ;;  %v4024_v3 = vadd.f32 %v4023_v37, %v4022_v19  ;;  %v4052_v4 = vadd.f32 %v4051_v38, %v4050_v36 }
 0x426   :  { %v3477_v41 = vadd.f32 %v4049_v35, %v3428_v2  ;;  %v3431_v42 = vadd.f32 %v4024_v3, %v3932_v18 }
 0x428   :  { %v3480_v5 = vadd.f32 %v4052_v4, %v3431_v42 }
 0x499   :  { %v4069_v6 = vpop.f32.mrb[32].mxu1 }
 0x49a   :  { %v4097_v45 = vpop.f32.mrb[40].mxu0  ;;  %v4070_v46 = vpop.f32.mrb[33].mxu1 }
 0x49b   :  { %v4071_v47 = vadd.f32 %v4070_v46, %v4069_v6  ;;  %v4098_v15 = vpop.f32.mrb[41].mxu0  ;;  %v4072_v48 = vpop.f32.mrb[34].mxu1 }
 0x49c   :  { %v4099_v49 = vadd.f32 %v4098_v15, %v4097_v45  ;;  %v4100_v50 = vpop.f32.mrb[42].mxu0  ;;  %v4073_v56 = vpop.f32.mrb[35].mxu1 }
 0x49d   :  { %v3518_v55 = vadd.f32 %v4071_v47, %v3469_v17  ;;  %v4074_v57 = vadd.f32 %v4073_v56, %v4072_v48  ;;  %v4101_v58 = vpop.f32.mrb[43].mxu0 }
 0x49e   :  { %v4102_v59 = vadd.f32 %v4101_v58, %v4100_v50 }
 0x49f   :  { %v3567_v43 = vadd.f32 %v4099_v49, %v3518_v55  ;;  %v3521_v60 = vadd.f32 %v4074_v57, %v3472_v14 }
 0x4a1   :  { %3581 = vst [vmem:[#allocation11] sm:$0xff] %v3567_v43  ;;  %v3570_v23 = vadd.f32 %v4102_v59, %v3521_v60  ;;  %v4075_v62 = vpop.f32.mrb[36].mxu1 }
 0x4a2   :  { %v4103_v52 = vpop.f32.mrb[44].mxu0  ;;  %v4076_v53 = vpop.f32.mrb[37].mxu1 }
 0x4a3   :  { %3582 = vst [vmem:[#allocation11 + $0x8] sm:$0xff] %v3570_v23  ;;  %v4077_v54 = vadd.f32 %v4076_v53, %v4075_v62  ;;  %v4104_v7 = vpop.f32.mrb[45].mxu0  ;;  %v4078_v13 = vpop.f32.mrb[38].mxu1 }
 0x4a4   :  { %v4105_v24 = vadd.f32 %v4104_v7, %v4103_v52  ;;  %v4106_v25 = vpop.f32.mrb[46].mxu0  ;;  %v4079_v26 = vpop.f32.mrb[39].mxu1 }
 0x4a5   :  { %v3526_v51 = vadd.f32 %v4077_v54, %v3477_v41  ;;  %v4080_v8 = vadd.f32 %v4079_v26, %v4078_v13  ;;  %v4107_v39 = vpop.f32.mrb[47].mxu0 }
 0x4a6   :  { %v4108_v40 = vadd.f32 %v4107_v39, %v4106_v25 }
 0x4a7   :  { %v3575_v44 = vadd.f32 %v4105_v24, %v3526_v51  ;;  %v3529_v63 = vadd.f32 %v4080_v8, %v3480_v5 }
 0x4a9   :  { %3583 = vst [vmem:[#allocation11 + $0x10] sm:$0xff] %v3575_v44  ;;  %v3578_v61 = vadd.f32 %v4108_v40, %v3529_v63 }
 0x4ab   :  { %3584 = vst [vmem:[#allocation11 + $0x18] sm:$0xff] %v3578_v61 }
 0x4ac   :  { %4477 = shalt.err (!%p4474_p2)
}
 0x4ad   :  { %s4478_s16 = scalar_lea.hbm %s4834_s9, 512 }
 0x4ae   :  { %p4479_p3 = scmp.ne.s32.totalorder %s4834_s9, %s4478_s16  ;;  %p4482_p4 = scmp.lt.u32.totalorder %s4478_s16, %s4834_s9 }
 0x4b0   :  { %p4484_p5 = pnand %p4482_p4, %p4479_p3 }
 0x4b2   :  { %4487 = shalt.err (!%p4484_p5)
}
 0x4b3   :  { %3596 = dma.vmem_to_hbm [thread:$0]  %s3591_s15, 512, %s4834_s9, [#allocation4], %s4497_s19, %s4497_s19, %s4498_s20  }
 0x4b4   :  { %4494 = dma.done.wait [#allocation4], 512  }
 0x4b5   :  { %4495 = vsyncadd [#allocation4], 4294966784 }
 0x4b6   :  { %3600 = vsyncpa [#allocation3], 1 }
 0x4b7   :  { %3601 = vsyncpa [#allocation6], 1 }
 0x4b8   :  { %3602 = vsyncpa [#allocation9], 1 }
 0x4b9   :  { %3603 = vsyncpa [#allocation4], 1 }

// kernel: tpu_custom_call.1
= control target key start
LH: loop header
LB: loop body
LE: loop exit
PB: predicated region body
PF: predicated region fallthrough
CT: control target
= control target key end

     0   :  { %14 = vsyncpa [#allocation3], 0  ;;  %s4825_s0 = inlined_call_operand.hbm [shape: bf16[32,32], index: 0, kind: input, shape index: {}]   ;;  %s4826_s1 = inlined_call_operand.hbm [shape: bf16[32,256], index: 1, kind: input, shape index: {}]   ;;  %s4827_s2 = inlined_call_operand.vmem [shape: f32[1,256], index: 2, kind: input, shape index: {}]   ;;  %s4828_s3 = inlined_call_operand.hbm [shape: bf16[256,512], index: 3, kind: input, shape index: {}]   ;;  %s4829_s4 = inlined_call_operand.vmem [shape: f32[1,512], index: 4, kind: input, shape index: {}]   ;;  %s4830_s5 = inlined_call_operand.hbm [shape: bf16[512,1024], index: 5, kind: input, shape index: {}]   ;;  %s4831_s6 = inlined_call_operand.vmem [shape: f32[1,1024], index: 6, kind: input, shape index: {}]   ;;  %s4832_s7 = inlined_call_operand.hbm [shape: bf16[1024,128], index: 7, kind: input, shape index: {}]   ;;  %s4833_s8 = inlined_call_operand.vmem [shape: f32[1,128], index: 8, kind: input, shape index: {}]   ;;  %s4834_s9 = inlined_call_operand.hbm [shape: f32[32,128], index: 9, kind: output, shape index: {}]  }
   0x1   :  { %15 = vsyncpa [#allocation6], 0 }
   0x2   :  { %16 = vsyncpa [#allocation9], 0 }
   0x3   :  { %17 = vsyncpa [#allocation4], 0  ;;  %s4496_s30 = smov [#allocation5]   ;;  %s4356_s13 = scalar_lea.hbm %s4826_s1, 512 }
   0x4   :  { %s35_s10 = sshll.u32 %s4496_s30, 4  ;;  %p4357_p0 = scmp.ne.s32.totalorder %s4826_s1, %s4356_s13  ;;  %s36_s10 = int_to_ptr.vmem [resolvable:$true] %s35_s10 }
   0x5   :  { %p4360_p1 = scmp.lt.u32.totalorder %s4356_s13, %s4826_s1 }
   0x7   :  { %p4362_p2 = pnand %p4360_p1, %p4357_p0 }
   0x9   :  { %4365 = shalt.err (!%p4362_p2)
}
   0xa   :  { %s4366_s18 = scalar_lea.vmem %s36_s10, 512  ;;  %p4371_p4 = scmp.lt.s32.totalorder %s36_s10, %s36_s10 }
   0xb   :  { %p4367_p3 = scmp.ne.s32.totalorder %s36_s10, %s4366_s18  ;;  %p4372_p5 = scmp.lt.s32.totalorder %s4366_s18, %s4366_s18 }
   0xd   :  { %p4373_p6 = por %p4372_p5, %p4371_p4 }
   0xf   :  { %p4374_p7 = pnand %p4373_p6, %p4367_p3 }
  0x11   :  { %4377 = shalt.err (!%p4374_p7)
}
  0x12   :  { %s4497_s19 = smov 128   ;;  %s4498_s20 = smov 8  }
  0x13   :  { %41 = dma.hbm_to_vmem [thread:$0]  %s4826_s1, 512, %s36_s10, [#allocation6], %s4497_s19, %s4497_s19, %s4498_s20  }
  0x14   :  { %s4499_s23 = smov [#allocation8]   ;;  %s4378_s27 = scalar_lea.hbm %s4830_s5, 32768 }
  0x15   :  { %s63_s24 = sshll.u32 %s4499_s23, 4  ;;  %p4379_p8 = scmp.ne.s32.totalorder %s4830_s5, %s4378_s27  ;;  %s64_s24 = int_to_ptr.vmem [resolvable:$true] %s63_s24 }
  0x16   :  { %p4382_p9 = scmp.lt.u32.totalorder %s4378_s27, %s4830_s5 }
  0x18   :  { %p4384_p10 = pnand %p4382_p9, %p4379_p8 }
  0x1a   :  { %4387 = shalt.err (!%p4384_p10)
}
  0x1b   :  { %s4388_s12 = scalar_lea.vmem %s64_s24, 32768  ;;  %p4393_p12 = scmp.lt.s32.totalorder %s64_s24, %s64_s24 }
  0x1c   :  { %p4389_p11 = scmp.ne.s32.totalorder %s64_s24, %s4388_s12  ;;  %p4394_p13 = scmp.lt.s32.totalorder %s4388_s12, %s4388_s12 }
  0x1e   :  { %p4395_p0 = por %p4394_p13, %p4393_p12 }
  0x20   :  { %p4396_p1 = pnand %p4395_p0, %p4389_p11 }
  0x22   :  { %4399 = shalt.err (!%p4396_p1)
}
  0x23   :  { %s4500_s1 = smov 512   ;;  %s4501_s10 = smov 32  }
  0x24   :  { %69 = dma.hbm_to_vmem [thread:$0]  %s4830_s5, 32768, %s64_s24, [#allocation9], %s4500_s1, %s4500_s1, %s4501_s10  }
  0x25   :  { %s4502_s15 = smov [#allocation2]   ;;  %s4400_s21 = scalar_lea.hbm %s4825_s0, 256 }
  0x26   :  { %s23_s16 = sshll.u32 %s4502_s15, 4  ;;  %p4401_p2 = scmp.ne.s32.totalorder %s4825_s0, %s4400_s21  ;;  %s24_s16 = int_to_ptr.vmem [resolvable:$true] %s23_s16 }
  0x27   :  { %p4404_p3 = scmp.lt.u32.totalorder %s4400_s21, %s4825_s0 }
  0x29   :  { %p4406_p4 = pnand %p4404_p3, %p4401_p2 }
  0x2b   :  { %4409 = shalt.err (!%p4406_p4)
}
  0x2c   :  { %s4410_s27 = scalar_lea.vmem %s24_s16, 256  ;;  %p4415_p6 = scmp.lt.s32.totalorder %s24_s16, %s24_s16 }
  0x2d   :  { %p4411_p5 = scmp.ne.s32.totalorder %s24_s16, %s4410_s27  ;;  %p4416_p7 = scmp.lt.s32.totalorder %s4410_s27, %s4410_s27 }
  0x2f   :  { %p4417_p8 = por %p4416_p7, %p4415_p6 }
  0x31   :  { %p4418_p9 = pnand %p4417_p8, %p4411_p5 }
  0x33   :  { %4421 = shalt.err (!%p4418_p9)
}
  0x34   :  { %s4503_s5 = smov 64   ;;  %s4504_s24 = smov 4  }
  0x35   :  { %29 = dma.hbm_to_vmem [thread:$0]  %s4825_s0, 256, %s24_s16, [#allocation3], %s4503_s5, %s4503_s5, %s4504_s24  }
  0x36   :  { %s4505_s30 = smov [#allocation7]   ;;  %s4422_s10 = scalar_lea.hbm %s4828_s3, 8192 }
  0x37   :  { %s49_s11 = sshll.u32 %s4505_s30, 4  ;;  %p4423_p10 = scmp.ne.s32.totalorder %s4828_s3, %s4422_s10  ;;  %s50_s11 = int_to_ptr.vmem [resolvable:$true] %s49_s11 }
  0x38   :  { %p4426_p11 = scmp.lt.u32.totalorder %s4422_s10, %s4828_s3 }
  0x3a   :  { %p4428_p12 = pnand %p4426_p11, %p4423_p10 }
  0x3c   :  { %4431 = shalt.err (!%p4428_p12)
}
  0x3d   :  { %s4432_s18 = scalar_lea.vmem %s50_s11, 8192  ;;  %p4437_p0 = scmp.lt.s32.totalorder %s50_s11, %s50_s11 }
  0x3e   :  { %p4433_p13 = scmp.ne.s32.totalorder %s50_s11, %s4432_s18  ;;  %p4438_p1 = scmp.lt.s32.totalorder %s4432_s18, %s4432_s18 }
  0x40   :  { %p4439_p2 = por %p4438_p1, %p4437_p0 }
  0x42   :  { %p4440_p3 = pnand %p4439_p2, %p4433_p13 }
  0x44   :  { %4443 = shalt.err (!%p4440_p3)
}
  0x45   :  { %s4506_s0 = smov 256   ;;  %s4507_s16 = smov 16  }
  0x46   :  { %55 = dma.hbm_to_vmem [thread:$0]  %s4828_s3, 8192, %s50_s11, [#allocation6], %s4506_s0, %s4506_s0, %s4507_s16  }
  0x47   :  { %s4508_s23 = smov [#allocation10]   ;;  %s4444_s28 = scalar_lea.hbm %s4832_s7, 8192 }
  0x48   :  { %s77_s25 = sshll.u32 %s4508_s23, 4  ;;  %p4445_p4 = scmp.ne.s32.totalorder %s4832_s7, %s4444_s28  ;;  %s78_s25 = int_to_ptr.vmem [resolvable:$true] %s77_s25 }
  0x49   :  { %p4448_p5 = scmp.lt.u32.totalorder %s4444_s28, %s4832_s7 }
  0x4b   :  { %p4450_p6 = pnand %p4448_p5, %p4445_p4 }
  0x4d   :  { %4453 = shalt.err (!%p4450_p6)
}
  0x4e   :  { %s4454_s10 = scalar_lea.vmem %s78_s25, 8192  ;;  %p4459_p8 = scmp.lt.s32.totalorder %s78_s25, %s78_s25 }
  0x4f   :  { %p4455_p7 = scmp.ne.s32.totalorder %s78_s25, %s4454_s10  ;;  %p4460_p9 = scmp.lt.s32.totalorder %s4454_s10, %s4454_s10 }
  0x51   :  { %p4461_p10 = por %p4460_p9, %p4459_p8 }
  0x53   :  { %p4462_p11 = pnand %p4461_p10, %p4455_p7 }
  0x55   :  { %4465 = shalt.err (!%p4462_p11)
}
  0x56   :  { %83 = dma.hbm_to_vmem [thread:$0]  %s4832_s7, 8192, %s78_s25, [#allocation9], %s4503_s5, %s4503_s5, %s4504_s24  }
  0x57   :  { %4488 = dma.done.wait [#allocation3], 256  }
  0x58   :  { %4489 = vsyncadd [#allocation3], 4294967040 }
  0x59   :  { %4490 = dma.done.wait [#allocation6], 8704  }
  0x5a   :  { %4491 = vsyncadd [#allocation6], 4294958592 }
  0x5b   :  { %4492 = dma.done.wait [#allocation9], 40960  }
  0x5c   :  { %4493 = vsyncadd [#allocation9], 4294926336  ;;  %v4509_v0 = vmov 0   ;;  %v4188_v1 = vld [vmem:[#allocation5 + $0x4] ss:$8 sps:$4 sm:$0xff]   ;;  %v4194_v5 = vld [vmem:[#allocation2] sm:$0xff]  }
  0x5d   :  { %191 = vmatprep.mubr.bf16.mxu0 %v4509_v0  ;;  %v4190_v2 = vld [vmem:[#allocation5] ss:$8 sps:$4 sm:$0xff]   ;;  %159 = vmatprep.subr.bf16.mxu0 %v4188_v1  ;;  %v4191_v3 = vld [vmem:[#allocation5 + $0x14] ss:$8 sps:$4 sm:$0xff]   ;;  %v4193_v4 = vld [vmem:[#allocation5 + $0x10] ss:$8 sps:$4 sm:$0xff]  }
  0x5e   :  { %160 = vmatpush1.bf16.msra.mxu0 %v4190_v2  ;;  %v4196_v6 = vld [vmem:[#allocation7 + $0x4] ss:$16 sps:$4 sm:$0xff]   ;;  %v4198_v7 = vld [vmem:[#allocation7 + $0x8] ss:$16 sps:$4 sm:$0xff]   ;;  %v4200_v8 = vld [vmem:[#allocation7 + $0xc] ss:$16 sps:$4 sm:$0xff]  }
  0x5f   :  { %161 = vmatprep.subr.bf16.mxu0 %v4191_v3  ;;  %vm152_vm0 = vcmask 261120   ;;  %638 = vmatprep.subr.bf16.mxu1 %v4196_v6  ;;  %v4201_v9 = vld [vmem:[#allocation7] ss:$16 sps:$4 sm:$0xff]   ;;  %v4202_v10 = vld [vmem:[#allocation7 + $0x24] ss:$16 sps:$4 sm:$0xff]   ;;  %v4195_v17 = vld [vmem:[#allocation2 + $0x8] sm:$0xff]  }
  0x60   :  { %639 = vmatpush1.bf16.msra.mxu1 %v4201_v9  ;;  %v4206_v11 = vld [vmem:[#allocation7 + $0x2c] ss:$16 sps:$4 sm:$0xff]   ;;  %v4207_v12 = vld [vmem:[#allocation7 + $0x20] ss:$16 sps:$4 sm:$0xff]   ;;  %v4208_v13 = vld [vmem:[#allocation7 + $0x44] ss:$16 sps:$4 sm:$0xff]  }
  0x61   :  { %640 = vmatprep.subr.bf16.mxu1 %v4202_v10  ;;  %v4204_v14 = vld [vmem:[#allocation7 + $0x28] ss:$16 sps:$4 sm:$0xff]   ;;  %v4212_v15 = vld [vmem:[#allocation7 + $0x4c] ss:$16 sps:$4 sm:$0xff]   ;;  %v4213_v16 = vld [vmem:[#allocation7 + $0x40] ss:$16 sps:$4 sm:$0xff]  }
  0x62   :  { %162 = vmatpush1.bf16.msra.mxu0 %v4193_v4  ;;  %v4214_v18 = vld [vmem:[#allocation7 + $0x64] ss:$16 sps:$4 sm:$0xff]   ;;  %v4210_v19 = vld [vmem:[#allocation7 + $0x48] ss:$16 sps:$4 sm:$0xff]   ;;  %v4218_v20 = vld [vmem:[#allocation7 + $0x6c] ss:$16 sps:$4 sm:$0xff]  }
  0x63   :  { %691 = vmatprep.subr.bf16.mxu0 %v4200_v8  ;;  %v4219_v21 = vld [vmem:[#allocation7 + $0x60] ss:$16 sps:$4 sm:$0xff]   ;;  %v4220_v22 = vld [vmem:[#allocation7 + $0x84] ss:$16 sps:$4 sm:$0xff]   ;;  %v4216_v23 = vld [vmem:[#allocation7 + $0x68] ss:$16 sps:$4 sm:$0xff]  }
  0x64   :  { %641 = vmatpush1.bf16.msra.mxu1 %v4207_v12  ;;  %v4224_v24 = vld [vmem:[#allocation7 + $0x8c] ss:$16 sps:$4 sm:$0xff]   ;;  %v4225_v25 = vld [vmem:[#allocation7 + $0x80] ss:$16 sps:$4 sm:$0xff]   ;;  %v4226_v26 = vld [vmem:[#allocation7 + $0xa4] ss:$16 sps:$4 sm:$0xff]  }
  0x65   :  { %3610 = vmatmul.mubr.msk.bf16.vlgmr.msra.gmra.mrb[0].mxu0 %vm152_vm0, %v4194_v5  ;;  %642 = vmatprep.subr.bf16.mxu1 %v4208_v13  ;;  %v4222_v27 = vld [vmem:[#allocation7 + $0x88] ss:$16 sps:$4 sm:$0xff]   ;;  %v4230_v28 = vld [vmem:[#allocation7 + $0xac] ss:$16 sps:$4 sm:$0xff]   ;;  %v4231_v29 = vld [vmem:[#allocation7 + $0xa0] ss:$16 sps:$4 sm:$0xff]  }
  0x66   :  { %201 = vmatprep.mubr.bf16.mxu0 %v4509_v0  ;;  %692 = vmatpush1.bf16.msra.mxu0 %v4198_v7  ;;  %v4232_v30 = vld [vmem:[#allocation7 + $0xc4] ss:$16 sps:$4 sm:$0xff]   ;;  %v4228_v31 = vld [vmem:[#allocation7 + $0xa8] ss:$16 sps:$4 sm:$0xff]   ;;  %v4236_v32 = vld [vmem:[#allocation7 + $0xcc] ss:$16 sps:$4 sm:$0xff]  }
  0x67   :  { %693 = vmatprep.subr.bf16.mxu0 %v4206_v11  ;;  %v4237_v33 = vld [vmem:[#allocation7 + $0xc0] ss:$16 sps:$4 sm:$0xff]   ;;  %v4238_v34 = vld [vmem:[#allocation7 + $0xe4] ss:$16 sps:$4 sm:$0xff]   ;;  %v4234_v35 = vld [vmem:[#allocation7 + $0xc8] ss:$16 sps:$4 sm:$0xff]  }
  0x68   :  { %643 = vmatpush1.bf16.msra.mxu1 %v4213_v16  ;;  %v4242_v36 = vld [vmem:[#allocation7 + $0xec] ss:$16 sps:$4 sm:$0xff]   ;;  %v4243_v37 = vld [vmem:[#allocation7 + $0xe0] ss:$16 sps:$4 sm:$0xff]   ;;  %v4244_v38 = vld [vmem:[#allocation7 + $0x104] ss:$16 sps:$4 sm:$0xff]  }
  0x69   :  { %644 = vmatprep.subr.bf16.mxu1 %v4214_v18  ;;  %v4240_v39 = vld [vmem:[#allocation7 + $0xe8] ss:$16 sps:$4 sm:$0xff]   ;;  %v4248_v40 = vld [vmem:[#allocation7 + $0x10c] ss:$16 sps:$4 sm:$0xff]   ;;  %v4249_v41 = vld [vmem:[#allocation7 + $0x100] ss:$16 sps:$4 sm:$0xff]  }
  0x6a   :  { %694 = vmatpush1.bf16.msra.mxu0 %v4204_v14  ;;  %v4246_v42 = vld [vmem:[#allocation7 + $0x108] ss:$16 sps:$4 sm:$0xff]   ;;  %v4250_v43 = vld [vmem:[#allocation7 + $0x124] ss:$16 sps:$4 sm:$0xff]   ;;  %v4254_v44 = vld [vmem:[#allocation7 + $0x12c] ss:$16 sps:$4 sm:$0xff]  }
  0x6b   :  { %695 = vmatprep.subr.bf16.mxu0 %v4212_v15  ;;  %v4255_v45 = vld [vmem:[#allocation7 + $0x120] ss:$16 sps:$4 sm:$0xff]   ;;  %v4256_v46 = vld [vmem:[#allocation7 + $0x144] ss:$16 sps:$4 sm:$0xff]   ;;  %v4252_v47 = vld [vmem:[#allocation7 + $0x128] ss:$16 sps:$4 sm:$0xff]   ;;  %v112_v15 = vlaneseq }
  0x6c   :  { %645 = vmatpush1.bf16.msra.mxu1 %v4219_v21  ;;  %v4260_v48 = vld [vmem:[#allocation7 + $0x14c] ss:$16 sps:$4 sm:$0xff]   ;;  %v4261_v49 = vld [vmem:[#allocation7 + $0x140] ss:$16 sps:$4 sm:$0xff]   ;;  %v4262_v50 = vld [vmem:[#allocation7 + $0x164] ss:$16 sps:$4 sm:$0xff]  }
  0x6d   :  { %3611 = vmatmul.mubr.msk.bf16.gmra.mrb[4].mxu0 %vm152_vm0, %v4195_v17  ;;  %646 = vmatprep.subr.bf16.mxu1 %v4220_v22  ;;  %v4258_v51 = vld [vmem:[#allocation7 + $0x148] ss:$16 sps:$4 sm:$0xff]   ;;  %v4266_v52 = vld [vmem:[#allocation7 + $0x16c] ss:$16 sps:$4 sm:$0xff]   ;;  %v4267_v53 = vld [vmem:[#allocation7 + $0x160] ss:$16 sps:$4 sm:$0xff]  }
  0x6e   :  { %696 = vmatpush1.bf16.msra.mxu0 %v4210_v19  ;;  %v4268_v54 = vld [vmem:[#allocation7 + $0x184] ss:$16 sps:$4 sm:$0xff]   ;;  %v4264_v55 = vld [vmem:[#allocation7 + $0x168] ss:$16 sps:$4 sm:$0xff]   ;;  %v4272_v56 = vld [vmem:[#allocation7 + $0x18c] ss:$16 sps:$4 sm:$0xff]  }
  0x6f   :  { %697 = vmatprep.subr.bf16.mxu0 %v4218_v20  ;;  %v4273_v57 = vld [vmem:[#allocation7 + $0x180] ss:$16 sps:$4 sm:$0xff]   ;;  %v4270_v58 = vld [vmem:[#allocation7 + $0x188] ss:$16 sps:$4 sm:$0xff]   ;;  %v4274_v59 = vld [vmem:[#allocation7 + $0x1a4] ss:$16 sps:$4 sm:$0xff]  }
  0x70   :  { %647 = vmatpush1.bf16.msra.mxu1 %v4225_v25  ;;  %v4278_v60 = vld [vmem:[#allocation7 + $0x1ac] ss:$16 sps:$4 sm:$0xff]   ;;  %v4276_v61 = vld [vmem:[#allocation7 + $0x1a8] ss:$16 sps:$4 sm:$0xff]   ;;  %v4279_v62 = vld [vmem:[#allocation7 + $0x1a0] ss:$16 sps:$4 sm:$0xff]  }
  0x71   :  { %648 = vmatprep.subr.bf16.mxu1 %v4226_v26  ;;  %v4280_v63 = vld [vmem:[#allocation7 + $0x1c4] ss:$16 sps:$4 sm:$0xff]   ;;  %v4284_v0 = vld [vmem:[#allocation7 + $0x1cc] ss:$16 sps:$4 sm:$0xff]   ;;  %v4282_v1 = vld [vmem:[#allocation7 + $0x1c8] ss:$16 sps:$4 sm:$0xff]  }
  0x72   :  { %698 = vmatpush1.bf16.msra.mxu0 %v4216_v23  ;;  %v4285_v2 = vld [vmem:[#allocation7 + $0x1c0] ss:$16 sps:$4 sm:$0xff]   ;;  %v4286_v3 = vld [vmem:[#allocation7 + $0x1e4] ss:$16 sps:$4 sm:$0xff]   ;;  %v4290_v4 = vld [vmem:[#allocation7 + $0x1ec] ss:$16 sps:$4 sm:$0xff]  }
  0x73   :  { %699 = vmatprep.subr.bf16.mxu0 %v4224_v24  ;;  %v4288_v5 = vld [vmem:[#allocation7 + $0x1e8] ss:$16 sps:$4 sm:$0xff]   ;;  %v4291_v6 = vld [vmem:[#allocation7 + $0x1e0] ss:$16 sps:$4 sm:$0xff]   ;;  %v4636_v16 = vshrl.u32 %v112_v15, 7 }
  0x74   :  { %649 = vmatpush1.bf16.msra.mxu1 %v4231_v29  ;;  %v4632_v7 = vld [vmem:[#allocation8] sm:$0xff]  ;;  %v785_v9 = vld [vmem:[#allocation8 + $0x8] sm:$0xff]  ;;  %v110_v18 = vld [vmem:[%s4827_s2] sm:$0x3] }
  0x75   :  { %650 = vmatprep.subr.bf16.mxu1 %v4232_v30  ;;  %v788_v8 = vld [vmem:[#allocation8 + $0x20] sm:$0xff]  ;;  %v789_v12 = vld [vmem:[#allocation8 + $0x28] sm:$0xff]  ;;  %v4639_v17 = vsub.s32 0, %v4636_v16  ;;  %v4645_v19 = vsub.s32 1, %v4636_v16 }
  0x76   :  { %700 = vmatpush1.bf16.msra.mxu0 %v4222_v27  ;;  %v3676_v10 = vcombine.low %v4632_v7, %v788_v8  ;;  %v3677_v11 = vcombine.high %v4632_v7, %v788_v8  ;;  %v3678_v13 = vcombine.low %v785_v9, %v789_v12  ;;  %v3679_v14 = vcombine.high %v785_v9, %v789_v12  ;;  %v812_v7 = vld [vmem:[#allocation8 + $0xe0] sm:$0xff]  ;;  %v809_v8 = vld [vmem:[#allocation8 + $0xc8] sm:$0xff] }
  0x77   :  { %701 = vmatprep.subr.bf16.mxu0 %v4230_v28  ;;  %v115_v20 = vrot.slane %v110_v18, %v4639_v17  ;;  %v119_v21 = vrot.slane %v110_v18, %v4645_v19  ;;  %v813_v9 = vld [vmem:[#allocation8 + $0xe8] sm:$0xff]  ;;  %v816_v18 = vld [vmem:[#allocation8 + $0x100] sm:$0xff] }
  0x78   :  { %651 = vmatpush1.bf16.msra.mxu1 %v4237_v33 }
  0x79   :  { %652 = vmatprep.subr.bf16.mxu1 %v4238_v34 }
  0x7a   :  { %702 = vmatpush1.bf16.msra.mxu0 %v4228_v31 }
  0x7b   :  { %703 = vmatprep.subr.bf16.mxu0 %v4236_v32 }
  0x7c   :  { %653 = vmatpush1.bf16.msra.mxu1 %v4243_v37 }
  0x7d   :  { %654 = vmatprep.subr.bf16.mxu1 %v4244_v38 }
  0x7e   :  { %704 = vmatpush1.bf16.msra.mxu0 %v4234_v35 }
  0x7f   :  { %705 = vmatprep.subr.bf16.mxu0 %v4242_v36  ;;  %v792_v36 = vld [vmem:[#allocation8 + $0x40] sm:$0xff] }
  0x80   :  { %655 = vmatpush1.bf16.msra.mxu1 %v4249_v41  ;;  %v793_v41 = vld [vmem:[#allocation8 + $0x48] sm:$0xff] }
  0x81   :  { %656 = vmatprep.subr.bf16.mxu1 %v4250_v43 }
  0x82   :  { %706 = vmatpush1.bf16.msra.mxu0 %v4240_v39 }
  0x83   :  { %707 = vmatprep.subr.bf16.mxu0 %v4248_v40  ;;  %v796_v40 = vld [vmem:[#allocation8 + $0x60] sm:$0xff] }
  0x84   :  { %657 = vmatpush1.bf16.msra.mxu1 %v4255_v45 }
  0x85   :  { %658 = vmatprep.subr.bf16.mxu1 %v4256_v46 }
  0x86   :  { %708 = vmatpush1.bf16.msra.mxu0 %v4246_v42  ;;  %v797_v42 = vld [vmem:[#allocation8 + $0x68] sm:$0xff] }
  0x87   :  { %709 = vmatprep.subr.bf16.mxu0 %v4254_v44 }
  0x88   :  { %659 = vmatpush1.bf16.msra.mxu1 %v4261_v49 }
  0x89   :  { %660 = vmatprep.subr.bf16.mxu1 %v4262_v50 }
  0x8a   :  { %710 = vmatpush1.bf16.msra.mxu0 %v4252_v47 }
  0x8b   :  { %711 = vmatprep.subr.bf16.mxu0 %v4260_v48 }
  0x8c   :  { %661 = vmatpush1.bf16.msra.mxu1 %v4267_v53  ;;  %v3687_v53 = vcombine.high %v793_v41, %v797_v42 }
  0x8d   :  { %662 = vmatprep.subr.bf16.mxu1 %v4268_v54  ;;  %v800_v54 = vld [vmem:[#allocation8 + $0x80] sm:$0xff] }
  0x8e   :  { %712 = vmatpush1.bf16.msra.mxu0 %v4258_v51 }
  0x8f   :  { %713 = vmatprep.subr.bf16.mxu0 %v4266_v52  ;;  %v3685_v52 = vcombine.high %v792_v36, %v796_v40 }
  0x90   :  { %663 = vmatpush1.bf16.msra.mxu1 %v4273_v57  ;;  %v804_v57 = vld [vmem:[#allocation8 + $0xa0] sm:$0xff] }
  0x91   :  { %664 = vmatprep.subr.bf16.mxu1 %v4274_v59  ;;  %v805_v59 = vld [vmem:[#allocation8 + $0xa8] sm:$0xff] }
  0x92   :  { %714 = vmatpush1.bf16.msra.mxu0 %v4264_v55 }
  0x93   :  { %715 = vmatprep.subr.bf16.mxu0 %v4272_v56 }
  0x94   :  { %665 = vmatpush1.bf16.msra.mxu1 %v4279_v62 }
  0x95   :  { %666 = vmatprep.subr.bf16.mxu1 %v4280_v63 }
  0x96   :  { %716 = vmatpush1.bf16.msra.mxu0 %v4270_v58  ;;  %v801_v58 = vld [vmem:[#allocation8 + $0x88] sm:$0xff] }
  0x97   :  { %717 = vmatprep.subr.bf16.mxu0 %v4278_v60  ;;  %v3694_v15 = vcombine.low %v801_v58, %v805_v59 }
  0x98   :  { %667 = vmatpush1.bf16.msra.mxu1 %v4285_v2 }
  0x99   :  { %668 = vmatprep.subr.bf16.mxu1 %v4286_v3  ;;  %v3693_v3 = vcombine.high %v800_v54, %v804_v57 }
  0x9a   :  { %718 = vmatpush1.bf16.msra.mxu0 %v4276_v61 }
  0x9b   :  { %719 = vmatprep.subr.bf16.mxu0 %v4284_v0  ;;  %v3684_v0 = vcombine.low %v792_v36, %v796_v40  ;;  %v836_v36 = vld [vmem:[#allocation8 + $0x1a0] sm:$0xff] }
  0x9c   :  { %669 = vmatpush1.bf16.msra.mxu1 %v4291_v6 }
  0x9d   :  { %2362 = vmatprep.subr.bf16.mxu1 %v3677_v11 }
  0x9e   :  { %720 = vmatpush1.bf16.msra.mxu0 %v4282_v1  ;;  %v3686_v1 = vcombine.low %v793_v41, %v797_v42 }
  0x9f   :  { %721 = vmatprep.subr.bf16.mxu0 %v4290_v4  ;;  %v3695_v4 = vcombine.high %v801_v58, %v805_v59  ;;  %v856_v59 = vld [vmem:[#allocation8 + $0x240] sm:$0xff] }
  0xa2   :  { %722 = vmatpush1.bf16.msra.mxu0 %v4288_v5  ;;  %v808_v5 = vld [vmem:[#allocation8 + $0xc0] sm:$0xff] }
  0xa3   :  { %2468 = vmatprep.subr.bf16.mxu0 %v3679_v14  ;;  %v3692_v14 = vcombine.low %v800_v54, %v804_v57  ;;  %v853_v54 = vld [vmem:[#allocation8 + $0x228] sm:$0xff] }
 0x138   :  { %v193_v22 = vpop.f32.mrb[0].mxu0 }
 0x139   :  { %v194_v23 = vadd.f32 %v193_v22, %v115_v20  ;;  %v195_v24 = vpop.f32.mrb[1].mxu0  ;;  %v821_v22 = vld [vmem:[#allocation8 + $0x128] sm:$0xff] }
 0x13a   :  { %v196_v25 = vadd.f32 %v195_v24, %v119_v21  ;;  %v197_v26 = vpop.f32.mrb[2].mxu0  ;;  %v3702_v24 = vcombine.low %v809_v8, %v813_v9 }
 0x13b   :  { %v212_v27 = vmul.f32 0.01, %v194_v23  ;;  %v198_v28 = vadd.f32 %v197_v26, %v115_v20  ;;  %v199_v29 = vpop.f32.mrb[3].mxu0 }
 0x13c   :  { %v213_v30 = vmul.f32 0.01, %v196_v25  ;;  %v200_v31 = vadd.f32 %v199_v29, %v119_v21  ;;  %v825_v29 = vld [vmem:[#allocation8 + $0x148] sm:$0xff] }
 0x13d   :  { %v214_v32 = vmul.f32 0.01, %v198_v28  ;;  %v220_v34 = vmax.f32 %v194_v23, %v212_v27  ;;  %v3700_v23 = vcombine.low %v808_v5, %v812_v7  ;;  %v824_v27 = vld [vmem:[#allocation8 + $0x140] sm:$0xff] }
 0x13e   :  { %v215_v33 = vmul.f32 0.01, %v200_v31  ;;  %v221_v37 = vmax.f32 %v196_v25, %v213_v30  ;;  %v829_v30 = vld [vmem:[#allocation8 + $0x168] sm:$0xff] }
 0x13f   :  { %v222_v35 = vmax.f32 %v198_v28, %v214_v32  ;;  %v828_v28 = vld [vmem:[#allocation8 + $0x160] sm:$0xff]  ;;  %v3718_v40 = vcombine.low %v825_v29, %v829_v30 }
 0x140   :  { %v223_v38 = vmax.f32 %v200_v31, %v215_v33  ;;  %v203_v39 = vpop.f32.mrb[4].mxu0  ;;  %v3717_v33 = vcombine.high %v824_v27, %v828_v28 }
 0x141   :  { %v204_v43 = vadd.f32 %v203_v39, %v115_v20  ;;  %v205_v44 = vpop.f32.mrb[5].mxu0  ;;  %v228_v45 = vpack.c.bf16 %v222_v35, %v220_v34  ;;  %v3719_v34 = vcombine.high %v825_v29, %v829_v30  ;;  %v832_v35 = vld [vmem:[#allocation8 + $0x180] sm:$0xff]  ;;  %v3716_v39 = vcombine.low %v824_v27, %v828_v28 }
 0x142   :  { %v206_v46 = vadd.f32 %v205_v44, %v119_v21  ;;  %v207_v47 = vpop.f32.mrb[6].mxu0  ;;  %v229_v48 = vpack.c.bf16 %v223_v38, %v221_v37  ;;  %v833_v37 = vld [vmem:[#allocation8 + $0x188] sm:$0xff]  ;;  %v3725_v41 = vcombine.high %v832_v35, %v836_v36  ;;  %v844_v44 = vld [vmem:[#allocation8 + $0x1e0] sm:$0xff] }
 0x143   :  { %v216_v49 = vmul.f32 0.01, %v204_v43  ;;  %v208_v50 = vadd.f32 %v207_v47, %v115_v20  ;;  %v209_v51 = vpop.f32.mrb[7].mxu0  ;;  %v820_v20 = vld [vmem:[#allocation8 + $0x120] sm:$0xff]  ;;  %v837_v38 = vld [vmem:[#allocation8 + $0x1a8] sm:$0xff]  ;;  %v3724_v47 = vcombine.low %v832_v35, %v836_v36 }
 0x144   :  { %v217_v55 = vmul.f32 0.01, %v206_v46  ;;  %v210_v56 = vadd.f32 %v209_v51, %v119_v21  ;;  %670 = vmatprep.mubr.bf16.mxu1 %v229_v48  ;;  %723 = vmatprep.mubr.bf16.mxu0 %v229_v48  ;;  %v817_v21 = vld [vmem:[#allocation8 + $0x108] sm:$0xff]  ;;  %v3709_v25 = vcombine.high %v816_v18, %v820_v20  ;;  %v3708_v31 = vcombine.low %v816_v18, %v820_v20  ;;  %v848_v51 = vld [vmem:[#allocation8 + $0x200] sm:$0xff] }
 0x145   :  { %v224_v60 = vmax.f32 %v204_v43, %v216_v49  ;;  %v218_v61 = vmul.f32 0.01, %v208_v50  ;;  %671 = vmatmul.mubr.bf16.vlgmr.msra.gmra.mrb[0].mxu1 %v228_v45  ;;  %724 = vmatmul.mubr.bf16.vlgmr.msra.gmra.mrb[8].mxu0 %v228_v45  ;;  %v3711_v26 = vcombine.high %v817_v21, %v821_v22  ;;  %v3710_v32 = vcombine.low %v817_v21, %v821_v22  ;;  %v840_v43 = vld [vmem:[#allocation8 + $0x1c0] sm:$0xff]  ;;  %v841_v45 = vld [vmem:[#allocation8 + $0x1c8] sm:$0xff] }
 0x146   :  { %v225_v62 = vmax.f32 %v206_v46, %v217_v55  ;;  %v219_v63 = vmul.f32 0.01, %v210_v56  ;;  %2363 = vmatpush1.bf16.msra.mxu1 %v3676_v10  ;;  %2469 = vmatpush1.bf16.msra.mxu0 %v3678_v13  ;;  %v3701_v10 = vcombine.high %v808_v5, %v812_v7  ;;  %v3703_v13 = vcombine.high %v809_v8, %v813_v9  ;;  %v845_v46 = vld [vmem:[#allocation8 + $0x1e8] sm:$0xff]  ;;  %v880_v22 = vld [vmem:[#allocation8 + $0x300] sm:$0xff] }
 0x147   :  { %v226_v2 = vmax.f32 %v208_v50, %v218_v61  ;;  %2364 = vmatprep.subr.bf16.mxu1 %v3685_v52  ;;  %2470 = vmatprep.subr.bf16.mxu0 %v3687_v53  ;;  %v3727_v42 = vcombine.high %v833_v37, %v837_v38  ;;  %v3726_v48 = vcombine.low %v833_v37, %v837_v38  ;;  %v852_v52 = vld [vmem:[#allocation8 + $0x220] sm:$0xff]  ;;  %v849_v53 = vld [vmem:[#allocation8 + $0x208] sm:$0xff] }
 0x148   :  { %v227_v6 = vmax.f32 %v210_v56, %v219_v63  ;;  %v3733_v49 = vcombine.high %v840_v43, %v844_v44  ;;  %v3735_v50 = vcombine.high %v841_v45, %v845_v46  ;;  %v3732_v55 = vcombine.low %v840_v43, %v844_v44  ;;  %v857_v61 = vld [vmem:[#allocation8 + $0x248] sm:$0xff] }
 0x149   :  { %v230_v11 = vpack.c.bf16 %v226_v2, %v224_v60  ;;  %v3734_v56 = vcombine.low %v841_v45, %v845_v46  ;;  %v3741_v57 = vcombine.high %v848_v51, %v852_v52  ;;  %v3743_v58 = vcombine.high %v849_v53, %v853_v54  ;;  %v860_v60 = vld [vmem:[#allocation8 + $0x260] sm:$0xff]  ;;  %v865_v5 = vld [vmem:[#allocation8 + $0x288] sm:$0xff] }
 0x14a   :  { %v231_v12 = vpack.c.bf16 %v227_v6, %v225_v62  ;;  %2365 = vmatpush1.bf16.msra.mxu1 %v3684_v0  ;;  %2471 = vmatpush1.bf16.msra.mxu0 %v3686_v1  ;;  %v861_v62 = vld [vmem:[#allocation8 + $0x268] sm:$0xff]  ;;  %v3740_v63 = vcombine.low %v848_v51, %v852_v52  ;;  %v3742_v0 = vcombine.low %v849_v53, %v853_v54 }
 0x14b   :  { %2366 = vmatprep.subr.bf16.mxu1 %v3693_v3  ;;  %2472 = vmatprep.subr.bf16.mxu0 %v3695_v4  ;;  %v3749_v1 = vcombine.high %v856_v59, %v860_v60  ;;  %v3751_v2 = vcombine.high %v857_v61, %v861_v62  ;;  %v864_v3 = vld [vmem:[#allocation8 + $0x280] sm:$0xff]  ;;  %v869_v6 = vld [vmem:[#allocation8 + $0x2a8] sm:$0xff]  ;;  %v3748_v7 = vcombine.low %v856_v59, %v860_v60 }
 0x14c   :  { %680 = vmatprep.mubr.bf16.mxu1 %v231_v12  ;;  %733 = vmatprep.mubr.bf16.mxu0 %v231_v12  ;;  %v868_v4 = vld [vmem:[#allocation8 + $0x2a0] sm:$0xff]  ;;  %v3750_v8 = vcombine.low %v857_v61, %v861_v62  ;;  %v3758_v18 = vcombine.low %v865_v5, %v869_v6  ;;  %v893_v36 = vld [vmem:[#allocation8 + $0x368] sm:$0xff] }
 0x14d   :  { %681 = vmatmul.mubr.bf16.gmra.mrb[4].mxu1 %v230_v11  ;;  %734 = vmatmul.mubr.bf16.gmra.mrb[12].mxu0 %v230_v11  ;;  %v3757_v9 = vcombine.high %v864_v3, %v868_v4  ;;  %v3759_v11 = vcombine.high %v865_v5, %v869_v6  ;;  %v872_v12 = vld [vmem:[#allocation8 + $0x2c0] sm:$0xff]  ;;  %v901_v44 = vld [vmem:[#allocation8 + $0x3a8] sm:$0xff] }
 0x14e   :  { %2367 = vmatpush1.bf16.msra.mxu1 %v3692_v14  ;;  %2473 = vmatpush1.bf16.msra.mxu0 %v3694_v15  ;;  %v876_v14 = vld [vmem:[#allocation8 + $0x2e0] sm:$0xff]  ;;  %v873_v15 = vld [vmem:[#allocation8 + $0x2c8] sm:$0xff] }
 0x14f   :  { %2368 = vmatprep.subr.bf16.mxu1 %v3701_v10  ;;  %2474 = vmatprep.subr.bf16.mxu0 %v3703_v13  ;;  %v877_v10 = vld [vmem:[#allocation8 + $0x2e8] sm:$0xff]  ;;  %v3756_v13 = vcombine.low %v864_v3, %v868_v4  ;;  %v3765_v20 = vcombine.high %v872_v12, %v876_v14 }
 0x150   :  { %v3767_v21 = vcombine.high %v873_v15, %v877_v10  ;;  %v3766_v27 = vcombine.low %v873_v15, %v877_v10  ;;  %v909_v52 = vld [vmem:[#allocation8 + $0x3e8] sm:$0xff] }
 0x151   :  { %v4657_v60 = vld [vmem:[#allocation8 + $0x428] sm:$0xff] }
 0x152   :  { %2369 = vmatpush1.bf16.msra.mxu1 %v3700_v23  ;;  %2475 = vmatpush1.bf16.msra.mxu0 %v3702_v24  ;;  %v884_v23 = vld [vmem:[#allocation8 + $0x320] sm:$0xff]  ;;  %v881_v24 = vld [vmem:[#allocation8 + $0x308] sm:$0xff] }
 0x153   :  { %2370 = vmatprep.subr.bf16.mxu1 %v3709_v25  ;;  %2476 = vmatprep.subr.bf16.mxu0 %v3711_v26  ;;  %v885_v25 = vld [vmem:[#allocation8 + $0x328] sm:$0xff]  ;;  %v3764_v26 = vcombine.low %v872_v12, %v876_v14  ;;  %v3773_v28 = vcombine.high %v880_v22, %v884_v23  ;;  %v3772_v30 = vcombine.low %v880_v22, %v884_v23 }
 0x154   :  { %v3775_v29 = vcombine.high %v881_v24, %v885_v25 }
 0x156   :  { %2371 = vmatpush1.bf16.msra.mxu1 %v3708_v31  ;;  %2477 = vmatpush1.bf16.msra.mxu0 %v3710_v32  ;;  %v3774_v31 = vcombine.low %v881_v24, %v885_v25  ;;  %v888_v32 = vld [vmem:[#allocation8 + $0x340] sm:$0xff]  ;;  %v4693_v24 = vld [vmem:[#allocation8 + $0x468] sm:$0xff] }
 0x157   :  { %2372 = vmatprep.subr.bf16.mxu1 %v3717_v33  ;;  %2478 = vmatprep.subr.bf16.mxu0 %v3719_v34  ;;  %v892_v33 = vld [vmem:[#allocation8 + $0x360] sm:$0xff]  ;;  %v889_v34 = vld [vmem:[#allocation8 + $0x348] sm:$0xff] }
 0x158   :  { %v3781_v35 = vcombine.high %v888_v32, %v892_v33  ;;  %v3780_v37 = vcombine.low %v888_v32, %v892_v33  ;;  %v3782_v38 = vcombine.low %v889_v34, %v893_v36  ;;  %v4695_v25 = vld [vmem:[#allocation8 + $0x480] sm:$0xff] }
 0x15a   :  { %2373 = vmatpush1.bf16.msra.mxu1 %v3716_v39  ;;  %2479 = vmatpush1.bf16.msra.mxu0 %v3718_v40  ;;  %v3783_v39 = vcombine.high %v889_v34, %v893_v36  ;;  %v896_v40 = vld [vmem:[#allocation8 + $0x380] sm:$0xff] }
 0x15b   :  { %2374 = vmatprep.subr.bf16.mxu1 %v3725_v41  ;;  %2480 = vmatprep.subr.bf16.mxu0 %v3727_v42  ;;  %v900_v41 = vld [vmem:[#allocation8 + $0x3a0] sm:$0xff]  ;;  %v897_v42 = vld [vmem:[#allocation8 + $0x388] sm:$0xff] }
 0x15c   :  { %v3789_v43 = vcombine.high %v896_v40, %v900_v41  ;;  %v3788_v45 = vcombine.low %v896_v40, %v900_v41  ;;  %v3790_v46 = vcombine.low %v897_v42, %v901_v44 }
 0x15e   :  { %2375 = vmatpush1.bf16.msra.mxu1 %v3724_v47  ;;  %2481 = vmatpush1.bf16.msra.mxu0 %v3726_v48  ;;  %v3791_v47 = vcombine.high %v897_v42, %v901_v44  ;;  %v904_v48 = vld [vmem:[#allocation8 + $0x3c0] sm:$0xff] }
 0x15f   :  { %2376 = vmatprep.subr.bf16.mxu1 %v3733_v49  ;;  %2482 = vmatprep.subr.bf16.mxu0 %v3735_v50  ;;  %v908_v49 = vld [vmem:[#allocation8 + $0x3e0] sm:$0xff]  ;;  %v905_v50 = vld [vmem:[#allocation8 + $0x3c8] sm:$0xff] }
 0x160   :  { %v3797_v51 = vcombine.high %v904_v48, %v908_v49  ;;  %v3796_v53 = vcombine.low %v904_v48, %v908_v49  ;;  %v3798_v54 = vcombine.low %v905_v50, %v909_v52 }
 0x162   :  { %2377 = vmatpush1.bf16.msra.mxu1 %v3732_v55  ;;  %2483 = vmatpush1.bf16.msra.mxu0 %v3734_v56  ;;  %v3799_v55 = vcombine.high %v905_v50, %v909_v52  ;;  %v4649_v56 = vld [vmem:[#allocation8 + $0x400] sm:$0xff] }
 0x163   :  { %2378 = vmatprep.subr.bf16.mxu1 %v3741_v57  ;;  %2484 = vmatprep.subr.bf16.mxu0 %v3743_v58  ;;  %v4651_v57 = vld [vmem:[#allocation8 + $0x420] sm:$0xff]  ;;  %v4653_v58 = vld [vmem:[#allocation8 + $0x408] sm:$0xff] }
 0x164   :  { %v3805_v59 = vcombine.high %v4649_v56, %v4651_v57  ;;  %v3804_v61 = vcombine.low %v4649_v56, %v4651_v57  ;;  %v3806_v62 = vcombine.low %v4653_v58, %v4657_v60  ;;  %v940_v57 = vld [vmem:[#allocation8 + $0x4e0] sm:$0xff] }
 0x166   :  { %2379 = vmatpush1.bf16.msra.mxu1 %v3740_v63  ;;  %2485 = vmatpush1.bf16.msra.mxu0 %v3742_v0  ;;  %v3807_v63 = vcombine.high %v4653_v58, %v4657_v60  ;;  %v308_v0 = vsub.s32 2, %v4636_v16  ;;  %v937_v58 = vld [vmem:[#allocation8 + $0x4c8] sm:$0xff] }
 0x167   :  { %2380 = vmatprep.subr.bf16.mxu1 %v3749_v1  ;;  %2486 = vmatprep.subr.bf16.mxu0 %v3751_v2  ;;  %v296_v1 = vld [vmem:[%s4829_s4] sm:$0xf]  ;;  %v312_v2 = vsub.s32 3, %v4636_v16  ;;  %v941_v60 = vld [vmem:[#allocation8 + $0x4e8] sm:$0xff] }
 0x168   :  { %v301_v3 = vrot.slane %v296_v1, %v4639_v17  ;;  %v4673_v4 = vrot.slane %v296_v1, %v308_v0  ;;  %v4676_v5 = vrot.slane %v296_v1, %v4645_v19 }
 0x169   :  { %v4680_v6 = vrot.slane %v296_v1, %v312_v2 }
 0x16a   :  { %2381 = vmatpush1.bf16.msra.mxu1 %v3748_v7  ;;  %2487 = vmatpush1.bf16.msra.mxu0 %v3750_v8  ;;  %v4682_v7 = vld [vmem:[#allocation8 + $0x440] sm:$0xff] }
 0x16b   :  { %2382 = vmatprep.subr.bf16.mxu1 %v3757_v9  ;;  %2488 = vmatprep.subr.bf16.mxu0 %v3759_v11  ;;  %v4684_v8 = vld [vmem:[#allocation8 + $0x460] sm:$0xff] }
 0x16c   :  { %v3813_v23 = vcombine.high %v4682_v7, %v4684_v8 }
 0x16e   :  { %2383 = vmatpush1.bf16.msra.mxu1 %v3756_v13  ;;  %2489 = vmatpush1.bf16.msra.mxu0 %v3758_v18  ;;  %v4687_v13 = vld [vmem:[#allocation8 + $0x448] sm:$0xff] }
 0x16f   :  { %2384 = vmatprep.subr.bf16.mxu1 %v3765_v20  ;;  %2490 = vmatprep.subr.bf16.mxu0 %v3767_v21  ;;  %v3814_v40 = vcombine.low %v4687_v13, %v4693_v24 }
 0x172   :  { %2385 = vmatpush1.bf16.msra.mxu1 %v3764_v26  ;;  %2491 = vmatpush1.bf16.msra.mxu0 %v3766_v27  ;;  %v4697_v26 = vld [vmem:[#allocation8 + $0x4a0] sm:$0xff] }
 0x173   :  { %2386 = vmatprep.subr.bf16.mxu1 %v3773_v28  ;;  %2492 = vmatprep.subr.bf16.mxu0 %v3775_v29  ;;  %v3821_v44 = vcombine.high %v4695_v25, %v4697_v26  ;;  %v3820_v56 = vcombine.low %v4695_v25, %v4697_v26 }
 0x176   :  { %2387 = vmatpush1.bf16.msra.mxu1 %v3772_v30  ;;  %2493 = vmatpush1.bf16.msra.mxu0 %v3774_v31 }
 0x177   :  { %2388 = vmatprep.subr.bf16.mxu1 %v3781_v35  ;;  %2494 = vmatprep.subr.bf16.mxu0 %v3783_v39  ;;  %v3812_v39 = vcombine.low %v4682_v7, %v4684_v8  ;;  %v3831_v7 = vcombine.high %v937_v58, %v941_v60  ;;  %v948_v8 = vld [vmem:[#allocation8 + $0x520] sm:$0xff] }
 0x17a   :  { %2389 = vmatpush1.bf16.msra.mxu1 %v3780_v37  ;;  %2495 = vmatpush1.bf16.msra.mxu0 %v3782_v38 }
 0x17b   :  { %2390 = vmatprep.subr.bf16.mxu1 %v3789_v43  ;;  %2496 = vmatprep.subr.bf16.mxu0 %v3791_v47  ;;  %v3815_v43 = vcombine.high %v4687_v13, %v4693_v24  ;;  %v3830_v24 = vcombine.low %v937_v58, %v941_v60 }
 0x17e   :  { %2391 = vmatpush1.bf16.msra.mxu1 %v3788_v45  ;;  %2497 = vmatpush1.bf16.msra.mxu0 %v3790_v46 }
 0x17f   :  { %2392 = vmatprep.subr.bf16.mxu1 %v3797_v51  ;;  %2498 = vmatprep.subr.bf16.mxu0 %v3799_v55 }
 0x182   :  { %2393 = vmatpush1.bf16.msra.mxu1 %v3796_v53  ;;  %2499 = vmatpush1.bf16.msra.mxu0 %v3798_v54 }
 0x183   :  { %2415 = vmatprep.subr.bf16.mxu1 %v3805_v59  ;;  %2521 = vmatprep.subr.bf16.mxu0 %v3807_v63 }
 0x218   :  { %v672_v9 = vpop.f32.mrb[0].mxu1  ;;  %v725_v11 = vpop.f32.mrb[8].mxu0 }
 0x219   :  { %v673_v12 = vadd.f32 %v672_v9, %v301_v3  ;;  %v726_v14 = vadd.f32 %v725_v11, %v4673_v4  ;;  %v674_v15 = vpop.f32.mrb[1].mxu1  ;;  %v727_v10 = vpop.f32.mrb[9].mxu0 }
 0x21a   :  { %v675_v18 = vadd.f32 %v674_v15, %v4676_v5  ;;  %v728_v20 = vadd.f32 %v727_v10, %v4680_v6  ;;  %v676_v21 = vpop.f32.mrb[2].mxu1  ;;  %v729_v22 = vpop.f32.mrb[10].mxu0 }
 0x21b   :  { %v744_v27 = vmul.f32 0.01, %v673_v12  ;;  %v746_v28 = vmul.f32 0.01, %v726_v14  ;;  %v677_v29 = vadd.f32 %v676_v21, %v301_v3  ;;  %v730_v30 = vadd.f32 %v729_v22, %v4673_v4  ;;  %v678_v31 = vpop.f32.mrb[3].mxu1  ;;  %v731_v32 = vpop.f32.mrb[11].mxu0 }
 0x21c   :  { %v745_v33 = vmul.f32 0.01, %v675_v18  ;;  %v747_v34 = vmul.f32 0.01, %v728_v20  ;;  %v679_v35 = vadd.f32 %v678_v31, %v4676_v5  ;;  %v732_v36 = vadd.f32 %v731_v32, %v4680_v6 }
 0x21d   :  { %v748_v37 = vmul.f32 0.01, %v677_v29  ;;  %v750_v38 = vmul.f32 0.01, %v730_v30  ;;  %v760_v45 = vmax.f32 %v673_v12, %v744_v27  ;;  %v762_v46 = vmax.f32 %v726_v14, %v746_v28 }
 0x21e   :  { %v749_v41 = vmul.f32 0.01, %v679_v35  ;;  %v751_v42 = vmul.f32 0.01, %v732_v36  ;;  %v761_v49 = vmax.f32 %v675_v18, %v745_v33  ;;  %v763_v50 = vmax.f32 %v728_v20, %v747_v34  ;;  %v929_v33 = vld [vmem:[#allocation8 + $0x488] sm:$0xff] }
 0x21f   :  { %v764_v47 = vmax.f32 %v677_v29, %v748_v37  ;;  %v766_v48 = vmax.f32 %v730_v30, %v750_v38  ;;  %v933_v34 = vld [vmem:[#allocation8 + $0x4a8] sm:$0xff] }
 0x220   :  { %v765_v51 = vmax.f32 %v679_v35, %v749_v41  ;;  %v767_v52 = vmax.f32 %v732_v36, %v751_v42  ;;  %v682_v53 = vpop.f32.mrb[4].mxu1  ;;  %v735_v54 = vpop.f32.mrb[12].mxu0 }
 0x221   :  { %v4710_v55 = vpack.c.bf16 %v764_v47, %v760_v45  ;;  %v4712_v59 = vpack.c.bf16 %v766_v48, %v762_v46  ;;  %v683_v63 = vadd.f32 %v682_v53, %v301_v3  ;;  %v684_v1 = vpop.f32.mrb[5].mxu1  ;;  %v736_v9 = vadd.f32 %v735_v54, %v4673_v4  ;;  %v737_v11 = vpop.f32.mrb[13].mxu0  ;;  %v949_v54 = vld [vmem:[#allocation8 + $0x528] sm:$0xff] }
 0x222   :  { %v4715_v15 = vpack.c.bf16 %v765_v51, %v761_v49  ;;  %v4717_v12 = vpack.c.bf16 %v767_v52, %v763_v50  ;;  %v685_v14 = vadd.f32 %v684_v1, %v4676_v5  ;;  %v686_v10 = vpop.f32.mrb[6].mxu1  ;;  %v738_v18 = vadd.f32 %v737_v11, %v4680_v6  ;;  %v739_v20 = vpop.f32.mrb[14].mxu0  ;;  %v936_v49 = vld [vmem:[#allocation8 + $0x4c0] sm:$0xff]  ;;  %v957_v1 = vld [vmem:[#allocation8 + $0x568] sm:$0xff] }
 0x223   :  { %v752_v21 = vmul.f32 0.01, %v683_v63  ;;  %v687_v22 = vadd.f32 %v686_v10, %v301_v3  ;;  %v688_v27 = vpop.f32.mrb[7].mxu1  ;;  %v754_v28 = vmul.f32 0.01, %v736_v9  ;;  %v740_v29 = vadd.f32 %v739_v20, %v4673_v4  ;;  %v741_v30 = vpop.f32.mrb[15].mxu0 }
 0x224   :  { %v753_v31 = vmul.f32 0.01, %v685_v14  ;;  %v689_v32 = vadd.f32 %v688_v27, %v4676_v5  ;;  %2394 = vmatprep.mubr.bf16.mxu1 %v4715_v15  ;;  %2500 = vmatprep.mubr.bf16.mxu0 %v4715_v15  ;;  %v755_v35 = vmul.f32 0.01, %v738_v18  ;;  %v742_v36 = vadd.f32 %v741_v30, %v4680_v6  ;;  %v944_v52 = vld [vmem:[#allocation8 + $0x500] sm:$0xff] }
 0x225   :  { %v768_v37 = vmax.f32 %v683_v63, %v752_v21  ;;  %v756_v38 = vmul.f32 0.01, %v687_v22  ;;  %2395 = vmatmul.mubr.bf16.vlgmr.msra.gmra.mrb[8].mxu1 %v4710_v55  ;;  %2501 = vmatmul.mubr.bf16.vlgmr.msra.gmra.mrb[16].mxu0 %v4710_v55  ;;  %v770_v3 = vmax.f32 %v736_v9, %v754_v28  ;;  %v758_v4 = vmul.f32 0.01, %v740_v29  ;;  %v953_v63 = vld [vmem:[#allocation8 + $0x548] sm:$0xff]  ;;  %v964_v20 = vld [vmem:[#allocation8 + $0x5a0] sm:$0xff] }
 0x226   :  { %v769_v41 = vmax.f32 %v685_v14, %v753_v31  ;;  %v757_v42 = vmul.f32 0.01, %v689_v32  ;;  %2416 = vmatpush1.bf16.msra.mxu1 %v3804_v61  ;;  %2522 = vmatpush1.bf16.msra.mxu0 %v3806_v62  ;;  %v771_v5 = vmax.f32 %v738_v18, %v755_v35  ;;  %v759_v6 = vmul.f32 0.01, %v742_v36  ;;  %v960_v18 = vld [vmem:[#allocation8 + $0x580] sm:$0xff]  ;;  %v961_v21 = vld [vmem:[#allocation8 + $0x588] sm:$0xff] }
 0x227   :  { %v772_v45 = vmax.f32 %v687_v22, %v756_v38  ;;  %2417 = vmatprep.subr.bf16.mxu1 %v3813_v23  ;;  %2523 = vmatprep.subr.bf16.mxu0 %v3815_v43  ;;  %v3823_v46 = vcombine.high %v929_v33, %v933_v34  ;;  %v774_v47 = vmax.f32 %v740_v29, %v758_v4  ;;  %v965_v22 = vld [vmem:[#allocation8 + $0x5a8] sm:$0xff]  ;;  %v968_v31 = vld [vmem:[#allocation8 + $0x5c0] sm:$0xff] }
 0x228   :  { %v773_v48 = vmax.f32 %v689_v32, %v757_v42  ;;  %v775_v50 = vmax.f32 %v742_v36, %v759_v6  ;;  %v3822_v23 = vcombine.low %v929_v33, %v933_v34  ;;  %v3829_v53 = vcombine.high %v936_v49, %v940_v57  ;;  %v972_v32 = vld [vmem:[#allocation8 + $0x5e0] sm:$0xff]  ;;  %v969_v33 = vld [vmem:[#allocation8 + $0x5c8] sm:$0xff] }
 0x229   :  { %v4737_v51 = vpack.c.bf16 %v772_v45, %v768_v37  ;;  %v4741_v61 = vpack.c.bf16 %v774_v47, %v770_v3  ;;  %v3828_v13 = vcombine.low %v936_v49, %v940_v57  ;;  %v3837_v25 = vcombine.high %v944_v52, %v948_v8  ;;  %v973_v34 = vld [vmem:[#allocation8 + $0x5e8] sm:$0xff]  ;;  %v976_v3 = vld [vmem:[#allocation8 + $0x600] sm:$0xff] }
 0x22a   :  { %v4743_v62 = vpack.c.bf16 %v773_v48, %v769_v41  ;;  %2418 = vmatpush1.bf16.msra.mxu1 %v3812_v39  ;;  %2524 = vmatpush1.bf16.msra.mxu0 %v3814_v40  ;;  %v4751_v43 = vpack.c.bf16 %v775_v50, %v771_v5  ;;  %v945_v39 = vld [vmem:[#allocation8 + $0x508] sm:$0xff]  ;;  %v952_v40 = vld [vmem:[#allocation8 + $0x540] sm:$0xff]  ;;  %v3836_v9 = vcombine.low %v944_v52, %v948_v8 }
 0x22b   :  { %2419 = vmatprep.subr.bf16.mxu1 %v3821_v44  ;;  %2525 = vmatprep.subr.bf16.mxu0 %v3823_v46  ;;  %v3839_v26 = vcombine.high %v945_v39, %v949_v54  ;;  %v956_v44 = vld [vmem:[#allocation8 + $0x560] sm:$0xff]  ;;  %v3838_v11 = vcombine.low %v945_v39, %v949_v54  ;;  %v3847_v10 = vcombine.high %v953_v63, %v957_v1  ;;  %v977_v41 = vld [vmem:[#allocation8 + $0x608] sm:$0xff] }
 0x22c   :  { %2404 = vmatprep.mubr.bf16.mxu1 %v4743_v62  ;;  %2510 = vmatprep.mubr.bf16.mxu0 %v4743_v62  ;;  %v3845_v14 = vcombine.high %v952_v40, %v956_v44  ;;  %v3844_v27 = vcombine.low %v952_v40, %v956_v44  ;;  %v3846_v28 = vcombine.low %v953_v63, %v957_v1  ;;  %v980_v4 = vld [vmem:[#allocation8 + $0x620] sm:$0xff]  ;;  %v981_v42 = vld [vmem:[#allocation8 + $0x628] sm:$0xff] }
 0x22d   :  { %2405 = vmatmul.mubr.bf16.gmra.mrb[12].mxu1 %v4737_v51  ;;  %2511 = vmatmul.mubr.bf16.gmra.mrb[20].mxu0 %v4737_v51  ;;  %v3853_v29 = vcombine.high %v960_v18, %v964_v20  ;;  %v3855_v30 = vcombine.high %v961_v21, %v965_v22  ;;  %v3852_v35 = vcombine.low %v960_v18, %v964_v20  ;;  %v984_v47 = vld [vmem:[#allocation8 + $0x640] sm:$0xff]  ;;  %v985_v49 = vld [vmem:[#allocation8 + $0x648] sm:$0xff] }
 0x22e   :  { %2420 = vmatpush1.bf16.msra.mxu1 %v3820_v56  ;;  %2526 = vmatpush1.bf16.msra.mxu0 %v3822_v23  ;;  %v3854_v36 = vcombine.low %v961_v21, %v965_v22  ;;  %v3861_v37 = vcombine.high %v968_v31, %v972_v32  ;;  %v3863_v38 = vcombine.high %v969_v33, %v973_v34  ;;  %v988_v48 = vld [vmem:[#allocation8 + $0x660] sm:$0xff]  ;;  %v989_v50 = vld [vmem:[#allocation8 + $0x668] sm:$0xff] }
 0x22f   :  { %2447 = vmatprep.mubr.bf16.mxu1 %v4717_v12  ;;  %2553 = vmatprep.mubr.bf16.mxu0 %v4717_v12  ;;  %v3860_v5 = vcombine.low %v968_v31, %v972_v32  ;;  %v3862_v6 = vcombine.low %v969_v33, %v973_v34  ;;  %v3869_v45 = vcombine.high %v976_v3, %v980_v4  ;;  %v992_v23 = vld [vmem:[#allocation8 + $0x680] sm:$0xff]  ;;  %v1005_v40 = vld [vmem:[#allocation8 + $0x6e8] sm:$0xff] }
 0x230   :  { %2421 = vmatprep.subr.bf16.mxu1 %v3829_v53  ;;  %2527 = vmatprep.subr.bf16.mxu0 %v3831_v7  ;;  %v3871_v46 = vcombine.high %v977_v41, %v981_v42  ;;  %v3868_v56 = vcombine.low %v976_v3, %v980_v4  ;;  %v3870_v57 = vcombine.low %v977_v41, %v981_v42  ;;  %v996_v52 = vld [vmem:[#allocation8 + $0x6a0] sm:$0xff]  ;;  %v993_v53 = vld [vmem:[#allocation8 + $0x688] sm:$0xff] }
 0x231   :  { %v3877_v58 = vcombine.high %v984_v47, %v988_v48  ;;  %v3879_v60 = vcombine.high %v985_v49, %v989_v50  ;;  %v997_v7 = vld [vmem:[#allocation8 + $0x6a8] sm:$0xff]  ;;  %v3876_v8 = vcombine.low %v984_v47, %v988_v48  ;;  %v3878_v39 = vcombine.low %v985_v49, %v989_v50 }
 0x232   :  { %2422 = vmatpush1.bf16.msra.mxu1 %v3828_v13  ;;  %2528 = vmatpush1.bf16.msra.mxu0 %v3830_v24  ;;  %v3885_v54 = vcombine.high %v992_v23, %v996_v52  ;;  %v3887_v13 = vcombine.high %v993_v53, %v997_v7  ;;  %v1000_v24 = vld [vmem:[#allocation8 + $0x6c0] sm:$0xff]  ;;  %v3884_v44 = vcombine.low %v992_v23, %v996_v52  ;;  %v1013_v18 = vld [vmem:[#allocation8 + $0x728] sm:$0xff]  ;;  %v791_v23 = vld [vmem:[#allocation8 + $0x38] sm:$0xff] }
 0x233   :  { %2423 = vmatprep.subr.bf16.mxu1 %v3837_v25  ;;  %2529 = vmatprep.subr.bf16.mxu0 %v3839_v26  ;;  %v1004_v25 = vld [vmem:[#allocation8 + $0x6e0] sm:$0xff]  ;;  %v1001_v26 = vld [vmem:[#allocation8 + $0x6c8] sm:$0xff]  ;;  %v3886_v63 = vcombine.low %v993_v53, %v997_v7 }
 0x234   :  { %v3893_v1 = vcombine.high %v1000_v24, %v1004_v25  ;;  %v3892_v20 = vcombine.low %v1000_v24, %v1004_v25  ;;  %v3894_v21 = vcombine.low %v1001_v26, %v1005_v40  ;;  %v1021_v31 = vld [vmem:[#allocation8 + $0x768] sm:$0xff]  ;;  %v799_v24 = vld [vmem:[#allocation8 + $0x78] sm:$0xff] }
 0x235   :  { %v1029_v3 = vld [vmem:[#allocation8 + $0x7a8] sm:$0xff] }
 0x236   :  { %2424 = vmatpush1.bf16.msra.mxu1 %v3836_v9  ;;  %2530 = vmatpush1.bf16.msra.mxu0 %v3838_v11  ;;  %v3895_v9 = vcombine.high %v1001_v26, %v1005_v40  ;;  %v1008_v11 = vld [vmem:[#allocation8 + $0x700] sm:$0xff]  ;;  %v1037_v47 = vld [vmem:[#allocation8 + $0x7e8] sm:$0xff] }
 0x237   :  { %2425 = vmatprep.subr.bf16.mxu1 %v3845_v14  ;;  %2531 = vmatprep.subr.bf16.mxu0 %v3847_v10  ;;  %v1012_v14 = vld [vmem:[#allocation8 + $0x720] sm:$0xff]  ;;  %v1009_v10 = vld [vmem:[#allocation8 + $0x708] sm:$0xff] }
 0x238   :  { %v3901_v22 = vcombine.high %v1008_v11, %v1012_v14  ;;  %v3900_v32 = vcombine.low %v1008_v11, %v1012_v14  ;;  %v3902_v33 = vcombine.low %v1009_v10, %v1013_v18  ;;  %v807_v11 = vld [vmem:[#allocation8 + $0xb8] sm:$0xff] }
 0x23a   :  { %2426 = vmatpush1.bf16.msra.mxu1 %v3844_v27  ;;  %2532 = vmatpush1.bf16.msra.mxu0 %v3846_v28  ;;  %v3903_v27 = vcombine.high %v1009_v10, %v1013_v18  ;;  %v1016_v28 = vld [vmem:[#allocation8 + $0x740] sm:$0xff] }
 0x23b   :  { %2427 = vmatprep.subr.bf16.mxu1 %v3853_v29  ;;  %2533 = vmatprep.subr.bf16.mxu0 %v3855_v30  ;;  %v1020_v29 = vld [vmem:[#allocation8 + $0x760] sm:$0xff]  ;;  %v1017_v30 = vld [vmem:[#allocation8 + $0x748] sm:$0xff] }
 0x23c   :  { %v3909_v34 = vcombine.high %v1016_v28, %v1020_v29  ;;  %v3908_v4 = vcombine.low %v1016_v28, %v1020_v29  ;;  %v3910_v41 = vcombine.low %v1017_v30, %v1021_v31  ;;  %v815_v28 = vld [vmem:[#allocation8 + $0xf8] sm:$0xff] }
 0x23e   :  { %2428 = vmatpush1.bf16.msra.mxu1 %v3852_v35  ;;  %2534 = vmatpush1.bf16.msra.mxu0 %v3854_v36  ;;  %v3911_v35 = vcombine.high %v1017_v30, %v1021_v31  ;;  %v1024_v36 = vld [vmem:[#allocation8 + $0x780] sm:$0xff] }
 0x23f   :  { %2429 = vmatprep.subr.bf16.mxu1 %v3861_v37  ;;  %2535 = vmatprep.subr.bf16.mxu0 %v3863_v38  ;;  %v1028_v37 = vld [vmem:[#allocation8 + $0x7a0] sm:$0xff]  ;;  %v1025_v38 = vld [vmem:[#allocation8 + $0x788] sm:$0xff] }
 0x240   :  { %v3917_v42 = vcombine.high %v1024_v36, %v1028_v37  ;;  %v3916_v48 = vcombine.low %v1024_v36, %v1028_v37  ;;  %v3918_v49 = vcombine.low %v1025_v38, %v1029_v3  ;;  %v823_v36 = vld [vmem:[#allocation8 + $0x138] sm:$0xff] }
 0x242   :  { %2430 = vmatpush1.bf16.msra.mxu1 %v3860_v5  ;;  %2536 = vmatpush1.bf16.msra.mxu0 %v3862_v6  ;;  %v3919_v5 = vcombine.high %v1025_v38, %v1029_v3  ;;  %v1032_v6 = vld [vmem:[#allocation8 + $0x7c0] sm:$0xff] }
 0x243   :  { %2431 = vmatprep.subr.bf16.mxu1 %v3869_v45  ;;  %2537 = vmatprep.subr.bf16.mxu0 %v3871_v46  ;;  %v1036_v45 = vld [vmem:[#allocation8 + $0x7e0] sm:$0xff]  ;;  %v1033_v46 = vld [vmem:[#allocation8 + $0x7c8] sm:$0xff] }
 0x244   :  { %v3925_v50 = vcombine.high %v1032_v6, %v1036_v45  ;;  %v3924_v52 = vcombine.low %v1032_v6, %v1036_v45  ;;  %v3926_v53 = vcombine.low %v1033_v46, %v1037_v47  ;;  %v831_v6 = vld [vmem:[#allocation8 + $0x178] sm:$0xff] }
 0x246   :  { %2432 = vmatpush1.bf16.msra.mxu1 %v3868_v56  ;;  %2538 = vmatpush1.bf16.msra.mxu0 %v3870_v57  ;;  %v3927_v56 = vcombine.high %v1033_v46, %v1037_v47  ;;  %v786_v57 = vld [vmem:[#allocation8 + $0x10] sm:$0xff] }
 0x247   :  { %2433 = vmatprep.subr.bf16.mxu1 %v3877_v58  ;;  %2539 = vmatprep.subr.bf16.mxu0 %v3879_v60  ;;  %v790_v58 = vld [vmem:[#allocation8 + $0x30] sm:$0xff]  ;;  %v787_v60 = vld [vmem:[#allocation8 + $0x18] sm:$0xff] }
 0x248   :  { %v3681_v7 = vcombine.high %v786_v57, %v790_v58  ;;  %v3680_v25 = vcombine.low %v786_v57, %v790_v58  ;;  %v3682_v26 = vcombine.low %v787_v60, %v791_v23 }
 0x24a   :  { %2434 = vmatpush1.bf16.msra.mxu1 %v3876_v8  ;;  %2540 = vmatpush1.bf16.msra.mxu0 %v3878_v39  ;;  %v3683_v8 = vcombine.high %v787_v60, %v791_v23  ;;  %v794_v39 = vld [vmem:[#allocation8 + $0x50] sm:$0xff] }
 0x24b   :  { %2435 = vmatprep.subr.bf16.mxu1 %v3885_v54  ;;  %2541 = vmatprep.subr.bf16.mxu0 %v3887_v13  ;;  %v798_v54 = vld [vmem:[#allocation8 + $0x70] sm:$0xff]  ;;  %v795_v13 = vld [vmem:[#allocation8 + $0x58] sm:$0xff] }
 0x24c   :  { %v3689_v40 = vcombine.high %v794_v39, %v798_v54  ;;  %v3688_v14 = vcombine.low %v794_v39, %v798_v54  ;;  %v3690_v10 = vcombine.low %v795_v13, %v799_v24 }
 0x24e   :  { %2436 = vmatpush1.bf16.msra.mxu1 %v3884_v44  ;;  %2542 = vmatpush1.bf16.msra.mxu0 %v3886_v63  ;;  %v3691_v44 = vcombine.high %v795_v13, %v799_v24  ;;  %v802_v63 = vld [vmem:[#allocation8 + $0x90] sm:$0xff] }
 0x24f   :  { %2437 = vmatprep.subr.bf16.mxu1 %v3893_v1  ;;  %2543 = vmatprep.subr.bf16.mxu0 %v3895_v9  ;;  %v806_v1 = vld [vmem:[#allocation8 + $0xb0] sm:$0xff]  ;;  %v803_v9 = vld [vmem:[#allocation8 + $0x98] sm:$0xff] }
 0x250   :  { %v3697_v18 = vcombine.high %v802_v63, %v806_v1  ;;  %v3696_v29 = vcombine.low %v802_v63, %v806_v1  ;;  %v3698_v30 = vcombine.low %v803_v9, %v807_v11 }
 0x252   :  { %2438 = vmatpush1.bf16.msra.mxu1 %v3892_v20  ;;  %2544 = vmatpush1.bf16.msra.mxu0 %v3894_v21  ;;  %v3699_v20 = vcombine.high %v803_v9, %v807_v11  ;;  %v810_v21 = vld [vmem:[#allocation8 + $0xd0] sm:$0xff] }
 0x253   :  { %2439 = vmatprep.subr.bf16.mxu1 %v3901_v22  ;;  %2545 = vmatprep.subr.bf16.mxu0 %v3903_v27  ;;  %v814_v22 = vld [vmem:[#allocation8 + $0xf0] sm:$0xff]  ;;  %v811_v27 = vld [vmem:[#allocation8 + $0xd8] sm:$0xff] }
 0x254   :  { %v3705_v31 = vcombine.high %v810_v21, %v814_v22  ;;  %v3704_v37 = vcombine.low %v810_v21, %v814_v22  ;;  %v3706_v38 = vcombine.low %v811_v27, %v815_v28 }
 0x256   :  { %2440 = vmatpush1.bf16.msra.mxu1 %v3900_v32  ;;  %2546 = vmatpush1.bf16.msra.mxu0 %v3902_v33  ;;  %v3707_v32 = vcombine.high %v811_v27, %v815_v28  ;;  %v818_v33 = vld [vmem:[#allocation8 + $0x110] sm:$0xff] }
 0x257   :  { %2441 = vmatprep.subr.bf16.mxu1 %v3909_v34  ;;  %2547 = vmatprep.subr.bf16.mxu0 %v3911_v35  ;;  %v822_v34 = vld [vmem:[#allocation8 + $0x130] sm:$0xff]  ;;  %v819_v35 = vld [vmem:[#allocation8 + $0x118] sm:$0xff] }
 0x258   :  { %v3713_v3 = vcombine.high %v818_v33, %v822_v34  ;;  %v3712_v45 = vcombine.low %v818_v33, %v822_v34  ;;  %v3714_v46 = vcombine.low %v819_v35, %v823_v36 }
 0x25a   :  { %2442 = vmatpush1.bf16.msra.mxu1 %v3908_v4  ;;  %2548 = vmatpush1.bf16.msra.mxu0 %v3910_v41  ;;  %v3715_v4 = vcombine.high %v819_v35, %v823_v36  ;;  %v826_v41 = vld [vmem:[#allocation8 + $0x150] sm:$0xff] }
 0x25b   :  { %2443 = vmatprep.subr.bf16.mxu1 %v3917_v42  ;;  %2549 = vmatprep.subr.bf16.mxu0 %v3919_v5  ;;  %v830_v42 = vld [vmem:[#allocation8 + $0x170] sm:$0xff]  ;;  %v827_v5 = vld [vmem:[#allocation8 + $0x158] sm:$0xff] }
 0x25c   :  { %v3721_v47 = vcombine.high %v826_v41, %v830_v42  ;;  %v3720_v57 = vcombine.low %v826_v41, %v830_v42  ;;  %v3722_v58 = vcombine.low %v827_v5, %v831_v6 }
 0x25e   :  { %2444 = vmatpush1.bf16.msra.mxu1 %v3916_v48  ;;  %2550 = vmatpush1.bf16.msra.mxu0 %v3918_v49  ;;  %v834_v48 = vld [vmem:[#allocation8 + $0x190] sm:$0xff] }
 0x25f   :  { %2445 = vmatprep.subr.bf16.mxu1 %v3925_v50  ;;  %2551 = vmatprep.subr.bf16.mxu0 %v3927_v56  ;;  %v838_v49 = vld [vmem:[#allocation8 + $0x1b0] sm:$0xff]  ;;  %v835_v50 = vld [vmem:[#allocation8 + $0x198] sm:$0xff] }
 0x260   :  { %v839_v56 = vld [vmem:[#allocation8 + $0x1b8] sm:$0xff]  ;;  %v3729_v60 = vcombine.high %v834_v48, %v838_v49  ;;  %v3728_v39 = vcombine.low %v834_v48, %v838_v49 }
 0x261   :  { %v3731_v23 = vcombine.high %v835_v50, %v839_v56  ;;  %v3730_v54 = vcombine.low %v835_v50, %v839_v56 }
 0x262   :  { %2446 = vmatpush1.bf16.msra.mxu1 %v3924_v52  ;;  %2552 = vmatpush1.bf16.msra.mxu0 %v3926_v53  ;;  %v842_v52 = vld [vmem:[#allocation8 + $0x1d0] sm:$0xff] }
 0x263   :  { %2574 = vmatprep.subr.bf16.mxu1 %v3681_v7  ;;  %2680 = vmatprep.subr.bf16.mxu0 %v3683_v8  ;;  %v846_v53 = vld [vmem:[#allocation8 + $0x1f0] sm:$0xff]  ;;  %v843_v7 = vld [vmem:[#allocation8 + $0x1d8] sm:$0xff] }
 0x264   :  { %v847_v8 = vld [vmem:[#allocation8 + $0x1f8] sm:$0xff]  ;;  %v3737_v13 = vcombine.high %v842_v52, %v846_v53  ;;  %v3736_v63 = vcombine.low %v842_v52, %v846_v53 }
 0x265   :  { %2448 = vmatmul.mubr.bf16.vlgmr.msra.gmra.mrb[8].mxu1 %v4712_v59  ;;  %2554 = vmatmul.mubr.bf16.vlgmr.msra.gmra.mrb[16].mxu0 %v4712_v59  ;;  %v3739_v24 = vcombine.high %v843_v7, %v847_v8  ;;  %v3738_v1 = vcombine.low %v843_v7, %v847_v8 }
 0x266   :  { %2457 = vmatprep.mubr.bf16.mxu1 %v4751_v43  ;;  %2563 = vmatprep.mubr.bf16.mxu0 %v4751_v43 }
 0x267   :  { %2575 = vmatpush1.bf16.msra.mxu1 %v3680_v25  ;;  %2681 = vmatpush1.bf16.msra.mxu0 %v3682_v26  ;;  %v850_v25 = vld [vmem:[#allocation8 + $0x210] sm:$0xff] }
 0x268   :  { %2576 = vmatprep.subr.bf16.mxu1 %v3689_v40  ;;  %2682 = vmatprep.subr.bf16.mxu0 %v3691_v44  ;;  %v854_v26 = vld [vmem:[#allocation8 + $0x230] sm:$0xff]  ;;  %v851_v40 = vld [vmem:[#allocation8 + $0x218] sm:$0xff] }
 0x269   :  { %v855_v44 = vld [vmem:[#allocation8 + $0x238] sm:$0xff]  ;;  %v3745_v9 = vcombine.high %v850_v25, %v854_v26  ;;  %v3744_v21 = vcombine.low %v850_v25, %v854_v26 }
 0x26a   :  { %v3747_v11 = vcombine.high %v851_v40, %v855_v44  ;;  %v3746_v22 = vcombine.low %v851_v40, %v855_v44 }
 0x26b   :  { %2577 = vmatpush1.bf16.msra.mxu1 %v3688_v14  ;;  %2683 = vmatpush1.bf16.msra.mxu0 %v3690_v10  ;;  %v858_v14 = vld [vmem:[#allocation8 + $0x250] sm:$0xff] }
 0x26c   :  { %2578 = vmatprep.subr.bf16.mxu1 %v3697_v18  ;;  %2684 = vmatprep.subr.bf16.mxu0 %v3699_v20  ;;  %v862_v10 = vld [vmem:[#allocation8 + $0x270] sm:$0xff]  ;;  %v859_v18 = vld [vmem:[#allocation8 + $0x258] sm:$0xff] }
 0x26d   :  { %2458 = vmatmul.mubr.bf16.gmra.mrb[12].mxu1 %v4741_v61  ;;  %2564 = vmatmul.mubr.bf16.gmra.mrb[20].mxu0 %v4741_v61  ;;  %v863_v20 = vld [vmem:[#allocation8 + $0x278] sm:$0xff]  ;;  %v3753_v27 = vcombine.high %v858_v14, %v862_v10  ;;  %v3752_v33 = vcombine.low %v858_v14, %v862_v10 }
 0x26e   :  { %2606 = vmatprep.mubr.bf16.mxu1 %v4715_v15  ;;  %2712 = vmatprep.mubr.bf16.mxu0 %v4715_v15  ;;  %v3723_v15 = vcombine.high %v827_v5, %v831_v6  ;;  %v3755_v28 = vcombine.high %v859_v18, %v863_v20  ;;  %v3754_v34 = vcombine.low %v859_v18, %v863_v20 }
 0x26f   :  { %2579 = vmatpush1.bf16.msra.mxu1 %v3696_v29  ;;  %2685 = vmatpush1.bf16.msra.mxu0 %v3698_v30  ;;  %v866_v29 = vld [vmem:[#allocation8 + $0x290] sm:$0xff] }
 0x270   :  { %2580 = vmatprep.subr.bf16.mxu1 %v3705_v31  ;;  %2686 = vmatprep.subr.bf16.mxu0 %v3707_v32  ;;  %v870_v30 = vld [vmem:[#allocation8 + $0x2b0] sm:$0xff]  ;;  %v867_v31 = vld [vmem:[#allocation8 + $0x298] sm:$0xff] }
 0x271   :  { %v871_v32 = vld [vmem:[#allocation8 + $0x2b8] sm:$0xff]  ;;  %v3761_v35 = vcombine.high %v866_v29, %v870_v30  ;;  %v3760_v41 = vcombine.low %v866_v29, %v870_v30 }
 0x272   :  { %v3763_v36 = vcombine.high %v867_v31, %v871_v32  ;;  %v3762_v42 = vcombine.low %v867_v31, %v871_v32 }
 0x273   :  { %2581 = vmatpush1.bf16.msra.mxu1 %v3704_v37  ;;  %2687 = vmatpush1.bf16.msra.mxu0 %v3706_v38  ;;  %v874_v37 = vld [vmem:[#allocation8 + $0x2d0] sm:$0xff] }
 0x274   :  { %2582 = vmatprep.subr.bf16.mxu1 %v3713_v3  ;;  %2688 = vmatprep.subr.bf16.mxu0 %v3715_v4  ;;  %v878_v38 = vld [vmem:[#allocation8 + $0x2f0] sm:$0xff]  ;;  %v875_v3 = vld [vmem:[#allocation8 + $0x2d8] sm:$0xff] }
 0x275   :  { %v879_v4 = vld [vmem:[#allocation8 + $0x2f8] sm:$0xff]  ;;  %v3769_v5 = vcombine.high %v874_v37, %v878_v38  ;;  %v3768_v48 = vcombine.low %v874_v37, %v878_v38 }
 0x276   :  { %v3771_v6 = vcombine.high %v875_v3, %v879_v4  ;;  %v3770_v49 = vcombine.low %v875_v3, %v879_v4 }
 0x277   :  { %2583 = vmatpush1.bf16.msra.mxu1 %v3712_v45  ;;  %2689 = vmatpush1.bf16.msra.mxu0 %v3714_v46  ;;  %v882_v45 = vld [vmem:[#allocation8 + $0x310] sm:$0xff] }
 0x278   :  { %2584 = vmatprep.subr.bf16.mxu1 %v3721_v47  ;;  %2690 = vmatprep.subr.bf16.mxu0 %v3723_v15  ;;  %v886_v46 = vld [vmem:[#allocation8 + $0x330] sm:$0xff]  ;;  %v883_v47 = vld [vmem:[#allocation8 + $0x318] sm:$0xff] }
 0x279   :  { %v887_v15 = vld [vmem:[#allocation8 + $0x338] sm:$0xff]  ;;  %v3777_v50 = vcombine.high %v882_v45, %v886_v46  ;;  %v3776_v52 = vcombine.low %v882_v45, %v886_v46 }
 0x27a   :  { %v3779_v56 = vcombine.high %v883_v47, %v887_v15  ;;  %v3778_v53 = vcombine.low %v883_v47, %v887_v15 }
 0x27b   :  { %2585 = vmatpush1.bf16.msra.mxu1 %v3720_v57  ;;  %2691 = vmatpush1.bf16.msra.mxu0 %v3722_v58  ;;  %v890_v57 = vld [vmem:[#allocation8 + $0x350] sm:$0xff] }
 0x27c   :  { %2586 = vmatprep.subr.bf16.mxu1 %v3729_v60  ;;  %2692 = vmatprep.subr.bf16.mxu0 %v3731_v23  ;;  %v894_v58 = vld [vmem:[#allocation8 + $0x370] sm:$0xff]  ;;  %v891_v60 = vld [vmem:[#allocation8 + $0x358] sm:$0xff] }
 0x27d   :  { %v895_v23 = vld [vmem:[#allocation8 + $0x378] sm:$0xff]  ;;  %v3785_v7 = vcombine.high %v890_v57, %v894_v58  ;;  %v3784_v25 = vcombine.low %v890_v57, %v894_v58 }
 0x27e   :  { %v3787_v8 = vcombine.high %v891_v60, %v895_v23  ;;  %v3786_v26 = vcombine.low %v891_v60, %v895_v23  ;;  %v946_v23 = vld [vmem:[#allocation8 + $0x510] sm:$0xff] }
 0x27f   :  { %2587 = vmatpush1.bf16.msra.mxu1 %v3728_v39  ;;  %2693 = vmatpush1.bf16.msra.mxu0 %v3730_v54  ;;  %v898_v39 = vld [vmem:[#allocation8 + $0x390] sm:$0xff] }
 0x280   :  { %2588 = vmatprep.subr.bf16.mxu1 %v3737_v13  ;;  %2694 = vmatprep.subr.bf16.mxu0 %v3739_v24  ;;  %v902_v54 = vld [vmem:[#allocation8 + $0x3b0] sm:$0xff]  ;;  %v899_v13 = vld [vmem:[#allocation8 + $0x398] sm:$0xff] }
 0x281   :  { %v903_v24 = vld [vmem:[#allocation8 + $0x3b8] sm:$0xff]  ;;  %v3793_v40 = vcombine.high %v898_v39, %v902_v54  ;;  %v3792_v14 = vcombine.low %v898_v39, %v902_v54 }
 0x282   :  { %v3795_v44 = vcombine.high %v899_v13, %v903_v24  ;;  %v3794_v10 = vcombine.low %v899_v13, %v903_v24  ;;  %v954_v13 = vld [vmem:[#allocation8 + $0x550] sm:$0xff] }
 0x283   :  { %2589 = vmatpush1.bf16.msra.mxu1 %v3736_v63  ;;  %2695 = vmatpush1.bf16.msra.mxu0 %v3738_v1  ;;  %v906_v63 = vld [vmem:[#allocation8 + $0x3d0] sm:$0xff] }
 0x284   :  { %2590 = vmatprep.subr.bf16.mxu1 %v3745_v9  ;;  %2696 = vmatprep.subr.bf16.mxu0 %v3747_v11  ;;  %v910_v1 = vld [vmem:[#allocation8 + $0x3f0] sm:$0xff]  ;;  %v907_v9 = vld [vmem:[#allocation8 + $0x3d8] sm:$0xff] }
 0x285   :  { %v911_v11 = vld [vmem:[#allocation8 + $0x3f8] sm:$0xff]  ;;  %v3801_v18 = vcombine.high %v906_v63, %v910_v1  ;;  %v3800_v29 = vcombine.low %v906_v63, %v910_v1  ;;  %v958_v24 = vld [vmem:[#allocation8 + $0x570] sm:$0xff] }
 0x286   :  { %v3803_v20 = vcombine.high %v907_v9, %v911_v11  ;;  %v3802_v30 = vcombine.low %v907_v9, %v911_v11  ;;  %v962_v1 = vld [vmem:[#allocation8 + $0x590] sm:$0xff]  ;;  %v967_v11 = vld [vmem:[#allocation8 + $0x5b8] sm:$0xff] }
 0x287   :  { %2591 = vmatpush1.bf16.msra.mxu1 %v3744_v21  ;;  %2697 = vmatpush1.bf16.msra.mxu0 %v3746_v22  ;;  %v914_v21 = vld [vmem:[#allocation8 + $0x410] sm:$0xff] }
 0x288   :  { %2592 = vmatprep.subr.bf16.mxu1 %v3753_v27  ;;  %2698 = vmatprep.subr.bf16.mxu0 %v3755_v28  ;;  %v918_v22 = vld [vmem:[#allocation8 + $0x430] sm:$0xff]  ;;  %v915_v27 = vld [vmem:[#allocation8 + $0x418] sm:$0xff] }
 0x289   :  { %v919_v28 = vld [vmem:[#allocation8 + $0x438] sm:$0xff]  ;;  %v3809_v31 = vcombine.high %v914_v21, %v918_v22  ;;  %v3808_v37 = vcombine.low %v914_v21, %v918_v22  ;;  %v966_v9 = vld [vmem:[#allocation8 + $0x5b0] sm:$0xff] }
 0x28a   :  { %v3811_v32 = vcombine.high %v915_v27, %v919_v28  ;;  %v3810_v38 = vcombine.low %v915_v27, %v919_v28  ;;  %v970_v21 = vld [vmem:[#allocation8 + $0x5d0] sm:$0xff]  ;;  %v971_v27 = vld [vmem:[#allocation8 + $0x5d8] sm:$0xff] }
 0x28b   :  { %2593 = vmatpush1.bf16.msra.mxu1 %v3752_v33  ;;  %2699 = vmatpush1.bf16.msra.mxu0 %v3754_v34  ;;  %v922_v33 = vld [vmem:[#allocation8 + $0x450] sm:$0xff]  ;;  %v975_v28 = vld [vmem:[#allocation8 + $0x5f8] sm:$0xff] }
 0x28c   :  { %2594 = vmatprep.subr.bf16.mxu1 %v3761_v35  ;;  %2700 = vmatprep.subr.bf16.mxu0 %v3763_v36  ;;  %v926_v34 = vld [vmem:[#allocation8 + $0x470] sm:$0xff]  ;;  %v923_v35 = vld [vmem:[#allocation8 + $0x458] sm:$0xff] }
 0x28d   :  { %v927_v36 = vld [vmem:[#allocation8 + $0x478] sm:$0xff]  ;;  %v3817_v3 = vcombine.high %v922_v33, %v926_v34  ;;  %v3816_v45 = vcombine.low %v922_v33, %v926_v34  ;;  %v974_v22 = vld [vmem:[#allocation8 + $0x5f0] sm:$0xff] }
 0x28e   :  { %v3819_v4 = vcombine.high %v923_v35, %v927_v36  ;;  %v3818_v46 = vcombine.low %v923_v35, %v927_v36  ;;  %v978_v33 = vld [vmem:[#allocation8 + $0x610] sm:$0xff]  ;;  %v979_v35 = vld [vmem:[#allocation8 + $0x618] sm:$0xff] }
 0x28f   :  { %2595 = vmatpush1.bf16.msra.mxu1 %v3760_v41  ;;  %2701 = vmatpush1.bf16.msra.mxu0 %v3762_v42  ;;  %v930_v41 = vld [vmem:[#allocation8 + $0x490] sm:$0xff]  ;;  %v983_v36 = vld [vmem:[#allocation8 + $0x638] sm:$0xff] }
 0x290   :  { %2596 = vmatprep.subr.bf16.mxu1 %v3769_v5  ;;  %2702 = vmatprep.subr.bf16.mxu0 %v3771_v6  ;;  %v934_v42 = vld [vmem:[#allocation8 + $0x4b0] sm:$0xff]  ;;  %v931_v5 = vld [vmem:[#allocation8 + $0x498] sm:$0xff] }
 0x291   :  { %v935_v6 = vld [vmem:[#allocation8 + $0x4b8] sm:$0xff]  ;;  %v3825_v47 = vcombine.high %v930_v41, %v934_v42  ;;  %v982_v34 = vld [vmem:[#allocation8 + $0x630] sm:$0xff] }
 0x292   :  { %v3827_v15 = vcombine.high %v931_v5, %v935_v6  ;;  %v3826_v57 = vcombine.low %v931_v5, %v935_v6  ;;  %v987_v5 = vld [vmem:[#allocation8 + $0x658] sm:$0xff] }
 0x293   :  { %2597 = vmatpush1.bf16.msra.mxu1 %v3768_v48  ;;  %2703 = vmatpush1.bf16.msra.mxu0 %v3770_v49  ;;  %v938_v48 = vld [vmem:[#allocation8 + $0x4d0] sm:$0xff]  ;;  %v991_v6 = vld [vmem:[#allocation8 + $0x678] sm:$0xff] }
 0x294   :  { %2598 = vmatprep.subr.bf16.mxu1 %v3777_v50  ;;  %2704 = vmatprep.subr.bf16.mxu0 %v3779_v56  ;;  %v942_v49 = vld [vmem:[#allocation8 + $0x4f0] sm:$0xff]  ;;  %v939_v50 = vld [vmem:[#allocation8 + $0x4d8] sm:$0xff] }
 0x295   :  { %v943_v56 = vld [vmem:[#allocation8 + $0x4f8] sm:$0xff]  ;;  %v3833_v58 = vcombine.high %v938_v48, %v942_v49 }
 0x296   :  { %v3835_v60 = vcombine.high %v939_v50, %v943_v56 }
 0x297   :  { %2599 = vmatpush1.bf16.msra.mxu1 %v3776_v52  ;;  %2705 = vmatpush1.bf16.msra.mxu0 %v3778_v53  ;;  %v947_v52 = vld [vmem:[#allocation8 + $0x518] sm:$0xff] }
 0x298   :  { %2600 = vmatprep.subr.bf16.mxu1 %v3785_v7  ;;  %2706 = vmatprep.subr.bf16.mxu0 %v3787_v8  ;;  %v951_v53 = vld [vmem:[#allocation8 + $0x538] sm:$0xff]  ;;  %v3832_v7 = vcombine.low %v938_v48, %v942_v49  ;;  %v3834_v8 = vcombine.low %v939_v50, %v943_v56  ;;  %v994_v48 = vld [vmem:[#allocation8 + $0x690] sm:$0xff] }
 0x299   :  { %v3843_v54 = vcombine.high %v947_v52, %v951_v53  ;;  %v998_v49 = vld [vmem:[#allocation8 + $0x6b0] sm:$0xff]  ;;  %v995_v50 = vld [vmem:[#allocation8 + $0x698] sm:$0xff] }
 0x29a   :  { %v999_v56 = vld [vmem:[#allocation8 + $0x6b8] sm:$0xff] }
 0x29b   :  { %2601 = vmatpush1.bf16.msra.mxu1 %v3784_v25  ;;  %2707 = vmatpush1.bf16.msra.mxu0 %v3786_v26  ;;  %v955_v25 = vld [vmem:[#allocation8 + $0x558] sm:$0xff] }
 0x29c   :  { %2602 = vmatprep.subr.bf16.mxu1 %v3793_v40  ;;  %2708 = vmatprep.subr.bf16.mxu0 %v3795_v44  ;;  %v959_v26 = vld [vmem:[#allocation8 + $0x578] sm:$0xff]  ;;  %v3842_v40 = vcombine.low %v947_v52, %v951_v53  ;;  %v3849_v44 = vcombine.high %v954_v13, %v958_v24 }
 0x29d   :  { %v3851_v63 = vcombine.high %v955_v25, %v959_v26  ;;  %v1003_v52 = vld [vmem:[#allocation8 + $0x6d8] sm:$0xff] }
 0x29e   :  { %v1007_v53 = vld [vmem:[#allocation8 + $0x6f8] sm:$0xff] }
 0x29f   :  { %2603 = vmatpush1.bf16.msra.mxu1 %v3792_v14  ;;  %2709 = vmatpush1.bf16.msra.mxu0 %v3794_v10  ;;  %v3848_v14 = vcombine.low %v954_v13, %v958_v24  ;;  %v3850_v10 = vcombine.low %v955_v25, %v959_v26  ;;  %v1010_v13 = vld [vmem:[#allocation8 + $0x710] sm:$0xff]  ;;  %v1011_v25 = vld [vmem:[#allocation8 + $0x718] sm:$0xff] }
 0x2a0   :  { %2604 = vmatprep.subr.bf16.mxu1 %v3801_v18  ;;  %2710 = vmatprep.subr.bf16.mxu0 %v3803_v20  ;;  %v3857_v18 = vcombine.high %v962_v1, %v966_v9  ;;  %v1014_v24 = vld [vmem:[#allocation8 + $0x730] sm:$0xff]  ;;  %v1015_v26 = vld [vmem:[#allocation8 + $0x738] sm:$0xff] }
 0x2a3   :  { %2605 = vmatpush1.bf16.msra.mxu1 %v3800_v29  ;;  %2711 = vmatpush1.bf16.msra.mxu0 %v3802_v30  ;;  %v3856_v29 = vcombine.low %v962_v1, %v966_v9  ;;  %v1018_v1 = vld [vmem:[#allocation8 + $0x750] sm:$0xff] }
 0x2a4   :  { %2627 = vmatprep.subr.bf16.mxu1 %v3809_v31  ;;  %2733 = vmatprep.subr.bf16.mxu0 %v3811_v32  ;;  %v3865_v31 = vcombine.high %v970_v21, %v974_v22  ;;  %v3867_v32 = vcombine.high %v971_v27, %v975_v28  ;;  %v1022_v9 = vld [vmem:[#allocation8 + $0x770] sm:$0xff] }
 0x2a6   :  { %2607 = vmatmul.mubr.bf16.vlgmr.msra.gmra.mrb[16].mxu1 %v4710_v55  ;;  %2713 = vmatmul.mubr.bf16.vlgmr.msra.gmra.mrb[24].mxu0 %v4710_v55  ;;  %v3824_v55 = vcombine.low %v930_v41, %v934_v42  ;;  %v986_v41 = vld [vmem:[#allocation8 + $0x650] sm:$0xff] }
 0x2a7   :  { %2616 = vmatprep.mubr.bf16.mxu1 %v4743_v62  ;;  %2628 = vmatpush1.bf16.msra.mxu1 %v3808_v37  ;;  %v3864_v37 = vcombine.low %v970_v21, %v974_v22  ;;  %v990_v42 = vld [vmem:[#allocation8 + $0x670] sm:$0xff] }
 0x2a8   :  { %2722 = vmatprep.mubr.bf16.mxu0 %v4743_v62  ;;  %2734 = vmatpush1.bf16.msra.mxu0 %v3810_v38  ;;  %v950_v62 = vld [vmem:[#allocation8 + $0x530] sm:$0xff]  ;;  %v3866_v38 = vcombine.low %v971_v27, %v975_v28  ;;  %v1027_v27 = vld [vmem:[#allocation8 + $0x798] sm:$0xff] }
 0x2a9   :  { %2629 = vmatprep.subr.bf16.mxu1 %v3817_v3  ;;  %2735 = vmatprep.subr.bf16.mxu0 %v3819_v4  ;;  %v3841_v39 = vcombine.high %v946_v23, %v950_v62  ;;  %v3873_v3 = vcombine.high %v978_v33, %v982_v34  ;;  %v3875_v4 = vcombine.high %v979_v35, %v983_v36  ;;  %v1026_v21 = vld [vmem:[#allocation8 + $0x790] sm:$0xff]  ;;  %v1031_v28 = vld [vmem:[#allocation8 + $0x7b8] sm:$0xff] }
 0x2aa   :  { %v1030_v22 = vld [vmem:[#allocation8 + $0x7b0] sm:$0xff] }
 0x2ab   :  { %2630 = vmatpush1.bf16.msra.mxu1 %v3816_v45  ;;  %v3872_v45 = vcombine.low %v978_v33, %v982_v34  ;;  %v1034_v33 = vld [vmem:[#allocation8 + $0x7d0] sm:$0xff] }
 0x2ac   :  { %2736 = vmatpush1.bf16.msra.mxu0 %v3818_v46  ;;  %2631 = vmatprep.subr.bf16.mxu1 %v3825_v47  ;;  %v3874_v46 = vcombine.low %v979_v35, %v983_v36  ;;  %v3881_v47 = vcombine.high %v986_v41, %v990_v42  ;;  %v1038_v34 = vld [vmem:[#allocation8 + $0x7f0] sm:$0xff]  ;;  %v1035_v35 = vld [vmem:[#allocation8 + $0x7d8] sm:$0xff] }
 0x2ad   :  { %2737 = vmatprep.subr.bf16.mxu0 %v3827_v15  ;;  %v3883_v15 = vcombine.high %v987_v5, %v991_v6  ;;  %v1039_v36 = vld [vmem:[#allocation8 + $0x7f8] sm:$0xff] }
 0x2ae   :  { %2617 = vmatmul.mubr.bf16.gmra.mrb[20].mxu1 %v4737_v51  ;;  %2723 = vmatmul.mubr.bf16.gmra.mrb[28].mxu0 %v4737_v51  ;;  %v3840_v51 = vcombine.low %v946_v23, %v950_v62  ;;  %v1002_v23 = vld [vmem:[#allocation8 + $0x6d0] sm:$0xff] }
 0x2af   :  { %2632 = vmatpush1.bf16.msra.mxu1 %v3824_v55  ;;  %2659 = vmatprep.mubr.bf16.mxu1 %v4717_v12  ;;  %v3880_v55 = vcombine.low %v986_v41, %v990_v42  ;;  %v1006_v62 = vld [vmem:[#allocation8 + $0x6f0] sm:$0xff]  ;;  %v3928_v41 = vcombine.low %v1034_v33, %v1038_v34  ;;  %v3930_v42 = vcombine.low %v1035_v35, %v1039_v36 }
 0x2b0   :  { %2738 = vmatpush1.bf16.msra.mxu0 %v3826_v57  ;;  %2765 = vmatprep.mubr.bf16.mxu0 %v4717_v12  ;;  %v963_v12 = vld [vmem:[#allocation8 + $0x598] sm:$0xff]  ;;  %v3882_v57 = vcombine.low %v987_v5, %v991_v6  ;;  %v4292_v5 = vld [vmem:[#allocation10 + $0x40] sm:$0xff]  }
 0x2b1   :  { %2633 = vmatprep.subr.bf16.mxu1 %v3833_v58  ;;  %2739 = vmatprep.subr.bf16.mxu0 %v3835_v60  ;;  %v3859_v20 = vcombine.high %v963_v12, %v967_v11  ;;  %v3858_v30 = vcombine.low %v963_v12, %v967_v11  ;;  %v3889_v58 = vcombine.high %v994_v48, %v998_v49  ;;  %v1019_v12 = vld [vmem:[#allocation8 + $0x758] sm:$0xff]  ;;  %v4293_v6 = vld [vmem:[#allocation10 + $0xc0] sm:$0xff]  }
 0x2b2   :  { %v3891_v60 = vcombine.high %v995_v50, %v999_v56  ;;  %v1023_v11 = vld [vmem:[#allocation8 + $0x778] sm:$0xff] }
 0x2b3   :  { %2634 = vmatpush1.bf16.msra.mxu1 %v3832_v7  ;;  %v3888_v7 = vcombine.low %v994_v48, %v998_v49  ;;  %v4298_v48 = vld [vmem:[#allocation10 + $0x8] sm:$0xff]  }
 0x2b4   :  { %2740 = vmatpush1.bf16.msra.mxu0 %v3834_v8  ;;  %2635 = vmatprep.subr.bf16.mxu1 %v3841_v39  ;;  %v3890_v8 = vcombine.low %v995_v50, %v999_v56  ;;  %v3897_v39 = vcombine.high %v1002_v23, %v1006_v62  ;;  %v4299_v49 = vld [vmem:[#allocation10 + $0x88] sm:$0xff]   ;;  %v4300_v50 = vld [vmem:[#allocation10 + $0x50] sm:$0xff]  }
 0x2b5   :  { %2741 = vmatprep.subr.bf16.mxu0 %v3843_v54  ;;  %v3899_v54 = vcombine.high %v1003_v52, %v1007_v53  ;;  %v4301_v56 = vld [vmem:[#allocation10 + $0xd0] sm:$0xff]  }
 0x2b7   :  { %2636 = vmatpush1.bf16.msra.mxu1 %v3840_v51  ;;  %v3896_v51 = vcombine.low %v1002_v23, %v1006_v62  ;;  %v4308_v23 = vld [vmem:[#allocation10 + $0x60] sm:$0xff]  }
 0x2b8   :  { %2742 = vmatpush1.bf16.msra.mxu0 %v3842_v40  ;;  %2637 = vmatprep.subr.bf16.mxu1 %v3849_v44  ;;  %v3898_v40 = vcombine.low %v1003_v52, %v1007_v53  ;;  %v3905_v44 = vcombine.high %v1010_v13, %v1014_v24  ;;  %v4309_v62 = vld [vmem:[#allocation10 + $0xe0] sm:$0xff]  }
 0x2b9   :  { %2743 = vmatprep.subr.bf16.mxu0 %v3851_v63  ;;  %v3907_v63 = vcombine.high %v1011_v25, %v1015_v26  ;;  %v4310_v52 = vld [vmem:[#allocation10 + $0x20] sm:$0xff]  }
 0x2ba   :  { %v4311_v53 = vld [vmem:[#allocation10 + $0xa0] sm:$0xff]  }
 0x2bb   :  { %2638 = vmatpush1.bf16.msra.mxu1 %v3848_v14  ;;  %v3904_v14 = vcombine.low %v1010_v13, %v1014_v24  ;;  %v4317_v13 = vld [vmem:[#allocation10 + $0xf0] sm:$0xff]  }
 0x2bc   :  { %2744 = vmatpush1.bf16.msra.mxu0 %v3850_v10  ;;  %2639 = vmatprep.subr.bf16.mxu1 %v3857_v18  ;;  %v3906_v10 = vcombine.low %v1011_v25, %v1015_v26  ;;  %v3913_v18 = vcombine.high %v1018_v1, %v1022_v9  ;;  %v4318_v24 = vld [vmem:[#allocation10 + $0x30] sm:$0xff]   ;;  %v4320_v26 = vld [vmem:[#allocation10 + $0x78] sm:$0xff]  }
 0x2bd   :  { %2745 = vmatprep.subr.bf16.mxu0 %v3859_v20  ;;  %v3915_v20 = vcombine.high %v1019_v12, %v1023_v11  ;;  %v4319_v25 = vld [vmem:[#allocation10 + $0xb0] sm:$0xff]  }
 0x2bf   :  { %2640 = vmatpush1.bf16.msra.mxu1 %v3856_v29  ;;  %v3912_v29 = vcombine.low %v1018_v1, %v1022_v9  ;;  %v4325_v1 = vld [vmem:[#allocation10 + $0x1c0] sm:$0xff]   ;;  %v4787_v9 = vld [vmem:[%s4831_s6] sm:$0xff] }
 0x2c0   :  { %2746 = vmatpush1.bf16.msra.mxu0 %v3858_v30  ;;  %2641 = vmatprep.subr.bf16.mxu1 %v3865_v31  ;;  %v3914_v30 = vcombine.low %v1019_v12, %v1023_v11  ;;  %v3921_v31 = vcombine.high %v1026_v21, %v1030_v22  ;;  %v1045_v12 = vrot.slane %v4787_v9, %v4639_v17 }
 0x2c1   :  { %2747 = vmatprep.subr.bf16.mxu0 %v3867_v32  ;;  %v3923_v32 = vcombine.high %v1027_v27, %v1031_v28  ;;  %v1053_v11 = vrot.slane %v4787_v9, %v308_v0 }
 0x2c3   :  { %2642 = vmatpush1.bf16.msra.mxu1 %v3864_v37  ;;  %v3920_v37 = vcombine.low %v1026_v21, %v1030_v22 }
 0x2c4   :  { %2748 = vmatpush1.bf16.msra.mxu0 %v3866_v38  ;;  %2643 = vmatprep.subr.bf16.mxu1 %v3873_v3  ;;  %v3922_v38 = vcombine.low %v1027_v27, %v1031_v28  ;;  %v3929_v3 = vcombine.high %v1034_v33, %v1038_v34 }
 0x2c5   :  { %2749 = vmatprep.subr.bf16.mxu0 %v3875_v4  ;;  %v3931_v4 = vcombine.high %v1035_v35, %v1039_v36 }
 0x2c7   :  { %2644 = vmatpush1.bf16.msra.mxu1 %v3872_v45  ;;  %v4294_v45 = vld [vmem:[#allocation10] sm:$0xff]  }
 0x2c8   :  { %2750 = vmatpush1.bf16.msra.mxu0 %v3874_v46  ;;  %2645 = vmatprep.subr.bf16.mxu1 %v3881_v47  ;;  %v4295_v46 = vld [vmem:[#allocation10 + $0x80] sm:$0xff]   ;;  %v4296_v47 = vld [vmem:[#allocation10 + $0x48] sm:$0xff]  }
 0x2c9   :  { %2751 = vmatprep.subr.bf16.mxu0 %v3883_v15  ;;  %v4297_v15 = vld [vmem:[#allocation10 + $0xc8] sm:$0xff]  }
 0x2cb   :  { %2646 = vmatpush1.bf16.msra.mxu1 %v3880_v55  ;;  %v4302_v55 = vld [vmem:[#allocation10 + $0x10] sm:$0xff]  }
 0x2cc   :  { %2752 = vmatpush1.bf16.msra.mxu0 %v3882_v57  ;;  %2647 = vmatprep.subr.bf16.mxu1 %v3889_v58  ;;  %v4303_v57 = vld [vmem:[#allocation10 + $0x90] sm:$0xff]   ;;  %v4304_v58 = vld [vmem:[#allocation10 + $0x58] sm:$0xff]  }
 0x2cd   :  { %2753 = vmatprep.subr.bf16.mxu0 %v3891_v60  ;;  %v4307_v60 = vld [vmem:[#allocation10 + $0x98] sm:$0xff]  }
 0x2cf   :  { %2648 = vmatpush1.bf16.msra.mxu1 %v3888_v7  ;;  %v4312_v7 = vld [vmem:[#allocation10 + $0x68] sm:$0xff]  }
 0x2d0   :  { %2754 = vmatpush1.bf16.msra.mxu0 %v3890_v8  ;;  %2649 = vmatprep.subr.bf16.mxu1 %v3897_v39  ;;  %v4313_v8 = vld [vmem:[#allocation10 + $0xe8] sm:$0xff]  }
 0x2d1   :  { %2755 = vmatprep.subr.bf16.mxu0 %v3899_v54  ;;  %v4314_v39 = vld [vmem:[#allocation10 + $0x28] sm:$0xff]   ;;  %v4316_v54 = vld [vmem:[#allocation10 + $0x70] sm:$0xff]  }
 0x2d3   :  { %2650 = vmatpush1.bf16.msra.mxu1 %v3896_v51  ;;  %v4321_v51 = vld [vmem:[#allocation10 + $0xf8] sm:$0xff]  }
 0x2d4   :  { %2756 = vmatpush1.bf16.msra.mxu0 %v3898_v40  ;;  %2651 = vmatprep.subr.bf16.mxu1 %v3905_v44  ;;  %v4322_v40 = vld [vmem:[#allocation10 + $0x38] sm:$0xff]  }
 0x2d5   :  { %2757 = vmatprep.subr.bf16.mxu0 %v3907_v63  ;;  %v4323_v44 = vld [vmem:[#allocation10 + $0xb8] sm:$0xff]   ;;  %v4324_v63 = vld [vmem:[#allocation10 + $0x140] sm:$0xff]  }
 0x2d7   :  { %2652 = vmatpush1.bf16.msra.mxu1 %v3904_v14  ;;  %v1049_v14 = vrot.slane %v4787_v9, %v4645_v19 }
 0x2d8   :  { %2758 = vmatpush1.bf16.msra.mxu0 %v3906_v10  ;;  %2653 = vmatprep.subr.bf16.mxu1 %v3913_v18  ;;  %v1057_v10 = vrot.slane %v4787_v9, %v312_v2 }
 0x2d9   :  { %2759 = vmatprep.subr.bf16.mxu0 %v3915_v20 }
 0x2db   :  { %2654 = vmatpush1.bf16.msra.mxu1 %v3912_v29 }
 0x2dc   :  { %2760 = vmatpush1.bf16.msra.mxu0 %v3914_v30  ;;  %2655 = vmatprep.subr.bf16.mxu1 %v3921_v31 }
 0x2dd   :  { %2761 = vmatprep.subr.bf16.mxu0 %v3923_v32 }
 0x2df   :  { %2656 = vmatpush1.bf16.msra.mxu1 %v3920_v37 }
 0x2e0   :  { %2762 = vmatpush1.bf16.msra.mxu0 %v3922_v38  ;;  %2657 = vmatprep.subr.bf16.mxu1 %v3929_v3 }
 0x2e1   :  { %2763 = vmatprep.subr.bf16.mxu0 %v3931_v4 }
 0x2e3   :  { %2658 = vmatpush1.bf16.msra.mxu1 %v3928_v41 }
 0x2e4   :  { %2764 = vmatpush1.bf16.msra.mxu0 %v3930_v42  ;;  %3997 = vmatprep.subr.bf16.mxu1 %v4292_v5 }
 0x2e5   :  { %4025 = vmatprep.subr.bf16.mxu0 %v4293_v6 }
 0x2e6   :  { %2660 = vmatmul.mubr.bf16.vlgmr.msra.gmra.mrb[16].mxu1 %v4712_v59 }
 0x2e7   :  { %2766 = vmatmul.mubr.bf16.vlgmr.msra.gmra.mrb[24].mxu0 %v4712_v59  ;;  %2669 = vmatprep.mubr.bf16.mxu1 %v4751_v43  ;;  %v4305_v59 = vld [vmem:[#allocation10 + $0xd8] sm:$0xff]  }
 0x2e8   :  { %2775 = vmatprep.mubr.bf16.mxu0 %v4751_v43  ;;  %3998 = vmatpush3.bf16.msra.mxu1 %v4294_v45  ;;  %v4306_v43 = vld [vmem:[#allocation10 + $0x18] sm:$0xff]  }
 0x2e9   :  { %4026 = vmatpush3.bf16.msra.mxu0 %v4295_v46  ;;  %3999 = vmatprep.subr.bf16.mxu1 %v4296_v47 }
 0x2ea   :  { %4027 = vmatprep.subr.bf16.mxu0 %v4297_v15 }
 0x2ec   :  { %4000 = vmatpush3.bf16.msra.mxu1 %v4298_v48 }
 0x2ed   :  { %4028 = vmatpush3.bf16.msra.mxu0 %v4299_v49  ;;  %4001 = vmatprep.subr.bf16.mxu1 %v4300_v50 }
 0x2ee   :  { %2670 = vmatmul.mubr.bf16.gmra.mrb[20].mxu1 %v4741_v61  ;;  %4029 = vmatprep.subr.bf16.mxu0 %v4301_v56 }
 0x2ef   :  { %2776 = vmatmul.mubr.bf16.gmra.mrb[28].mxu0 %v4741_v61  ;;  %v4315_v61 = vld [vmem:[#allocation10 + $0xa8] sm:$0xff]  }
 0x2f0   :  { %4002 = vmatpush3.bf16.msra.mxu1 %v4302_v55 }
 0x2f1   :  { %4030 = vmatpush3.bf16.msra.mxu0 %v4303_v57  ;;  %4003 = vmatprep.subr.bf16.mxu1 %v4304_v58 }
 0x2f2   :  { %4031 = vmatprep.subr.bf16.mxu0 %v4305_v59 }
 0x2f4   :  { %4004 = vmatpush3.bf16.msra.mxu1 %v4306_v43 }
 0x2f5   :  { %4032 = vmatpush3.bf16.msra.mxu0 %v4307_v60  ;;  %4005 = vmatprep.subr.bf16.mxu1 %v4308_v23  ;;  %v4326_v23 = vld [vmem:[#allocation10 + $0x100] sm:$0xff]  }
 0x2f6   :  { %4033 = vmatprep.subr.bf16.mxu0 %v4309_v62 }
 0x2f8   :  { %4006 = vmatpush3.bf16.msra.mxu1 %v4310_v52 }
 0x2f9   :  { %4034 = vmatpush3.bf16.msra.mxu0 %v4311_v53  ;;  %4007 = vmatprep.subr.bf16.mxu1 %v4312_v7 }
 0x2fa   :  { %4035 = vmatprep.subr.bf16.mxu0 %v4313_v8 }
 0x2fc   :  { %4008 = vmatpush3.bf16.msra.mxu1 %v4314_v39 }
 0x2fd   :  { %4036 = vmatpush3.bf16.msra.mxu0 %v4315_v61  ;;  %4009 = vmatprep.subr.bf16.mxu1 %v4316_v54  ;;  %v4327_v61 = vld [vmem:[#allocation10 + $0x180] sm:$0xff]   ;;  %v4328_v54 = vld [vmem:[#allocation10 + $0x148] sm:$0xff]  }
 0x2fe   :  { %4037 = vmatprep.subr.bf16.mxu0 %v4317_v13  ;;  %v4329_v13 = vld [vmem:[#allocation10 + $0x1c8] sm:$0xff]  }
 0x300   :  { %4010 = vmatpush3.bf16.msra.mxu1 %v4318_v24 }
 0x301   :  { %4038 = vmatpush3.bf16.msra.mxu0 %v4319_v25  ;;  %4011 = vmatprep.subr.bf16.mxu1 %v4320_v26 }
 0x302   :  { %4039 = vmatprep.subr.bf16.mxu0 %v4321_v51 }
 0x304   :  { %4012 = vmatpush3.bf16.msra.mxu1 %v4322_v40 }
 0x305   :  { %4040 = vmatpush3.bf16.msra.mxu0 %v4323_v44  ;;  %4053 = vmatprep.subr.bf16.mxu1 %v4324_v63 }
 0x306   :  { %4081 = vmatprep.subr.bf16.mxu0 %v4325_v1 }
 0x338   :  { %v2449_v18 = vpop.f32.mrb[8].mxu1  ;;  %v2555_v20 = vpop.f32.mrb[16].mxu0 }
 0x339   :  { %v4109_v21 = vadd.f32 %v2449_v18, %v1045_v12  ;;  %v4117_v22 = vadd.f32 %v2555_v20, %v1053_v11  ;;  %v2451_v27 = vpop.f32.mrb[9].mxu1  ;;  %v2557_v28 = vpop.f32.mrb[17].mxu0 }
 0x33a   :  { %v4110_v29 = vadd.f32 %v2451_v27, %v1049_v14  ;;  %v4118_v30 = vadd.f32 %v2557_v28, %v1057_v10  ;;  %v2453_v17 = vpop.f32.mrb[10].mxu1  ;;  %v2559_v31 = vpop.f32.mrb[18].mxu0 }
 0x33b   :  { %v2786_v32 = vmul.f32 0.01, %v4109_v21  ;;  %v2788_v33 = vmul.f32 0.01, %v4117_v22  ;;  %v4111_v0 = vadd.f32 %v2453_v17, %v1045_v12  ;;  %v4119_v34 = vadd.f32 %v2559_v31, %v1053_v11  ;;  %v2455_v35 = vpop.f32.mrb[11].mxu1  ;;  %v2561_v19 = vpop.f32.mrb[19].mxu0 }
 0x33c   :  { %v2787_v36 = vmul.f32 0.01, %v4110_v29  ;;  %v2789_v37 = vmul.f32 0.01, %v4118_v30  ;;  %v4112_v38 = vadd.f32 %v2455_v35, %v1049_v14  ;;  %v4120_v2 = vadd.f32 %v2561_v19, %v1057_v10 }
 0x33d   :  { %v2794_v3 = vmul.f32 0.01, %v4111_v0  ;;  %v2796_v4 = vmul.f32 0.01, %v4119_v34  ;;  %v2818_v5 = vmax.f32 %v4109_v21, %v2786_v32  ;;  %v2820_v6 = vmax.f32 %v4117_v22, %v2788_v33 }
 0x33e   :  { %v2795_v41 = vmul.f32 0.01, %v4112_v38  ;;  %v2797_v42 = vmul.f32 0.01, %v4120_v2  ;;  %v2819_v47 = vmax.f32 %v4110_v29, %v2787_v36  ;;  %v2821_v15 = vmax.f32 %v4118_v30, %v2789_v37  ;;  %v4330_v30 = vld [vmem:[#allocation10 + $0x108] sm:$0xff]  }
 0x33f   :  { %v2826_v45 = vmax.f32 %v4111_v0, %v2794_v3  ;;  %v2828_v46 = vmax.f32 %v4119_v34, %v2796_v4  ;;  %v4336_v3 = vld [vmem:[#allocation10 + $0x158] sm:$0xff]  }
 0x340   :  { %v2827_v48 = vmax.f32 %v4112_v38, %v2795_v41  ;;  %v2829_v49 = vmax.f32 %v4120_v2, %v2797_v42  ;;  %v2459_v50 = vpop.f32.mrb[12].mxu1  ;;  %v2565_v56 = vpop.f32.mrb[20].mxu0  ;;  %v4334_v38 = vld [vmem:[#allocation10 + $0x110] sm:$0xff]   ;;  %v4337_v4 = vld [vmem:[#allocation10 + $0x1d8] sm:$0xff]  }
 0x341   :  { %v2850_v55 = vpack.c.bf16 %v2826_v45, %v2818_v5  ;;  %v2852_v57 = vpack.c.bf16 %v2828_v46, %v2820_v6  ;;  %v4113_v58 = vadd.f32 %v2459_v50, %v1045_v12  ;;  %v4121_v59 = vadd.f32 %v2565_v56, %v1053_v11  ;;  %v2461_v43 = vpop.f32.mrb[13].mxu1  ;;  %v2567_v60 = vpop.f32.mrb[21].mxu0  ;;  %v4335_v2 = vld [vmem:[#allocation10 + $0x190] sm:$0xff]   ;;  %v4338_v41 = vld [vmem:[#allocation10 + $0x118] sm:$0xff]   ;;  %v4340_v5 = vld [vmem:[#allocation10 + $0x160] sm:$0xff]  }
 0x342   :  { %v4114_v62 = vadd.f32 %v2461_v43, %v1049_v14  ;;  %v4122_v52 = vadd.f32 %v2567_v60, %v1057_v10  ;;  %v2463_v53 = vpop.f32.mrb[14].mxu1  ;;  %v2569_v7 = vpop.f32.mrb[22].mxu0  ;;  %v2851_v8 = vpack.c.bf16 %v2827_v48, %v2819_v47  ;;  %v2853_v39 = vpack.c.bf16 %v2829_v49, %v2821_v15  ;;  %v4339_v42 = vld [vmem:[#allocation10 + $0x198] sm:$0xff]   ;;  %v4341_v6 = vld [vmem:[#allocation10 + $0x1e0] sm:$0xff]   ;;  %v4344_v47 = vld [vmem:[#allocation10 + $0x168] sm:$0xff]  }
 0x343   :  { %v2802_v24 = vmul.f32 0.01, %v4113_v58  ;;  %v2804_v25 = vmul.f32 0.01, %v4121_v59  ;;  %v4115_v26 = vadd.f32 %v2463_v53, %v1045_v12  ;;  %v4123_v51 = vadd.f32 %v2569_v7, %v1053_v11  ;;  %v2465_v40 = vpop.f32.mrb[15].mxu1  ;;  %v2571_v44 = vpop.f32.mrb[23].mxu0 }
 0x344   :  { %v2803_v63 = vmul.f32 0.01, %v4114_v62  ;;  %v2805_v1 = vmul.f32 0.01, %v4122_v52  ;;  %v4116_v18 = vadd.f32 %v2465_v40, %v1049_v14  ;;  %v4124_v20 = vadd.f32 %v2571_v44, %v1057_v10  ;;  %3417 = vmatprep.mubr.bf16.mxu1 %v2851_v8  ;;  %3466 = vmatprep.mubr.bf16.mxu0 %v2853_v39  ;;  %v4331_v12 = vld [vmem:[#allocation10 + $0x188] sm:$0xff]   ;;  %v4332_v14 = vld [vmem:[#allocation10 + $0x150] sm:$0xff]  }
 0x345   :  { %v2810_v21 = vmul.f32 0.01, %v4115_v26  ;;  %v2812_v22 = vmul.f32 0.01, %v4123_v51  ;;  %3418 = vmatmul.mubr.bf16.vlgmr.msra.gmra.mrb[24].mxu1 %v2850_v55  ;;  %3467 = vmatmul.mubr.bf16.vlgmr.msra.gmra.mrb[32].mxu0 %v2852_v57  ;;  %v2834_v27 = vmax.f32 %v4113_v58, %v2802_v24  ;;  %v2836_v11 = vmax.f32 %v4121_v59, %v2804_v25  ;;  %v4333_v10 = vld [vmem:[#allocation10 + $0x1d0] sm:$0xff]   ;;  %v4342_v45 = vld [vmem:[#allocation10 + $0x120] sm:$0xff]  }
 0x346   :  { %v2811_v28 = vmul.f32 0.01, %v4116_v18  ;;  %v2813_v29 = vmul.f32 0.01, %v4124_v20  ;;  %4054 = vmatpush3.bf16.msra.mxu1 %v4326_v23  ;;  %4082 = vmatpush3.bf16.msra.mxu0 %v4327_v61  ;;  %v2835_v32 = vmax.f32 %v4114_v62, %v2803_v63  ;;  %v2837_v33 = vmax.f32 %v4122_v52, %v2805_v1  ;;  %v4343_v46 = vld [vmem:[#allocation10 + $0x1a0] sm:$0xff]   ;;  %v4345_v15 = vld [vmem:[#allocation10 + $0x1e8] sm:$0xff]  }
 0x347   :  { %v2842_v17 = vmax.f32 %v4115_v26, %v2810_v21  ;;  %v2844_v31 = vmax.f32 %v4123_v51, %v2812_v22  ;;  %4055 = vmatprep.subr.bf16.mxu1 %v4328_v54  ;;  %4083 = vmatprep.subr.bf16.mxu0 %v4329_v13  ;;  %v4346_v48 = vld [vmem:[#allocation10 + $0x128] sm:$0xff]   ;;  %v4348_v50 = vld [vmem:[#allocation10 + $0x170] sm:$0xff]   ;;  %v4352_v58 = vld [vmem:[#allocation10 + $0x178] sm:$0xff]   ;;  %v1060_v23 = vsub.s32 4, %v4636_v16  ;;  %v1068_v62 = vsub.s32 6, %v4636_v16 }
 0x348   :  { %v2843_v0 = vmax.f32 %v4116_v18, %v2811_v28  ;;  %v2845_v34 = vmax.f32 %v4124_v20, %v2813_v29  ;;  %v4347_v49 = vld [vmem:[#allocation10 + $0x1a8] sm:$0xff]   ;;  %v4349_v56 = vld [vmem:[#allocation10 + $0x1f0] sm:$0xff]   ;;  %v4353_v59 = vld [vmem:[#allocation10 + $0x1f8] sm:$0xff]   ;;  %v1064_v52 = vsub.s32 5, %v4636_v16  ;;  %v1072_v53 = vsub.s32 7, %v4636_v16 }
 0x349   :  { %v2858_v35 = vpack.c.bf16 %v2842_v17, %v2834_v27  ;;  %v2860_v19 = vpack.c.bf16 %v2844_v31, %v2836_v11  ;;  %v4350_v55 = vld [vmem:[#allocation10 + $0x130] sm:$0xff]   ;;  %v4354_v43 = vld [vmem:[#allocation10 + $0x138] sm:$0xff]   ;;  %v1061_v7 = vrot.slane %v4787_v9, %v1060_v23  ;;  %v1069_v8 = vrot.slane %v4787_v9, %v1068_v62 }
 0x34a   :  { %v2859_v36 = vpack.c.bf16 %v2843_v0, %v2835_v32  ;;  %v2861_v37 = vpack.c.bf16 %v2845_v34, %v2837_v33  ;;  %4056 = vmatpush3.bf16.msra.mxu1 %v4330_v30  ;;  %4084 = vmatpush3.bf16.msra.mxu0 %v4331_v12  ;;  %v4351_v57 = vld [vmem:[#allocation10 + $0x1b0] sm:$0xff]   ;;  %v4355_v60 = vld [vmem:[#allocation10 + $0x1b8] sm:$0xff]   ;;  %v1065_v39 = vrot.slane %v4787_v9, %v1064_v52 }
 0x34b   :  { %4057 = vmatprep.subr.bf16.mxu1 %v4332_v14  ;;  %4085 = vmatprep.subr.bf16.mxu0 %v4333_v10  ;;  %v1073_v61 = vrot.slane %v4787_v9, %v1072_v53 }
 0x34c   :  { %3425 = vmatprep.mubr.bf16.mxu1 %v2859_v36  ;;  %3474 = vmatprep.mubr.bf16.mxu0 %v2861_v37 }
 0x34d   :  { %3426 = vmatmul.mubr.bf16.gmra.mrb[28].mxu1 %v2858_v35  ;;  %3475 = vmatmul.mubr.bf16.gmra.mrb[36].mxu0 %v2860_v19 }
 0x34e   :  { %4058 = vmatpush3.bf16.msra.mxu1 %v4334_v38  ;;  %4086 = vmatpush3.bf16.msra.mxu0 %v4335_v2 }
 0x34f   :  { %4059 = vmatprep.subr.bf16.mxu1 %v4336_v3  ;;  %4087 = vmatprep.subr.bf16.mxu0 %v4337_v4 }
 0x352   :  { %4060 = vmatpush3.bf16.msra.mxu1 %v4338_v41  ;;  %4088 = vmatpush3.bf16.msra.mxu0 %v4339_v42 }
 0x353   :  { %4061 = vmatprep.subr.bf16.mxu1 %v4340_v5  ;;  %4089 = vmatprep.subr.bf16.mxu0 %v4341_v6 }
 0x356   :  { %4062 = vmatpush3.bf16.msra.mxu1 %v4342_v45  ;;  %4090 = vmatpush3.bf16.msra.mxu0 %v4343_v46 }
 0x357   :  { %4063 = vmatprep.subr.bf16.mxu1 %v4344_v47  ;;  %4091 = vmatprep.subr.bf16.mxu0 %v4345_v15 }
 0x35a   :  { %4064 = vmatpush3.bf16.msra.mxu1 %v4346_v48  ;;  %4092 = vmatpush3.bf16.msra.mxu0 %v4347_v49 }
 0x35b   :  { %4065 = vmatprep.subr.bf16.mxu1 %v4348_v50  ;;  %4093 = vmatprep.subr.bf16.mxu0 %v4349_v56 }
 0x35e   :  { %4066 = vmatpush3.bf16.msra.mxu1 %v4350_v55  ;;  %4094 = vmatpush3.bf16.msra.mxu0 %v4351_v57 }
 0x35f   :  { %4067 = vmatprep.subr.bf16.mxu1 %v4352_v58  ;;  %4095 = vmatprep.subr.bf16.mxu0 %v4353_v59 }
 0x362   :  { %4068 = vmatpush3.bf16.msra.mxu1 %v4354_v43  ;;  %4096 = vmatpush3.bf16.msra.mxu0 %v4355_v60 }
 0x3b9   :  { %v2661_v54 = vpop.f32.mrb[16].mxu1 }
 0x3ba   :  { %v4125_v13 = vadd.f32 %v2661_v54, %v1061_v7  ;;  %v2767_v24 = vpop.f32.mrb[24].mxu0  ;;  %v2663_v25 = vpop.f32.mrb[17].mxu1 }
 0x3bb   :  { %v4133_v26 = vadd.f32 %v2767_v24, %v1069_v8  ;;  %v4126_v51 = vadd.f32 %v2663_v25, %v1065_v39  ;;  %v2769_v40 = vpop.f32.mrb[25].mxu0  ;;  %v2665_v44 = vpop.f32.mrb[18].mxu1 }
 0x3bc   :  { %v2790_v63 = vmul.f32 0.01, %v4125_v13  ;;  %v4134_v1 = vadd.f32 %v2769_v40, %v1073_v61  ;;  %v4127_v18 = vadd.f32 %v2665_v44, %v1061_v7  ;;  %v2771_v16 = vpop.f32.mrb[26].mxu0  ;;  %v2667_v20 = vpop.f32.mrb[19].mxu1 }
 0x3bd   :  { %v2792_v21 = vmul.f32 0.01, %v4133_v26  ;;  %v2791_v22 = vmul.f32 0.01, %v4126_v51  ;;  %v4135_v27 = vadd.f32 %v2771_v16, %v1069_v8  ;;  %v4128_v28 = vadd.f32 %v2667_v20, %v1065_v39  ;;  %v2773_v29 = vpop.f32.mrb[27].mxu0 }
 0x3be   :  { %v2793_v30 = vmul.f32 0.01, %v4134_v1  ;;  %v2798_v9 = vmul.f32 0.01, %v4127_v18  ;;  %v4136_v12 = vadd.f32 %v2773_v29, %v1073_v61  ;;  %v2822_v31 = vmax.f32 %v4125_v13, %v2790_v63 }
 0x3bf   :  { %v2800_v11 = vmul.f32 0.01, %v4135_v27  ;;  %v2799_v17 = vmul.f32 0.01, %v4128_v28  ;;  %v2824_v32 = vmax.f32 %v4133_v26, %v2792_v21  ;;  %v2823_v33 = vmax.f32 %v4126_v51, %v2791_v22 }
 0x3c0   :  { %v2830_v14 = vmax.f32 %v4127_v18, %v2798_v9  ;;  %v2801_v10 = vmul.f32 0.01, %v4136_v12  ;;  %v2825_v19 = vmax.f32 %v4134_v1, %v2793_v30  ;;  %v3932_v18 = vld [vmem:[%s4833_s8] ss:$0 sm:$0xff]  ;;  %s4510_s8 = smov [#allocation11]  }
 0x3c1   :  { %v2832_v0 = vmax.f32 %v4135_v27, %v2800_v11  ;;  %v2831_v34 = vmax.f32 %v4128_v28, %v2799_v17  ;;  %v2671_v35 = vpop.f32.mrb[20].mxu1  ;;  %s3590_s15 = sshll.u32 %s4510_s8, 4  ;;  %s3591_s15 = int_to_ptr.vmem [resolvable:$true] %s3590_s15 }
 0x3c2   :  { %v2854_v36 = vpack.c.bf16 %v2830_v14, %v2822_v31  ;;  %v2833_v37 = vmax.f32 %v4136_v12, %v2801_v10  ;;  %v4129_v38 = vadd.f32 %v2671_v35, %v1061_v7  ;;  %v2777_v2 = vpop.f32.mrb[28].mxu0  ;;  %v2673_v3 = vpop.f32.mrb[21].mxu1  ;;  %s4466_s17 = scalar_lea.vmem %s3591_s15, 512  ;;  %p4471_p13 = scmp.lt.s32.totalorder %s3591_s15, %s3591_s15 }
 0x3c3   :  { %v2856_v4 = vpack.c.bf16 %v2832_v0, %v2824_v32  ;;  %v4137_v41 = vadd.f32 %v2777_v2, %v1069_v8  ;;  %v4130_v42 = vadd.f32 %v2673_v3, %v1065_v39  ;;  %v2779_v5 = vpop.f32.mrb[29].mxu0  ;;  %v2675_v6 = vpop.f32.mrb[22].mxu1  ;;  %v2855_v45 = vpack.c.bf16 %v2831_v34, %v2823_v33  ;;  %p4467_p12 = scmp.ne.s32.totalorder %s3591_s15, %s4466_s17  ;;  %p4472_p0 = scmp.lt.s32.totalorder %s4466_s17, %s4466_s17 }
 0x3c4   :  { %v2806_v46 = vmul.f32 0.01, %v4129_v38  ;;  %v4138_v47 = vadd.f32 %v2779_v5, %v1073_v61  ;;  %v4131_v15 = vadd.f32 %v2675_v6, %v1061_v7  ;;  %v2781_v48 = vpop.f32.mrb[30].mxu0  ;;  %v2677_v49 = vpop.f32.mrb[23].mxu1  ;;  %v2857_v50 = vpack.c.bf16 %v2833_v37, %v2825_v19 }
 0x3c5   :  { %v2808_v56 = vmul.f32 0.01, %v4137_v41  ;;  %v2807_v55 = vmul.f32 0.01, %v4130_v42  ;;  %v4139_v57 = vadd.f32 %v2781_v48, %v1069_v8  ;;  %v4132_v58 = vadd.f32 %v2677_v49, %v1065_v39  ;;  %v2783_v59 = vpop.f32.mrb[31].mxu0  ;;  %3515 = vmatprep.mubr.bf16.mxu1 %v2855_v45  ;;  %p4473_p1 = por %p4472_p0, %p4471_p13 }
 0x3c6   :  { %v2809_v43 = vmul.f32 0.01, %v4138_v47  ;;  %v2814_v60 = vmul.f32 0.01, %v4131_v15  ;;  %v4140_v23 = vadd.f32 %v2783_v59, %v1073_v61  ;;  %3564 = vmatprep.mubr.bf16.mxu0 %v2857_v50  ;;  %3516 = vmatmul.mubr.bf16.vlgmr.msra.gmra.mrb[32].mxu1 %v2854_v36  ;;  %v2838_v53 = vmax.f32 %v4129_v38, %v2806_v46 }
 0x3c7   :  { %v2816_v62 = vmul.f32 0.01, %v4139_v57  ;;  %v2815_v52 = vmul.f32 0.01, %v4132_v58  ;;  %3565 = vmatmul.mubr.bf16.vlgmr.msra.gmra.mrb[40].mxu0 %v2856_v4  ;;  %v2840_v13 = vmax.f32 %v4137_v41, %v2808_v56  ;;  %v2839_v24 = vmax.f32 %v4130_v42, %v2807_v55  ;;  %p4474_p2 = pnand %p4473_p1, %p4467_p12 }
 0x3c8   :  { %v2846_v54 = vmax.f32 %v4131_v15, %v2814_v60  ;;  %v2817_v7 = vmul.f32 0.01, %v4140_v23  ;;  %v2841_v51 = vmax.f32 %v4138_v47, %v2809_v43 }
 0x3c9   :  { %v2848_v25 = vmax.f32 %v4139_v57, %v2816_v62  ;;  %v2847_v26 = vmax.f32 %v4132_v58, %v2815_v52 }
 0x3ca   :  { %v2849_v8 = vmax.f32 %v4140_v23, %v2817_v7  ;;  %v2862_v39 = vpack.c.bf16 %v2846_v54, %v2838_v53 }
 0x3cb   :  { %v2863_v40 = vpack.c.bf16 %v2847_v26, %v2839_v24  ;;  %v2864_v44 = vpack.c.bf16 %v2848_v25, %v2840_v13 }
 0x3cc   :  { %v2865_v63 = vpack.c.bf16 %v2849_v8, %v2841_v51 }
 0x3cd   :  { %3523 = vmatprep.mubr.bf16.mxu1 %v2863_v40 }
 0x3ce   :  { %3572 = vmatprep.mubr.bf16.mxu0 %v2865_v63  ;;  %3524 = vmatmul.mubr.bf16.gmra.mrb[36].mxu1 %v2862_v39 }
 0x3cf   :  { %3573 = vmatmul.mubr.bf16.gmra.mrb[44].mxu0 %v2864_v44 }
 0x418   :  { %v4013_v61 = vpop.f32.mrb[24].mxu1  ;;  %v4041_v1 = vpop.f32.mrb[32].mxu0 }
 0x419   :  { %v4014_v16 = vpop.f32.mrb[25].mxu1  ;;  %v4042_v20 = vpop.f32.mrb[33].mxu0 }
 0x41a   :  { %v4015_v21 = vadd.f32 %v4014_v16, %v4013_v61  ;;  %v4043_v22 = vadd.f32 %v4042_v20, %v4041_v1  ;;  %v4016_v27 = vpop.f32.mrb[26].mxu1  ;;  %v4044_v28 = vpop.f32.mrb[34].mxu0 }
 0x41b   :  { %v4017_v29 = vpop.f32.mrb[27].mxu1  ;;  %v4045_v30 = vpop.f32.mrb[35].mxu0 }
 0x41c   :  { %v3420_v9 = vadd.f32 %v4015_v21, %v3932_v18  ;;  %v4018_v12 = vadd.f32 %v4017_v29, %v4016_v27  ;;  %v4046_v11 = vadd.f32 %v4045_v30, %v4044_v28 }
 0x41e   :  { %v3469_v17 = vadd.f32 %v4043_v22, %v3420_v9  ;;  %v3423_v31 = vadd.f32 %v4018_v12, %v3932_v18 }
 0x420   :  { %v3472_v14 = vadd.f32 %v4046_v11, %v3423_v31  ;;  %v4019_v10 = vpop.f32.mrb[28].mxu1  ;;  %v4047_v32 = vpop.f32.mrb[36].mxu0 }
 0x421   :  { %v4020_v33 = vpop.f32.mrb[29].mxu1  ;;  %v4048_v0 = vpop.f32.mrb[37].mxu0 }
 0x422   :  { %v4021_v34 = vadd.f32 %v4020_v33, %v4019_v10  ;;  %v4049_v35 = vadd.f32 %v4048_v0, %v4047_v32  ;;  %v4022_v19 = vpop.f32.mrb[30].mxu1  ;;  %v4050_v36 = vpop.f32.mrb[38].mxu0 }
 0x423   :  { %v4023_v37 = vpop.f32.mrb[31].mxu1  ;;  %v4051_v38 = vpop.f32.mrb[39].mxu0 }
 0x424   :  { %v3428_v2 = vadd.f32 %v4021_v34, %v3932_v18  ;;  %v4024_v3 = vadd.f32 %v4023_v37, %v4022_v19  ;;  %v4052_v4 = vadd.f32 %v4051_v38, %v4050_v36 }
 0x426   :  { %v3477_v41 = vadd.f32 %v4049_v35, %v3428_v2  ;;  %v3431_v42 = vadd.f32 %v4024_v3, %v3932_v18 }
 0x428   :  { %v3480_v5 = vadd.f32 %v4052_v4, %v3431_v42 }
 0x499   :  { %v4069_v6 = vpop.f32.mrb[32].mxu1 }
 0x49a   :  { %v4097_v45 = vpop.f32.mrb[40].mxu0  ;;  %v4070_v46 = vpop.f32.mrb[33].mxu1 }
 0x49b   :  { %v4071_v47 = vadd.f32 %v4070_v46, %v4069_v6  ;;  %v4098_v15 = vpop.f32.mrb[41].mxu0  ;;  %v4072_v48 = vpop.f32.mrb[34].mxu1 }
 0x49c   :  { %v4099_v49 = vadd.f32 %v4098_v15, %v4097_v45  ;;  %v4100_v50 = vpop.f32.mrb[42].mxu0  ;;  %v4073_v56 = vpop.f32.mrb[35].mxu1 }
 0x49d   :  { %v3518_v55 = vadd.f32 %v4071_v47, %v3469_v17  ;;  %v4074_v57 = vadd.f32 %v4073_v56, %v4072_v48  ;;  %v4101_v58 = vpop.f32.mrb[43].mxu0 }
 0x49e   :  { %v4102_v59 = vadd.f32 %v4101_v58, %v4100_v50 }
 0x49f   :  { %v3567_v43 = vadd.f32 %v4099_v49, %v3518_v55  ;;  %v3521_v60 = vadd.f32 %v4074_v57, %v3472_v14 }
 0x4a1   :  { %3581 = vst [vmem:[#allocation11] sm:$0xff] %v3567_v43  ;;  %v3570_v23 = vadd.f32 %v4102_v59, %v3521_v60  ;;  %v4075_v62 = vpop.f32.mrb[36].mxu1 }
 0x4a2   :  { %v4103_v52 = vpop.f32.mrb[44].mxu0  ;;  %v4076_v53 = vpop.f32.mrb[37].mxu1 }
 0x4a3   :  { %3582 = vst [vmem:[#allocation11 + $0x8] sm:$0xff] %v3570_v23  ;;  %v4077_v54 = vadd.f32 %v4076_v53, %v4075_v62  ;;  %v4104_v7 = vpop.f32.mrb[45].mxu0  ;;  %v4078_v13 = vpop.f32.mrb[38].mxu1 }
 0x4a4   :  { %v4105_v24 = vadd.f32 %v4104_v7, %v4103_v52  ;;  %v4106_v25 = vpop.f32.mrb[46].mxu0  ;;  %v4079_v26 = vpop.f32.mrb[39].mxu1 }
 0x4a5   :  { %v3526_v51 = vadd.f32 %v4077_v54, %v3477_v41  ;;  %v4080_v8 = vadd.f32 %v4079_v26, %v4078_v13  ;;  %v4107_v39 = vpop.f32.mrb[47].mxu0 }
 0x4a6   :  { %v4108_v40 = vadd.f32 %v4107_v39, %v4106_v25 }
 0x4a7   :  { %v3575_v44 = vadd.f32 %v4105_v24, %v3526_v51  ;;  %v3529_v63 = vadd.f32 %v4080_v8, %v3480_v5 }
 0x4a9   :  { %3583 = vst [vmem:[#allocation11 + $0x10] sm:$0xff] %v3575_v44  ;;  %v3578_v61 = vadd.f32 %v4108_v40, %v3529_v63 }
 0x4ab   :  { %3584 = vst [vmem:[#allocation11 + $0x18] sm:$0xff] %v3578_v61 }
 0x4ac   :  { %4477 = shalt.err (!%p4474_p2)
}
 0x4ad   :  { %s4478_s16 = scalar_lea.hbm %s4834_s9, 512 }
 0x4ae   :  { %p4479_p3 = scmp.ne.s32.totalorder %s4834_s9, %s4478_s16  ;;  %p4482_p4 = scmp.lt.u32.totalorder %s4478_s16, %s4834_s9 }
 0x4b0   :  { %p4484_p5 = pnand %p4482_p4, %p4479_p3 }
 0x4b2   :  { %4487 = shalt.err (!%p4484_p5)
}
 0x4b3   :  { %3596 = dma.vmem_to_hbm [thread:$0]  %s3591_s15, 512, %s4834_s9, [#allocation4], %s4497_s19, %s4497_s19, %s4498_s20  }
 0x4b4   :  { %4494 = dma.done.wait [#allocation4], 512  }
 0x4b5   :  { %4495 = vsyncadd [#allocation4], 4294966784 }
 0x4b6   :  { %3600 = vsyncpa [#allocation3], 1 }
 0x4b7   :  { %3601 = vsyncpa [#allocation6], 1 }
 0x4b8   :  { %3602 = vsyncpa [#allocation9], 1 }
 0x4b9   :  { %3603 = vsyncpa [#allocation4], 1 }

</bundles_post_ra>
